<compile_context>
chip_gen: v5e
topology: v5e:2x2
jax: 0.10.0
libtpu: 0.0.40
codegen_flags: <defaults>
</compile_context>

<pallas_src>
import jax
import jax.numpy as jnp
from jax.experimental import pallas as pl
from jax.experimental.pallas import tpu as pltpu

# ---- small, self-consistent hyperparameters (same structure as the module) ----
VOCAB_SIZE = 65        # e.g. tiny-shakespeare charset size
N_EMBD = 64
N_HEAD = 4
HEAD_SIZE = N_EMBD // N_HEAD
N_LAYER = 2
BLOCK_SIZE = 16        # max context length
BATCH = 2
SEQ = 16               # T (== BLOCK_SIZE here)
LN_EPS = 1e-5
VPAD = 128             # lm_head lane padding (65 -> 128 lanes, unmasked stores)
MM_DTYPE = jnp.bfloat16  # MXU input dtype; accumulation stays float32


def _layernorm(x, w, b):
    # x: (R, C) f32; w, b: (1, C) f32 (kept 2-D for friendlier lane layout)
    mu = jnp.mean(x, axis=-1, keepdims=True)
    var = jnp.mean(jnp.square(x - mu), axis=-1, keepdims=True)
    return (x - mu) * jax.lax.rsqrt(var + LN_EPS) * w + b


def _mm(a, w):
    # f32 activations cast to bf16 x bf16 weights -> f32 accumulation on the MXU.
    return jnp.dot(a.astype(MM_DTYPE), w, preferred_element_type=jnp.float32)


# --------------------------------------------------------------------------
# Fused forward kernel: all decoder blocks + final LN + lm_head in one call.
# Weight refs carry a leading layer axis; the layer loop is unrolled at trace
# time so everything stays resident in VMEM / vregs.
# --------------------------------------------------------------------------
def gpt_fused_kernel(x_ref, wqkv_ref, wproj_ref, w1_ref, w2_ref,
                     vec_ref, b1_ref, lnf_ref, lmw_ref, lmb_ref,
                     o_ref, attn_ref):
    B, T, C, H, D = BATCH, SEQ, N_EMBD, N_HEAD, HEAD_SIZE
    scale = 1.0 / (D ** 0.5)

    x = x_ref[...]                                           # (BT, C) f32

    # Causal additive bias, computed ONCE (hoisted out of layer/head loops).
    row = jax.lax.broadcasted_iota(jnp.int32, (T, T), 0)
    col = jax.lax.broadcasted_iota(jnp.int32, (T, T), 1)
    causal_bias = jnp.where(row >= col, 0.0, -1e9).astype(jnp.float32)   # (T,T)

    for l in range(N_LAYER):                                 # unrolled (static)
        vecs = vec_ref[l]        # (6, C): ln1_w ln1_b ln2_w ln2_b bproj b2

        # ---- multi-head causal self-attention on LN1(x) ----
        xn = _layernorm(x, vecs[0:1, :], vecs[1:2, :])       # (BT, C)
        qkv = _mm(xn, wqkv_ref[l])                           # (BT, 3C) fused QKV

        for b in range(B):                                   # unrolled
            r0 = b * T
            for h in range(H):                               # unrolled
                qh = qkv[r0:r0 + T, h * D:(h + 1) * D] * scale            # (T, D)
                kh = qkv[r0:r0 + T, C + h * D:C + (h + 1) * D]            # (T, D)
                vh = qkv[r0:r0 + T, 2 * C + h * D:2 * C + (h + 1) * D]    # (T, D)
                # q @ k^T without an explicit transpose (contract last axes).
                s = jax.lax.dot_general(qh, kh, (((1,), (1,)), ((), ())),
                                        preferred_element_type=jnp.float32)
                wei = s + causal_bias
                wei = wei - jnp.max(wei, axis=-1, keepdims=True)
                p = jnp.exp(wei)
                p = p * pl.reciprocal(jnp.sum(p, axis=-1, keepdims=True),
                                      approx=True)
                oh = jnp.dot(p, vh, preferred_element_type=jnp.float32)   # (T, D)
                # write into the scratch slab instead of lane-axis concatenate
                attn_ref[r0:r0 + T, h * D:(h + 1) * D] = oh

        sa = _mm(attn_ref[...], wproj_ref[l]) + vecs[4:5, :]  # (BT, C)
        x = x + sa                                            # residual

        # ---- feed-forward on LN2(x) ----
        xn2 = _layernorm(x, vecs[2:3, :], vecs[3:4, :])
        h1 = jnp.maximum(_mm(xn2, w1_ref[l]) + b1_ref[l], 0.0)  # (BT, 4C) ReLU
        ff = _mm(h1, w2_ref[l]) + vecs[5:6, :]
        x = x + ff                                              # residual

    # ---- final LayerNorm + lm_head (lane-padded output) ----
    xn = _layernorm(x, lnf_ref[0:1, :], lnf_ref[1:2, :])
    o_ref[...] = _mm(xn, lmw_ref[...]) + lmb_ref[...]


def gpt_pallas_forward(x2, params):
    BT, C = x2.shape
    L = N_LAYER

    def full(shape):
        return pl.BlockSpec(shape, lambda i, s=shape: (0,) * len(s))

    return pl.pallas_call(
        gpt_fused_kernel,
        out_shape=jax.ShapeDtypeStruct((BT, VPAD), jnp.float32),
        grid=(1,),
        in_specs=[
            full((BT, C)),               # x (flattened activations)
            full((L, C, 3 * C)),         # fused QKV weights
            full((L, C, C)),             # attn output projection
            full((L, C, 4 * C)),         # FFN w1
            full((L, 4 * C, C)),         # FFN w2
            full((L, 6, C)),             # LN params + small biases pack
            full((L, 1, 4 * C)),         # FFN b1
            full((2, C)),                # final LN (w, b)
            full((C, VPAD)),             # lm_head weight (lane-padded)
            full((1, VPAD)),             # lm_head bias (lane-padded)
        ],
        out_specs=full((BT, VPAD)),
        scratch_shapes=[pltpu.VMEM((BT, C), jnp.float32)],     # head-output slab
        compiler_params=pltpu.CompilerParams(
            dimension_semantics=("arbitrary",)),
    )(x2, params["wqkv"], params["wproj"], params["w1"], params["w2"],
      params["vecs"], params["b1"], params["lnf"],
      params["lm_w"], params["lm_b"])


# --------------------------------------------------------------------------
# Parameter init (deterministic, synthetic) and forward pass.
# --------------------------------------------------------------------------
def init_params(key):
    C, V, L = N_EMBD, VOCAB_SIZE, N_LAYER
    keys = jax.random.split(key, 8)

    def w(k, shape, scale=0.02):
        return (scale * jax.random.normal(k, shape)).astype(jnp.float32)

    # Per-layer LN / bias pack rows: [ln1_w, ln1_b, ln2_w, ln2_b, bproj, b2]
    row_vals = jnp.array([1.0, 0.0, 1.0, 0.0, 0.0, 0.0], jnp.float32)
    vecs = row_vals[None, :, None] * jnp.ones((L, 6, C), jnp.float32)

    lm_w = jnp.zeros((C, VPAD), jnp.float32).at[:, :V].set(w(keys[6], (C, V)))

    return {
        "tok_emb": w(keys[0], (V, C)),
        "pos_emb": w(keys[1], (BLOCK_SIZE, C)),
        "wqkv":  w(keys[2], (L, C, 3 * C)).astype(MM_DTYPE),
        "wproj": w(keys[3], (L, C, C)).astype(MM_DTYPE),
        "w1":    w(keys[4], (L, C, 4 * C)).astype(MM_DTYPE),
        "w2":    w(keys[5], (L, 4 * C, C)).astype(MM_DTYPE),
        "b1":    jnp.zeros((L, 1, 4 * C), jnp.float32),
        "vecs":  vecs,
        "lnf":   jnp.concatenate([jnp.ones((1, C), jnp.float32),
                                  jnp.zeros((1, C), jnp.float32)], axis=0),
        "lm_w":  lm_w.astype(MM_DTYPE),
        "lm_b":  jnp.zeros((1, VPAD), jnp.float32),
    }


@jax.jit
def gpt_forward(params, idx):
    """idx: (B, T) int32 token ids -> logits (B, T, vocab).  (targets=None path)"""
    B, T = idx.shape
    C = N_EMBD
    # glue: embedding gather + positional embedding add (plain JAX)
    tok = jnp.take(params["tok_emb"], idx, axis=0)           # (B, T, C)
    pos = params["pos_emb"][:T]                              # (T, C)
    x2 = (tok + pos[None, :, :]).astype(jnp.float32).reshape(B * T, C)

    out = gpt_pallas_forward(x2, params)                     # (B*T, VPAD)
    logits = out.reshape(B, T, VPAD)[:, :, :VOCAB_SIZE]      # drop lane padding
    return logits


# --------------------------------------------------------------------------
# Pure-JAX reference (same params, f32 everywhere) for a correctness check.
# --------------------------------------------------------------------------
def gpt_reference(params, idx):
    B, T = idx.shape
    C, H, D = N_EMBD, N_HEAD, HEAD_SIZE

    def ln(x, w, b):
        mu = jnp.mean(x, -1, keepdims=True)
        var = jnp.mean(jnp.square(x - mu), -1, keepdims=True)
        return (x - mu) * jax.lax.rsqrt(var + LN_EPS) * w + b

    tok = jnp.take(params["tok_emb"], idx, axis=0)
    pos = params["pos_emb"][:T]
    x = (tok + pos[None]).astype(jnp.float32)                # (B, T, C)
    mask = jnp.tril(jnp.ones((T, T), bool))

    for l in range(N_LAYER):
        vecs = params["vecs"][l]
        wqkv = params["wqkv"][l].astype(jnp.float32)
        wproj = params["wproj"][l].astype(jnp.float32)
        w1 = params["w1"][l].astype(jnp.float32)
        w2 = params["w2"][l].astype(jnp.float32)
        b1 = params["b1"][l]

        xn = ln(x, vecs[0], vecs[1])
        qkv = xn @ wqkv                                      # (B, T, 3C)
        q, k, v = jnp.split(qkv, 3, axis=-1)
        q = q.reshape(B, T, H, D).transpose(0, 2, 1, 3)
        k = k.reshape(B, T, H, D).transpose(0, 2, 1, 3)
        v = v.reshape(B, T, H, D).transpose(0, 2, 1, 3)
        s = jnp.einsum("bhtd,bhsd->bhts", q, k) * (D ** -0.5)
        s = jnp.where(mask[None, None], s, -jnp.inf)
        p = jax.nn.softmax(s, axis=-1)
        o = jnp.einsum("bhts,bhsd->bhtd", p, v).transpose(0, 2, 1, 3).reshape(B, T, C)
        x = x + o @ wproj + vecs[4]

        xn2 = ln(x, vecs[2], vecs[3])
        h1 = jax.nn.relu(xn2 @ w1 + b1)
        x = x + h1 @ w2 + vecs[5]

    xn = ln(x, params["lnf"][0], params["lnf"][1])
    logits = xn @ params["lm_w"].astype(jnp.float32) + params["lm_b"]
    return logits[:, :, :VOCAB_SIZE]


if __name__ == "__main__":
    params = init_params(jax.random.PRNGKey(0))
    idx = jax.random.randint(jax.random.PRNGKey(1), (BATCH, SEQ), 0, VOCAB_SIZE,
                             dtype=jnp.int32)

    logits = gpt_forward(params, idx)
    logits = jax.block_until_ready(logits)

    assert logits.shape == (BATCH, SEQ, VOCAB_SIZE)
    assert bool(jnp.all(jnp.isfinite(logits)))

    ref = gpt_reference(params, idx)
    max_err = float(jnp.max(jnp.abs(logits - ref)))
    assert max_err < 5e-2, f"mismatch vs reference: max_err={max_err}"

    print("KERNEL_OK")
</pallas_src>

<mosaic_0001>
module attributes {stable_mosaic.version = 11 : i64} {
  func.func @gpt_fused_kernel(%arg0: i32, %arg1: memref<32x64xf32, #tpu.memory_space<vmem>>, %arg2: memref<2x64x192xbf16, #tpu.memory_space<vmem>>, %arg3: memref<2x64x64xbf16, #tpu.memory_space<vmem>>, %arg4: memref<2x64x256xbf16, #tpu.memory_space<vmem>>, %arg5: memref<2x256x64xbf16, #tpu.memory_space<vmem>>, %arg6: memref<2x6x64xf32, #tpu.memory_space<vmem>>, %arg7: memref<2x1x256xf32, #tpu.memory_space<vmem>>, %arg8: memref<2x64xf32, #tpu.memory_space<vmem>>, %arg9: memref<64x128xbf16, #tpu.memory_space<vmem>>, %arg10: memref<1x128xf32, #tpu.memory_space<vmem>>, %arg11: memref<32x128xf32, #tpu.memory_space<vmem>>, %arg12: memref<32x64xf32, #tpu.memory_space<vmem>>) attributes {dimension_semantics = [#tpu.dimension_semantics<arbitrary>], iteration_bounds = array<i64: 1>, scalar_prefetch = 0 : i64, scratch_operands = 1 : i64, tpu.core_type = #tpu.core_type<tc>, window_params = [{pipeline_mode = #tpu.pipeline_mode<synchronous>, transform_indices = @transform_0, window_bounds = array<i64: 32, 64>}, {pipeline_mode = #tpu.pipeline_mode<synchronous>, transform_indices = @transform_1, window_bounds = array<i64: 2, 64, 192>}, {pipeline_mode = #tpu.pipeline_mode<synchronous>, transform_indices = @transform_2, window_bounds = array<i64: 2, 64, 64>}, {pipeline_mode = #tpu.pipeline_mode<synchronous>, transform_indices = @transform_3, window_bounds = array<i64: 2, 64, 256>}, {pipeline_mode = #tpu.pipeline_mode<synchronous>, transform_indices = @transform_4, window_bounds = array<i64: 2, 256, 64>}, {pipeline_mode = #tpu.pipeline_mode<synchronous>, transform_indices = @transform_5, window_bounds = array<i64: 2, 6, 64>}, {pipeline_mode = #tpu.pipeline_mode<synchronous>, transform_indices = @transform_6, window_bounds = array<i64: 2, 1, 256>}, {pipeline_mode = #tpu.pipeline_mode<synchronous>, transform_indices = @transform_7, window_bounds = array<i64: 2, 64>}, {pipeline_mode = #tpu.pipeline_mode<synchronous>, transform_indices = @transform_8, window_bounds = array<i64: 64, 128>}, {pipeline_mode = #tpu.pipeline_mode<synchronous>, transform_indices = @transform_9, window_bounds = array<i64: 1, 128>}, {pipeline_mode = #tpu.pipeline_mode<synchronous>, transform_indices = @transform_10, window_bounds = array<i64: 32, 128>}]} {
    %c0 = arith.constant 0 : index
    %c0_0 = arith.constant 0 : index
    %0 = vector.load %arg1[%c0, %c0_0] : memref<32x64xf32, #tpu.memory_space<vmem>>, vector<32x64xf32>
    %1 = tpu.iota {dimensions = array<i32: 0>} : vector<16x16xi32>
    %2 = tpu.iota {dimensions = array<i32: 1>} : vector<16x16xi32>
    %3 = arith.cmpi sge, %1, %2 : vector<16x16xi32>
    %cst = arith.constant 0.000000e+00 : f32
    %cst_1 = arith.constant -1.000000e+09 : f32
    %4 = vector.broadcast %cst : f32 to vector<16x16xf32>
    %5 = vector.broadcast %cst_1 : f32 to vector<16x16xf32>
    %6 = arith.select %3, %4, %5 : vector<16x16xi1>, vector<16x16xf32>
    %c0_2 = arith.constant 0 : index
    %c0_3 = arith.constant 0 : index
    %c0_4 = arith.constant 0 : index
    %7 = vector.load %arg6[%c0_2, %c0_3, %c0_4] : memref<2x6x64xf32, #tpu.memory_space<vmem>>, vector<1x6x64xf32>
    %8 = vector.shape_cast %7 : vector<1x6x64xf32> to vector<6x64xf32>
    %9 = vector.extract_strided_slice %8 {offsets = [0, 0], sizes = [1, 64], strides = [1, 1]} : vector<6x64xf32> to vector<1x64xf32>
    %10 = vector.extract_strided_slice %8 {offsets = [1, 0], sizes = [1, 64], strides = [1, 1]} : vector<6x64xf32> to vector<1x64xf32>
    %cst_5 = arith.constant dense<0.000000e+00> : vector<32xf32>
    %11 = vector.multi_reduction <add>, %0, %cst_5 [1] : vector<32x64xf32> to vector<32xf32>
    %12 = vector.shape_cast %11 : vector<32xf32> to vector<32x1xf32>
    %cst_6 = arith.constant 6.400000e+01 : f32
    %13 = vector.broadcast %cst_6 : f32 to vector<32x1xf32>
    %14 = arith.divf %12, %13 : vector<32x1xf32>
    %15 = vector.broadcast %14 : vector<32x1xf32> to vector<32x64xf32>
    %16 = arith.subf %0, %15 : vector<32x64xf32>
    %17 = arith.mulf %16, %16 : vector<32x64xf32>
    %cst_7 = arith.constant dense<0.000000e+00> : vector<32xf32>
    %18 = vector.multi_reduction <add>, %17, %cst_7 [1] : vector<32x64xf32> to vector<32xf32>
    %19 = vector.shape_cast %18 : vector<32xf32> to vector<32x1xf32>
    %cst_8 = arith.constant 6.400000e+01 : f32
    %20 = vector.broadcast %cst_8 : f32 to vector<32x1xf32>
    %21 = arith.divf %19, %20 : vector<32x1xf32>
    %22 = vector.broadcast %14 : vector<32x1xf32> to vector<32x64xf32>
    %23 = arith.subf %0, %22 : vector<32x64xf32>
    %cst_9 = arith.constant 9.99999974E-6 : f32
    %24 = vector.broadcast %cst_9 : f32 to vector<32x1xf32>
    %25 = arith.addf %21, %24 : vector<32x1xf32>
    %26 = math.rsqrt %25 : vector<32x1xf32>
    %27 = vector.broadcast %26 : vector<32x1xf32> to vector<32x64xf32>
    %28 = arith.mulf %23, %27 : vector<32x64xf32>
    %29 = vector.broadcast %9 : vector<1x64xf32> to vector<32x64xf32>
    %30 = arith.mulf %28, %29 : vector<32x64xf32>
    %31 = vector.broadcast %10 : vector<1x64xf32> to vector<32x64xf32>
    %32 = arith.addf %30, %31 : vector<32x64xf32>
    %c0_10 = arith.constant 0 : index
    %c0_11 = arith.constant 0 : index
    %c0_12 = arith.constant 0 : index
    %33 = vector.load %arg2[%c0_10, %c0_11, %c0_12] : memref<2x64x192xbf16, #tpu.memory_space<vmem>>, vector<1x64x192xbf16>
    %34 = vector.shape_cast %33 : vector<1x64x192xbf16> to vector<64x192xbf16>
    %35 = arith.truncf %32 : vector<32x64xf32> to vector<32x64xbf16>
    %cst_13 = arith.constant dense<0.000000e+00> : vector<32x192xf32>
    %36 = tpu.matmul %35, %34, %cst_13 {dimension_numbers = #tpu.dot_dimension_numbers<[1], [0], [0], [1], [0, 0, 1, 1], [], []>} : vector<32x64xbf16>, vector<64x192xbf16>, vector<32x192xf32> -> vector<32x192xf32>
    %37 = vector.extract_strided_slice %36 {offsets = [0, 0], sizes = [16, 16], strides = [1, 1]} : vector<32x192xf32> to vector<16x16xf32>
    %cst_14 = arith.constant 2.500000e-01 : f32
    %38 = vector.broadcast %cst_14 : f32 to vector<16x16xf32>
    %39 = arith.mulf %37, %38 : vector<16x16xf32>
    %40 = vector.extract_strided_slice %36 {offsets = [0, 64], sizes = [16, 16], strides = [1, 1]} : vector<32x192xf32> to vector<16x16xf32>
    %41 = vector.extract_strided_slice %36 {offsets = [0, 128], sizes = [16, 16], strides = [1, 1]} : vector<32x192xf32> to vector<16x16xf32>
    %cst_15 = arith.constant dense<0.000000e+00> : vector<16x16xf32>
    %42 = tpu.matmul %39, %40, %cst_15 {dimension_numbers = #tpu.dot_dimension_numbers<[1], [1], [0], [0], [0, 0, 1, 0], [], []>} : vector<16x16xf32>, vector<16x16xf32>, vector<16x16xf32> -> vector<16x16xf32>
    %43 = arith.addf %42, %6 : vector<16x16xf32>
    %cst_16 = arith.constant dense<0xFF800000> : vector<16xf32>
    %44 = vector.multi_reduction <maximumf>, %43, %cst_16 [1] : vector<16x16xf32> to vector<16xf32>
    %45 = vector.shape_cast %44 : vector<16xf32> to vector<16x1xf32>
    %46 = vector.broadcast %45 : vector<16x1xf32> to vector<16x16xf32>
    %47 = arith.subf %43, %46 : vector<16x16xf32>
    %48 = math.exp %47 : vector<16x16xf32>
    %cst_17 = arith.constant dense<0.000000e+00> : vector<16xf32>
    %49 = vector.multi_reduction <add>, %48, %cst_17 [1] : vector<16x16xf32> to vector<16xf32>
    %50 = vector.shape_cast %49 : vector<16xf32> to vector<16x1xf32>
    %51 = tpu.reciprocal %50 {approx = true} : vector<16x1xf32> -> vector<16x1xf32>
    %52 = vector.broadcast %51 : vector<16x1xf32> to vector<16x16xf32>
    %53 = arith.mulf %48, %52 : vector<16x16xf32>
    %cst_18 = arith.constant dense<0.000000e+00> : vector<16x16xf32>
    %54 = tpu.matmul %53, %41, %cst_18 {dimension_numbers = #tpu.dot_dimension_numbers<[1], [0], [0], [1], [0, 0, 1, 1], [], []>} : vector<16x16xf32>, vector<16x16xf32>, vector<16x16xf32> -> vector<16x16xf32>
    %c0_19 = arith.constant 0 : index
    %c0_20 = arith.constant 0 : index
    %55 = vector.load %arg12[%c0_19, %c0_20] : memref<32x64xf32, #tpu.memory_space<vmem>>, vector<16x16xf32>
    tpu.vector_store %arg12[%c0_19, %c0_20], %54 {strides = array<i32>} : memref<32x64xf32, #tpu.memory_space<vmem>>, vector<16x16xf32>,
    %56 = vector.extract_strided_slice %36 {offsets = [0, 16], sizes = [16, 16], strides = [1, 1]} : vector<32x192xf32> to vector<16x16xf32>
    %cst_21 = arith.constant 2.500000e-01 : f32
    %57 = vector.broadcast %cst_21 : f32 to vector<16x16xf32>
    %58 = arith.mulf %56, %57 : vector<16x16xf32>
    %59 = vector.extract_strided_slice %36 {offsets = [0, 80], sizes = [16, 16], strides = [1, 1]} : vector<32x192xf32> to vector<16x16xf32>
    %60 = vector.extract_strided_slice %36 {offsets = [0, 144], sizes = [16, 16], strides = [1, 1]} : vector<32x192xf32> to vector<16x16xf32>
    %cst_22 = arith.constant dense<0.000000e+00> : vector<16x16xf32>
    %61 = tpu.matmul %58, %59, %cst_22 {dimension_numbers = #tpu.dot_dimension_numbers<[1], [1], [0], [0], [0, 0, 1, 0], [], []>} : vector<16x16xf32>, vector<16x16xf32>, vector<16x16xf32> -> vector<16x16xf32>
    %62 = arith.addf %61, %6 : vector<16x16xf32>
    %cst_23 = arith.constant dense<0xFF800000> : vector<16xf32>
    %63 = vector.multi_reduction <maximumf>, %62, %cst_23 [1] : vector<16x16xf32> to vector<16xf32>
    %64 = vector.shape_cast %63 : vector<16xf32> to vector<16x1xf32>
    %65 = vector.broadcast %64 : vector<16x1xf32> to vector<16x16xf32>
    %66 = arith.subf %62, %65 : vector<16x16xf32>
    %67 = math.exp %66 : vector<16x16xf32>
    %cst_24 = arith.constant dense<0.000000e+00> : vector<16xf32>
    %68 = vector.multi_reduction <add>, %67, %cst_24 [1] : vector<16x16xf32> to vector<16xf32>
    %69 = vector.shape_cast %68 : vector<16xf32> to vector<16x1xf32>
    %70 = tpu.reciprocal %69 {approx = true} : vector<16x1xf32> -> vector<16x1xf32>
    %71 = vector.broadcast %70 : vector<16x1xf32> to vector<16x16xf32>
    %72 = arith.mulf %67, %71 : vector<16x16xf32>
    %cst_25 = arith.constant dense<0.000000e+00> : vector<16x16xf32>
    %73 = tpu.matmul %72, %60, %cst_25 {dimension_numbers = #tpu.dot_dimension_numbers<[1], [0], [0], [1], [0, 0, 1, 1], [], []>} : vector<16x16xf32>, vector<16x16xf32>, vector<16x16xf32> -> vector<16x16xf32>
    %c0_26 = arith.constant 0 : index
    %c16 = arith.constant 16 : index
    %74 = vector.load %arg12[%c0_26, %c16] : memref<32x64xf32, #tpu.memory_space<vmem>>, vector<16x16xf32>
    tpu.vector_store %arg12[%c0_26, %c16], %73 {strides = array<i32>} : memref<32x64xf32, #tpu.memory_space<vmem>>, vector<16x16xf32>,
    %75 = vector.extract_strided_slice %36 {offsets = [0, 32], sizes = [16, 16], strides = [1, 1]} : vector<32x192xf32> to vector<16x16xf32>
    %cst_27 = arith.constant 2.500000e-01 : f32
    %76 = vector.broadcast %cst_27 : f32 to vector<16x16xf32>
    %77 = arith.mulf %75, %76 : vector<16x16xf32>
    %78 = vector.extract_strided_slice %36 {offsets = [0, 96], sizes = [16, 16], strides = [1, 1]} : vector<32x192xf32> to vector<16x16xf32>
    %79 = vector.extract_strided_slice %36 {offsets = [0, 160], sizes = [16, 16], strides = [1, 1]} : vector<32x192xf32> to vector<16x16xf32>
    %cst_28 = arith.constant dense<0.000000e+00> : vector<16x16xf32>
    %80 = tpu.matmul %77, %78, %cst_28 {dimension_numbers = #tpu.dot_dimension_numbers<[1], [1], [0], [0], [0, 0, 1, 0], [], []>} : vector<16x16xf32>, vector<16x16xf32>, vector<16x16xf32> -> vector<16x16xf32>
    %81 = arith.addf %80, %6 : vector<16x16xf32>
    %cst_29 = arith.constant dense<0xFF800000> : vector<16xf32>
    %82 = vector.multi_reduction <maximumf>, %81, %cst_29 [1] : vector<16x16xf32> to vector<16xf32>
    %83 = vector.shape_cast %82 : vector<16xf32> to vector<16x1xf32>
    %84 = vector.broadcast %83 : vector<16x1xf32> to vector<16x16xf32>
    %85 = arith.subf %81, %84 : vector<16x16xf32>
    %86 = math.exp %85 : vector<16x16xf32>
    %cst_30 = arith.constant dense<0.000000e+00> : vector<16xf32>
    %87 = vector.multi_reduction <add>, %86, %cst_30 [1] : vector<16x16xf32> to vector<16xf32>
    %88 = vector.shape_cast %87 : vector<16xf32> to vector<16x1xf32>
    %89 = tpu.reciprocal %88 {approx = true} : vector<16x1xf32> -> vector<16x1xf32>
    %90 = vector.broadcast %89 : vector<16x1xf32> to vector<16x16xf32>
    %91 = arith.mulf %86, %90 : vector<16x16xf32>
    %cst_31 = arith.constant dense<0.000000e+00> : vector<16x16xf32>
    %92 = tpu.matmul %91, %79, %cst_31 {dimension_numbers = #tpu.dot_dimension_numbers<[1], [0], [0], [1], [0, 0, 1, 1], [], []>} : vector<16x16xf32>, vector<16x16xf32>, vector<16x16xf32> -> vector<16x16xf32>
    %c0_32 = arith.constant 0 : index
    %c32 = arith.constant 32 : index
    %93 = vector.load %arg12[%c0_32, %c32] : memref<32x64xf32, #tpu.memory_space<vmem>>, vector<16x16xf32>
    tpu.vector_store %arg12[%c0_32, %c32], %92 {strides = array<i32>} : memref<32x64xf32, #tpu.memory_space<vmem>>, vector<16x16xf32>,
    %94 = vector.extract_strided_slice %36 {offsets = [0, 48], sizes = [16, 16], strides = [1, 1]} : vector<32x192xf32> to vector<16x16xf32>
    %cst_33 = arith.constant 2.500000e-01 : f32
    %95 = vector.broadcast %cst_33 : f32 to vector<16x16xf32>
    %96 = arith.mulf %94, %95 : vector<16x16xf32>
    %97 = vector.extract_strided_slice %36 {offsets = [0, 112], sizes = [16, 16], strides = [1, 1]} : vector<32x192xf32> to vector<16x16xf32>
    %98 = vector.extract_strided_slice %36 {offsets = [0, 176], sizes = [16, 16], strides = [1, 1]} : vector<32x192xf32> to vector<16x16xf32>
    %cst_34 = arith.constant dense<0.000000e+00> : vector<16x16xf32>
    %99 = tpu.matmul %96, %97, %cst_34 {dimension_numbers = #tpu.dot_dimension_numbers<[1], [1], [0], [0], [0, 0, 1, 0], [], []>} : vector<16x16xf32>, vector<16x16xf32>, vector<16x16xf32> -> vector<16x16xf32>
    %100 = arith.addf %99, %6 : vector<16x16xf32>
    %cst_35 = arith.constant dense<0xFF800000> : vector<16xf32>
    %101 = vector.multi_reduction <maximumf>, %100, %cst_35 [1] : vector<16x16xf32> to vector<16xf32>
    %102 = vector.shape_cast %101 : vector<16xf32> to vector<16x1xf32>
    %103 = vector.broadcast %102 : vector<16x1xf32> to vector<16x16xf32>
    %104 = arith.subf %100, %103 : vector<16x16xf32>
    %105 = math.exp %104 : vector<16x16xf32>
    %cst_36 = arith.constant dense<0.000000e+00> : vector<16xf32>
    %106 = vector.multi_reduction <add>, %105, %cst_36 [1] : vector<16x16xf32> to vector<16xf32>
    %107 = vector.shape_cast %106 : vector<16xf32> to vector<16x1xf32>
    %108 = tpu.reciprocal %107 {approx = true} : vector<16x1xf32> -> vector<16x1xf32>
    %109 = vector.broadcast %108 : vector<16x1xf32> to vector<16x16xf32>
    %110 = arith.mulf %105, %109 : vector<16x16xf32>
    %cst_37 = arith.constant dense<0.000000e+00> : vector<16x16xf32>
    %111 = tpu.matmul %110, %98, %cst_37 {dimension_numbers = #tpu.dot_dimension_numbers<[1], [0], [0], [1], [0, 0, 1, 1], [], []>} : vector<16x16xf32>, vector<16x16xf32>, vector<16x16xf32> -> vector<16x16xf32>
    %c0_38 = arith.constant 0 : index
    %c48 = arith.constant 48 : index
    %112 = vector.load %arg12[%c0_38, %c48] : memref<32x64xf32, #tpu.memory_space<vmem>>, vector<16x16xf32>
    tpu.vector_store %arg12[%c0_38, %c48], %111 {strides = array<i32>} : memref<32x64xf32, #tpu.memory_space<vmem>>, vector<16x16xf32>,
    %113 = vector.extract_strided_slice %36 {offsets = [16, 0], sizes = [16, 16], strides = [1, 1]} : vector<32x192xf32> to vector<16x16xf32>
    %cst_39 = arith.constant 2.500000e-01 : f32
    %114 = vector.broadcast %cst_39 : f32 to vector<16x16xf32>
    %115 = arith.mulf %113, %114 : vector<16x16xf32>
    %116 = vector.extract_strided_slice %36 {offsets = [16, 64], sizes = [16, 16], strides = [1, 1]} : vector<32x192xf32> to vector<16x16xf32>
    %117 = vector.extract_strided_slice %36 {offsets = [16, 128], sizes = [16, 16], strides = [1, 1]} : vector<32x192xf32> to vector<16x16xf32>
    %cst_40 = arith.constant dense<0.000000e+00> : vector<16x16xf32>
    %118 = tpu.matmul %115, %116, %cst_40 {dimension_numbers = #tpu.dot_dimension_numbers<[1], [1], [0], [0], [0, 0, 1, 0], [], []>} : vector<16x16xf32>, vector<16x16xf32>, vector<16x16xf32> -> vector<16x16xf32>
    %119 = arith.addf %118, %6 : vector<16x16xf32>
    %cst_41 = arith.constant dense<0xFF800000> : vector<16xf32>
    %120 = vector.multi_reduction <maximumf>, %119, %cst_41 [1] : vector<16x16xf32> to vector<16xf32>
    %121 = vector.shape_cast %120 : vector<16xf32> to vector<16x1xf32>
    %122 = vector.broadcast %121 : vector<16x1xf32> to vector<16x16xf32>
    %123 = arith.subf %119, %122 : vector<16x16xf32>
    %124 = math.exp %123 : vector<16x16xf32>
    %cst_42 = arith.constant dense<0.000000e+00> : vector<16xf32>
    %125 = vector.multi_reduction <add>, %124, %cst_42 [1] : vector<16x16xf32> to vector<16xf32>
    %126 = vector.shape_cast %125 : vector<16xf32> to vector<16x1xf32>
    %127 = tpu.reciprocal %126 {approx = true} : vector<16x1xf32> -> vector<16x1xf32>
    %128 = vector.broadcast %127 : vector<16x1xf32> to vector<16x16xf32>
    %129 = arith.mulf %124, %128 : vector<16x16xf32>
    %cst_43 = arith.constant dense<0.000000e+00> : vector<16x16xf32>
    %130 = tpu.matmul %129, %117, %cst_43 {dimension_numbers = #tpu.dot_dimension_numbers<[1], [0], [0], [1], [0, 0, 1, 1], [], []>} : vector<16x16xf32>, vector<16x16xf32>, vector<16x16xf32> -> vector<16x16xf32>
    %c16_44 = arith.constant 16 : index
    %c0_45 = arith.constant 0 : index
    %131 = vector.load %arg12[%c16_44, %c0_45] : memref<32x64xf32, #tpu.memory_space<vmem>>, vector<16x16xf32>
    tpu.vector_store %arg12[%c16_44, %c0_45], %130 {strides = array<i32>} : memref<32x64xf32, #tpu.memory_space<vmem>>, vector<16x16xf32>,
    %132 = vector.extract_strided_slice %36 {offsets = [16, 16], sizes = [16, 16], strides = [1, 1]} : vector<32x192xf32> to vector<16x16xf32>
    %cst_46 = arith.constant 2.500000e-01 : f32
    %133 = vector.broadcast %cst_46 : f32 to vector<16x16xf32>
    %134 = arith.mulf %132, %133 : vector<16x16xf32>
    %135 = vector.extract_strided_slice %36 {offsets = [16, 80], sizes = [16, 16], strides = [1, 1]} : vector<32x192xf32> to vector<16x16xf32>
    %136 = vector.extract_strided_slice %36 {offsets = [16, 144], sizes = [16, 16], strides = [1, 1]} : vector<32x192xf32> to vector<16x16xf32>
    %cst_47 = arith.constant dense<0.000000e+00> : vector<16x16xf32>
    %137 = tpu.matmul %134, %135, %cst_47 {dimension_numbers = #tpu.dot_dimension_numbers<[1], [1], [0], [0], [0, 0, 1, 0], [], []>} : vector<16x16xf32>, vector<16x16xf32>, vector<16x16xf32> -> vector<16x16xf32>
    %138 = arith.addf %137, %6 : vector<16x16xf32>
    %cst_48 = arith.constant dense<0xFF800000> : vector<16xf32>
    %139 = vector.multi_reduction <maximumf>, %138, %cst_48 [1] : vector<16x16xf32> to vector<16xf32>
    %140 = vector.shape_cast %139 : vector<16xf32> to vector<16x1xf32>
    %141 = vector.broadcast %140 : vector<16x1xf32> to vector<16x16xf32>
    %142 = arith.subf %138, %141 : vector<16x16xf32>
    %143 = math.exp %142 : vector<16x16xf32>
    %cst_49 = arith.constant dense<0.000000e+00> : vector<16xf32>
    %144 = vector.multi_reduction <add>, %143, %cst_49 [1] : vector<16x16xf32> to vector<16xf32>
    %145 = vector.shape_cast %144 : vector<16xf32> to vector<16x1xf32>
    %146 = tpu.reciprocal %145 {approx = true} : vector<16x1xf32> -> vector<16x1xf32>
    %147 = vector.broadcast %146 : vector<16x1xf32> to vector<16x16xf32>
    %148 = arith.mulf %143, %147 : vector<16x16xf32>
    %cst_50 = arith.constant dense<0.000000e+00> : vector<16x16xf32>
    %149 = tpu.matmul %148, %136, %cst_50 {dimension_numbers = #tpu.dot_dimension_numbers<[1], [0], [0], [1], [0, 0, 1, 1], [], []>} : vector<16x16xf32>, vector<16x16xf32>, vector<16x16xf32> -> vector<16x16xf32>
    %c16_51 = arith.constant 16 : index
    %c16_52 = arith.constant 16 : index
    %150 = vector.load %arg12[%c16_51, %c16_52] : memref<32x64xf32, #tpu.memory_space<vmem>>, vector<16x16xf32>
    tpu.vector_store %arg12[%c16_51, %c16_52], %149 {strides = array<i32>} : memref<32x64xf32, #tpu.memory_space<vmem>>, vector<16x16xf32>,
    %151 = vector.extract_strided_slice %36 {offsets = [16, 32], sizes = [16, 16], strides = [1, 1]} : vector<32x192xf32> to vector<16x16xf32>
    %cst_53 = arith.constant 2.500000e-01 : f32
    %152 = vector.broadcast %cst_53 : f32 to vector<16x16xf32>
    %153 = arith.mulf %151, %152 : vector<16x16xf32>
    %154 = vector.extract_strided_slice %36 {offsets = [16, 96], sizes = [16, 16], strides = [1, 1]} : vector<32x192xf32> to vector<16x16xf32>
    %155 = vector.extract_strided_slice %36 {offsets = [16, 160], sizes = [16, 16], strides = [1, 1]} : vector<32x192xf32> to vector<16x16xf32>
    %cst_54 = arith.constant dense<0.000000e+00> : vector<16x16xf32>
    %156 = tpu.matmul %153, %154, %cst_54 {dimension_numbers = #tpu.dot_dimension_numbers<[1], [1], [0], [0], [0, 0, 1, 0], [], []>} : vector<16x16xf32>, vector<16x16xf32>, vector<16x16xf32> -> vector<16x16xf32>
    %157 = arith.addf %156, %6 : vector<16x16xf32>
    %cst_55 = arith.constant dense<0xFF800000> : vector<16xf32>
    %158 = vector.multi_reduction <maximumf>, %157, %cst_55 [1] : vector<16x16xf32> to vector<16xf32>
    %159 = vector.shape_cast %158 : vector<16xf32> to vector<16x1xf32>
    %160 = vector.broadcast %159 : vector<16x1xf32> to vector<16x16xf32>
    %161 = arith.subf %157, %160 : vector<16x16xf32>
    %162 = math.exp %161 : vector<16x16xf32>
    %cst_56 = arith.constant dense<0.000000e+00> : vector<16xf32>
    %163 = vector.multi_reduction <add>, %162, %cst_56 [1] : vector<16x16xf32> to vector<16xf32>
    %164 = vector.shape_cast %163 : vector<16xf32> to vector<16x1xf32>
    %165 = tpu.reciprocal %164 {approx = true} : vector<16x1xf32> -> vector<16x1xf32>
    %166 = vector.broadcast %165 : vector<16x1xf32> to vector<16x16xf32>
    %167 = arith.mulf %162, %166 : vector<16x16xf32>
    %cst_57 = arith.constant dense<0.000000e+00> : vector<16x16xf32>
    %168 = tpu.matmul %167, %155, %cst_57 {dimension_numbers = #tpu.dot_dimension_numbers<[1], [0], [0], [1], [0, 0, 1, 1], [], []>} : vector<16x16xf32>, vector<16x16xf32>, vector<16x16xf32> -> vector<16x16xf32>
    %c16_58 = arith.constant 16 : index
    %c32_59 = arith.constant 32 : index
    %169 = vector.load %arg12[%c16_58, %c32_59] : memref<32x64xf32, #tpu.memory_space<vmem>>, vector<16x16xf32>
    tpu.vector_store %arg12[%c16_58, %c32_59], %168 {strides = array<i32>} : memref<32x64xf32, #tpu.memory_space<vmem>>, vector<16x16xf32>,
    %170 = vector.extract_strided_slice %36 {offsets = [16, 48], sizes = [16, 16], strides = [1, 1]} : vector<32x192xf32> to vector<16x16xf32>
    %cst_60 = arith.constant 2.500000e-01 : f32
    %171 = vector.broadcast %cst_60 : f32 to vector<16x16xf32>
    %172 = arith.mulf %170, %171 : vector<16x16xf32>
    %173 = vector.extract_strided_slice %36 {offsets = [16, 112], sizes = [16, 16], strides = [1, 1]} : vector<32x192xf32> to vector<16x16xf32>
    %174 = vector.extract_strided_slice %36 {offsets = [16, 176], sizes = [16, 16], strides = [1, 1]} : vector<32x192xf32> to vector<16x16xf32>
    %cst_61 = arith.constant dense<0.000000e+00> : vector<16x16xf32>
    %175 = tpu.matmul %172, %173, %cst_61 {dimension_numbers = #tpu.dot_dimension_numbers<[1], [1], [0], [0], [0, 0, 1, 0], [], []>} : vector<16x16xf32>, vector<16x16xf32>, vector<16x16xf32> -> vector<16x16xf32>
    %176 = arith.addf %175, %6 : vector<16x16xf32>
    %cst_62 = arith.constant dense<0xFF800000> : vector<16xf32>
    %177 = vector.multi_reduction <maximumf>, %176, %cst_62 [1] : vector<16x16xf32> to vector<16xf32>
    %178 = vector.shape_cast %177 : vector<16xf32> to vector<16x1xf32>
    %179 = vector.broadcast %178 : vector<16x1xf32> to vector<16x16xf32>
    %180 = arith.subf %176, %179 : vector<16x16xf32>
    %181 = math.exp %180 : vector<16x16xf32>
    %cst_63 = arith.constant dense<0.000000e+00> : vector<16xf32>
    %182 = vector.multi_reduction <add>, %181, %cst_63 [1] : vector<16x16xf32> to vector<16xf32>
    %183 = vector.shape_cast %182 : vector<16xf32> to vector<16x1xf32>
    %184 = tpu.reciprocal %183 {approx = true} : vector<16x1xf32> -> vector<16x1xf32>
    %185 = vector.broadcast %184 : vector<16x1xf32> to vector<16x16xf32>
    %186 = arith.mulf %181, %185 : vector<16x16xf32>
    %cst_64 = arith.constant dense<0.000000e+00> : vector<16x16xf32>
    %187 = tpu.matmul %186, %174, %cst_64 {dimension_numbers = #tpu.dot_dimension_numbers<[1], [0], [0], [1], [0, 0, 1, 1], [], []>} : vector<16x16xf32>, vector<16x16xf32>, vector<16x16xf32> -> vector<16x16xf32>
    %c16_65 = arith.constant 16 : index
    %c48_66 = arith.constant 48 : index
    %188 = vector.load %arg12[%c16_65, %c48_66] : memref<32x64xf32, #tpu.memory_space<vmem>>, vector<16x16xf32>
    tpu.vector_store %arg12[%c16_65, %c48_66], %187 {strides = array<i32>} : memref<32x64xf32, #tpu.memory_space<vmem>>, vector<16x16xf32>,
    %c0_67 = arith.constant 0 : index
    %c0_68 = arith.constant 0 : index
    %189 = vector.load %arg12[%c0_67, %c0_68] : memref<32x64xf32, #tpu.memory_space<vmem>>, vector<32x64xf32>
    %c0_69 = arith.constant 0 : index
    %c0_70 = arith.constant 0 : index
    %c0_71 = arith.constant 0 : index
    %190 = vector.load %arg3[%c0_69, %c0_70, %c0_71] : memref<2x64x64xbf16, #tpu.memory_space<vmem>>, vector<1x64x64xbf16>
    %191 = vector.shape_cast %190 : vector<1x64x64xbf16> to vector<64x64xbf16>
    %192 = arith.truncf %189 : vector<32x64xf32> to vector<32x64xbf16>
    %cst_72 = arith.constant dense<0.000000e+00> : vector<32x64xf32>
    %193 = tpu.matmul %192, %191, %cst_72 {dimension_numbers = #tpu.dot_dimension_numbers<[1], [0], [0], [1], [0, 0, 1, 1], [], []>} : vector<32x64xbf16>, vector<64x64xbf16>, vector<32x64xf32> -> vector<32x64xf32>
    %194 = vector.extract_strided_slice %8 {offsets = [4, 0], sizes = [1, 64], strides = [1, 1]} : vector<6x64xf32> to vector<1x64xf32>
    %195 = vector.broadcast %194 : vector<1x64xf32> to vector<32x64xf32>
    %196 = arith.addf %193, %195 : vector<32x64xf32>
    %197 = arith.addf %0, %196 : vector<32x64xf32>
    %198 = vector.extract_strided_slice %8 {offsets = [2, 0], sizes = [1, 64], strides = [1, 1]} : vector<6x64xf32> to vector<1x64xf32>
    %199 = vector.extract_strided_slice %8 {offsets = [3, 0], sizes = [1, 64], strides = [1, 1]} : vector<6x64xf32> to vector<1x64xf32>
    %cst_73 = arith.constant dense<0.000000e+00> : vector<32xf32>
    %200 = vector.multi_reduction <add>, %197, %cst_73 [1] : vector<32x64xf32> to vector<32xf32>
    %201 = vector.shape_cast %200 : vector<32xf32> to vector<32x1xf32>
    %cst_74 = arith.constant 6.400000e+01 : f32
    %202 = vector.broadcast %cst_74 : f32 to vector<32x1xf32>
    %203 = arith.divf %201, %202 : vector<32x1xf32>
    %204 = vector.broadcast %203 : vector<32x1xf32> to vector<32x64xf32>
    %205 = arith.subf %197, %204 : vector<32x64xf32>
    %206 = arith.mulf %205, %205 : vector<32x64xf32>
    %cst_75 = arith.constant dense<0.000000e+00> : vector<32xf32>
    %207 = vector.multi_reduction <add>, %206, %cst_75 [1] : vector<32x64xf32> to vector<32xf32>
    %208 = vector.shape_cast %207 : vector<32xf32> to vector<32x1xf32>
    %cst_76 = arith.constant 6.400000e+01 : f32
    %209 = vector.broadcast %cst_76 : f32 to vector<32x1xf32>
    %210 = arith.divf %208, %209 : vector<32x1xf32>
    %211 = vector.broadcast %203 : vector<32x1xf32> to vector<32x64xf32>
    %212 = arith.subf %197, %211 : vector<32x64xf32>
    %cst_77 = arith.constant 9.99999974E-6 : f32
    %213 = vector.broadcast %cst_77 : f32 to vector<32x1xf32>
    %214 = arith.addf %210, %213 : vector<32x1xf32>
    %215 = math.rsqrt %214 : vector<32x1xf32>
    %216 = vector.broadcast %215 : vector<32x1xf32> to vector<32x64xf32>
    %217 = arith.mulf %212, %216 : vector<32x64xf32>
    %218 = vector.broadcast %198 : vector<1x64xf32> to vector<32x64xf32>
    %219 = arith.mulf %217, %218 : vector<32x64xf32>
    %220 = vector.broadcast %199 : vector<1x64xf32> to vector<32x64xf32>
    %221 = arith.addf %219, %220 : vector<32x64xf32>
    %c0_78 = arith.constant 0 : index
    %c0_79 = arith.constant 0 : index
    %c0_80 = arith.constant 0 : index
    %222 = vector.load %arg4[%c0_78, %c0_79, %c0_80] : memref<2x64x256xbf16, #tpu.memory_space<vmem>>, vector<1x64x256xbf16>
    %223 = vector.shape_cast %222 : vector<1x64x256xbf16> to vector<64x256xbf16>
    %224 = arith.truncf %221 : vector<32x64xf32> to vector<32x64xbf16>
    %cst_81 = arith.constant dense<0.000000e+00> : vector<32x256xf32>
    %225 = tpu.matmul %224, %223, %cst_81 {dimension_numbers = #tpu.dot_dimension_numbers<[1], [0], [0], [1], [0, 0, 1, 1], [], []>} : vector<32x64xbf16>, vector<64x256xbf16>, vector<32x256xf32> -> vector<32x256xf32>
    %c0_82 = arith.constant 0 : index
    %c0_83 = arith.constant 0 : index
    %c0_84 = arith.constant 0 : index
    %226 = vector.load %arg7[%c0_82, %c0_83, %c0_84] : memref<2x1x256xf32, #tpu.memory_space<vmem>>, vector<1x1x256xf32>
    %227 = vector.shape_cast %226 : vector<1x1x256xf32> to vector<1x256xf32>
    %228 = vector.broadcast %227 : vector<1x256xf32> to vector<32x256xf32>
    %229 = arith.addf %225, %228 : vector<32x256xf32>
    %cst_85 = arith.constant 0.000000e+00 : f32
    %230 = vector.broadcast %cst_85 : f32 to vector<32x256xf32>
    %231 = arith.maximumf %229, %230 : vector<32x256xf32>
    %c0_86 = arith.constant 0 : index
    %c0_87 = arith.constant 0 : index
    %c0_88 = arith.constant 0 : index
    %232 = vector.load %arg5[%c0_86, %c0_87, %c0_88] : memref<2x256x64xbf16, #tpu.memory_space<vmem>>, vector<1x256x64xbf16>
    %233 = vector.shape_cast %232 : vector<1x256x64xbf16> to vector<256x64xbf16>
    %234 = arith.truncf %231 : vector<32x256xf32> to vector<32x256xbf16>
    %cst_89 = arith.constant dense<0.000000e+00> : vector<32x64xf32>
    %235 = tpu.matmul %234, %233, %cst_89 {dimension_numbers = #tpu.dot_dimension_numbers<[1], [0], [0], [1], [0, 0, 1, 1], [], []>} : vector<32x256xbf16>, vector<256x64xbf16>, vector<32x64xf32> -> vector<32x64xf32>
    %236 = vector.extract_strided_slice %8 {offsets = [5, 0], sizes = [1, 64], strides = [1, 1]} : vector<6x64xf32> to vector<1x64xf32>
    %237 = vector.broadcast %236 : vector<1x64xf32> to vector<32x64xf32>
    %238 = arith.addf %235, %237 : vector<32x64xf32>
    %239 = arith.addf %197, %238 : vector<32x64xf32>
    %c1 = arith.constant 1 : index
    %c0_90 = arith.constant 0 : index
    %c0_91 = arith.constant 0 : index
    %240 = vector.load %arg6[%c1, %c0_90, %c0_91] : memref<2x6x64xf32, #tpu.memory_space<vmem>>, vector<1x6x64xf32>
    %241 = vector.shape_cast %240 : vector<1x6x64xf32> to vector<6x64xf32>
    %242 = vector.extract_strided_slice %241 {offsets = [0, 0], sizes = [1, 64], strides = [1, 1]} : vector<6x64xf32> to vector<1x64xf32>
    %243 = vector.extract_strided_slice %241 {offsets = [1, 0], sizes = [1, 64], strides = [1, 1]} : vector<6x64xf32> to vector<1x64xf32>
    %cst_92 = arith.constant dense<0.000000e+00> : vector<32xf32>
    %244 = vector.multi_reduction <add>, %239, %cst_92 [1] : vector<32x64xf32> to vector<32xf32>
    %245 = vector.shape_cast %244 : vector<32xf32> to vector<32x1xf32>
    %cst_93 = arith.constant 6.400000e+01 : f32
    %246 = vector.broadcast %cst_93 : f32 to vector<32x1xf32>
    %247 = arith.divf %245, %246 : vector<32x1xf32>
    %248 = vector.broadcast %247 : vector<32x1xf32> to vector<32x64xf32>
    %249 = arith.subf %239, %248 : vector<32x64xf32>
    %250 = arith.mulf %249, %249 : vector<32x64xf32>
    %cst_94 = arith.constant dense<0.000000e+00> : vector<32xf32>
    %251 = vector.multi_reduction <add>, %250, %cst_94 [1] : vector<32x64xf32> to vector<32xf32>
    %252 = vector.shape_cast %251 : vector<32xf32> to vector<32x1xf32>
    %cst_95 = arith.constant 6.400000e+01 : f32
    %253 = vector.broadcast %cst_95 : f32 to vector<32x1xf32>
    %254 = arith.divf %252, %253 : vector<32x1xf32>
    %255 = vector.broadcast %247 : vector<32x1xf32> to vector<32x64xf32>
    %256 = arith.subf %239, %255 : vector<32x64xf32>
    %cst_96 = arith.constant 9.99999974E-6 : f32
    %257 = vector.broadcast %cst_96 : f32 to vector<32x1xf32>
    %258 = arith.addf %254, %257 : vector<32x1xf32>
    %259 = math.rsqrt %258 : vector<32x1xf32>
    %260 = vector.broadcast %259 : vector<32x1xf32> to vector<32x64xf32>
    %261 = arith.mulf %256, %260 : vector<32x64xf32>
    %262 = vector.broadcast %242 : vector<1x64xf32> to vector<32x64xf32>
    %263 = arith.mulf %261, %262 : vector<32x64xf32>
    %264 = vector.broadcast %243 : vector<1x64xf32> to vector<32x64xf32>
    %265 = arith.addf %263, %264 : vector<32x64xf32>
    %c1_97 = arith.constant 1 : index
    %c0_98 = arith.constant 0 : index
    %c0_99 = arith.constant 0 : index
    %266 = vector.load %arg2[%c1_97, %c0_98, %c0_99] : memref<2x64x192xbf16, #tpu.memory_space<vmem>>, vector<1x64x192xbf16>
    %267 = vector.shape_cast %266 : vector<1x64x192xbf16> to vector<64x192xbf16>
    %268 = arith.truncf %265 : vector<32x64xf32> to vector<32x64xbf16>
    %cst_100 = arith.constant dense<0.000000e+00> : vector<32x192xf32>
    %269 = tpu.matmul %268, %267, %cst_100 {dimension_numbers = #tpu.dot_dimension_numbers<[1], [0], [0], [1], [0, 0, 1, 1], [], []>} : vector<32x64xbf16>, vector<64x192xbf16>, vector<32x192xf32> -> vector<32x192xf32>
    %270 = vector.extract_strided_slice %269 {offsets = [0, 0], sizes = [16, 16], strides = [1, 1]} : vector<32x192xf32> to vector<16x16xf32>
    %cst_101 = arith.constant 2.500000e-01 : f32
    %271 = vector.broadcast %cst_101 : f32 to vector<16x16xf32>
    %272 = arith.mulf %270, %271 : vector<16x16xf32>
    %273 = vector.extract_strided_slice %269 {offsets = [0, 64], sizes = [16, 16], strides = [1, 1]} : vector<32x192xf32> to vector<16x16xf32>
    %274 = vector.extract_strided_slice %269 {offsets = [0, 128], sizes = [16, 16], strides = [1, 1]} : vector<32x192xf32> to vector<16x16xf32>
    %cst_102 = arith.constant dense<0.000000e+00> : vector<16x16xf32>
    %275 = tpu.matmul %272, %273, %cst_102 {dimension_numbers = #tpu.dot_dimension_numbers<[1], [1], [0], [0], [0, 0, 1, 0], [], []>} : vector<16x16xf32>, vector<16x16xf32>, vector<16x16xf32> -> vector<16x16xf32>
    %276 = arith.addf %275, %6 : vector<16x16xf32>
    %cst_103 = arith.constant dense<0xFF800000> : vector<16xf32>
    %277 = vector.multi_reduction <maximumf>, %276, %cst_103 [1] : vector<16x16xf32> to vector<16xf32>
    %278 = vector.shape_cast %277 : vector<16xf32> to vector<16x1xf32>
    %279 = vector.broadcast %278 : vector<16x1xf32> to vector<16x16xf32>
    %280 = arith.subf %276, %279 : vector<16x16xf32>
    %281 = math.exp %280 : vector<16x16xf32>
    %cst_104 = arith.constant dense<0.000000e+00> : vector<16xf32>
    %282 = vector.multi_reduction <add>, %281, %cst_104 [1] : vector<16x16xf32> to vector<16xf32>
    %283 = vector.shape_cast %282 : vector<16xf32> to vector<16x1xf32>
    %284 = tpu.reciprocal %283 {approx = true} : vector<16x1xf32> -> vector<16x1xf32>
    %285 = vector.broadcast %284 : vector<16x1xf32> to vector<16x16xf32>
    %286 = arith.mulf %281, %285 : vector<16x16xf32>
    %cst_105 = arith.constant dense<0.000000e+00> : vector<16x16xf32>
    %287 = tpu.matmul %286, %274, %cst_105 {dimension_numbers = #tpu.dot_dimension_numbers<[1], [0], [0], [1], [0, 0, 1, 1], [], []>} : vector<16x16xf32>, vector<16x16xf32>, vector<16x16xf32> -> vector<16x16xf32>
    %c0_106 = arith.constant 0 : index
    %c0_107 = arith.constant 0 : index
    %288 = vector.load %arg12[%c0_106, %c0_107] : memref<32x64xf32, #tpu.memory_space<vmem>>, vector<16x16xf32>
    tpu.vector_store %arg12[%c0_106, %c0_107], %287 {strides = array<i32>} : memref<32x64xf32, #tpu.memory_space<vmem>>, vector<16x16xf32>,
    %289 = vector.extract_strided_slice %269 {offsets = [0, 16], sizes = [16, 16], strides = [1, 1]} : vector<32x192xf32> to vector<16x16xf32>
    %cst_108 = arith.constant 2.500000e-01 : f32
    %290 = vector.broadcast %cst_108 : f32 to vector<16x16xf32>
    %291 = arith.mulf %289, %290 : vector<16x16xf32>
    %292 = vector.extract_strided_slice %269 {offsets = [0, 80], sizes = [16, 16], strides = [1, 1]} : vector<32x192xf32> to vector<16x16xf32>
    %293 = vector.extract_strided_slice %269 {offsets = [0, 144], sizes = [16, 16], strides = [1, 1]} : vector<32x192xf32> to vector<16x16xf32>
    %cst_109 = arith.constant dense<0.000000e+00> : vector<16x16xf32>
    %294 = tpu.matmul %291, %292, %cst_109 {dimension_numbers = #tpu.dot_dimension_numbers<[1], [1], [0], [0], [0, 0, 1, 0], [], []>} : vector<16x16xf32>, vector<16x16xf32>, vector<16x16xf32> -> vector<16x16xf32>
    %295 = arith.addf %294, %6 : vector<16x16xf32>
    %cst_110 = arith.constant dense<0xFF800000> : vector<16xf32>
    %296 = vector.multi_reduction <maximumf>, %295, %cst_110 [1] : vector<16x16xf32> to vector<16xf32>
    %297 = vector.shape_cast %296 : vector<16xf32> to vector<16x1xf32>
    %298 = vector.broadcast %297 : vector<16x1xf32> to vector<16x16xf32>
    %299 = arith.subf %295, %298 : vector<16x16xf32>
    %300 = math.exp %299 : vector<16x16xf32>
    %cst_111 = arith.constant dense<0.000000e+00> : vector<16xf32>
    %301 = vector.multi_reduction <add>, %300, %cst_111 [1] : vector<16x16xf32> to vector<16xf32>
    %302 = vector.shape_cast %301 : vector<16xf32> to vector<16x1xf32>
    %303 = tpu.reciprocal %302 {approx = true} : vector<16x1xf32> -> vector<16x1xf32>
    %304 = vector.broadcast %303 : vector<16x1xf32> to vector<16x16xf32>
    %305 = arith.mulf %300, %304 : vector<16x16xf32>
    %cst_112 = arith.constant dense<0.000000e+00> : vector<16x16xf32>
    %306 = tpu.matmul %305, %293, %cst_112 {dimension_numbers = #tpu.dot_dimension_numbers<[1], [0], [0], [1], [0, 0, 1, 1], [], []>} : vector<16x16xf32>, vector<16x16xf32>, vector<16x16xf32> -> vector<16x16xf32>
    %c0_113 = arith.constant 0 : index
    %c16_114 = arith.constant 16 : index
    %307 = vector.load %arg12[%c0_113, %c16_114] : memref<32x64xf32, #tpu.memory_space<vmem>>, vector<16x16xf32>
    tpu.vector_store %arg12[%c0_113, %c16_114], %306 {strides = array<i32>} : memref<32x64xf32, #tpu.memory_space<vmem>>, vector<16x16xf32>,
    %308 = vector.extract_strided_slice %269 {offsets = [0, 32], sizes = [16, 16], strides = [1, 1]} : vector<32x192xf32> to vector<16x16xf32>
    %cst_115 = arith.constant 2.500000e-01 : f32
    %309 = vector.broadcast %cst_115 : f32 to vector<16x16xf32>
    %310 = arith.mulf %308, %309 : vector<16x16xf32>
    %311 = vector.extract_strided_slice %269 {offsets = [0, 96], sizes = [16, 16], strides = [1, 1]} : vector<32x192xf32> to vector<16x16xf32>
    %312 = vector.extract_strided_slice %269 {offsets = [0, 160], sizes = [16, 16], strides = [1, 1]} : vector<32x192xf32> to vector<16x16xf32>
    %cst_116 = arith.constant dense<0.000000e+00> : vector<16x16xf32>
    %313 = tpu.matmul %310, %311, %cst_116 {dimension_numbers = #tpu.dot_dimension_numbers<[1], [1], [0], [0], [0, 0, 1, 0], [], []>} : vector<16x16xf32>, vector<16x16xf32>, vector<16x16xf32> -> vector<16x16xf32>
    %314 = arith.addf %313, %6 : vector<16x16xf32>
    %cst_117 = arith.constant dense<0xFF800000> : vector<16xf32>
    %315 = vector.multi_reduction <maximumf>, %314, %cst_117 [1] : vector<16x16xf32> to vector<16xf32>
    %316 = vector.shape_cast %315 : vector<16xf32> to vector<16x1xf32>
    %317 = vector.broadcast %316 : vector<16x1xf32> to vector<16x16xf32>
    %318 = arith.subf %314, %317 : vector<16x16xf32>
    %319 = math.exp %318 : vector<16x16xf32>
    %cst_118 = arith.constant dense<0.000000e+00> : vector<16xf32>
    %320 = vector.multi_reduction <add>, %319, %cst_118 [1] : vector<16x16xf32> to vector<16xf32>
    %321 = vector.shape_cast %320 : vector<16xf32> to vector<16x1xf32>
    %322 = tpu.reciprocal %321 {approx = true} : vector<16x1xf32> -> vector<16x1xf32>
    %323 = vector.broadcast %322 : vector<16x1xf32> to vector<16x16xf32>
    %324 = arith.mulf %319, %323 : vector<16x16xf32>
    %cst_119 = arith.constant dense<0.000000e+00> : vector<16x16xf32>
    %325 = tpu.matmul %324, %312, %cst_119 {dimension_numbers = #tpu.dot_dimension_numbers<[1], [0], [0], [1], [0, 0, 1, 1], [], []>} : vector<16x16xf32>, vector<16x16xf32>, vector<16x16xf32> -> vector<16x16xf32>
    %c0_120 = arith.constant 0 : index
    %c32_121 = arith.constant 32 : index
    %326 = vector.load %arg12[%c0_120, %c32_121] : memref<32x64xf32, #tpu.memory_space<vmem>>, vector<16x16xf32>
    tpu.vector_store %arg12[%c0_120, %c32_121], %325 {strides = array<i32>} : memref<32x64xf32, #tpu.memory_space<vmem>>, vector<16x16xf32>,
    %327 = vector.extract_strided_slice %269 {offsets = [0, 48], sizes = [16, 16], strides = [1, 1]} : vector<32x192xf32> to vector<16x16xf32>
    %cst_122 = arith.constant 2.500000e-01 : f32
    %328 = vector.broadcast %cst_122 : f32 to vector<16x16xf32>
    %329 = arith.mulf %327, %328 : vector<16x16xf32>
    %330 = vector.extract_strided_slice %269 {offsets = [0, 112], sizes = [16, 16], strides = [1, 1]} : vector<32x192xf32> to vector<16x16xf32>
    %331 = vector.extract_strided_slice %269 {offsets = [0, 176], sizes = [16, 16], strides = [1, 1]} : vector<32x192xf32> to vector<16x16xf32>
    %cst_123 = arith.constant dense<0.000000e+00> : vector<16x16xf32>
    %332 = tpu.matmul %329, %330, %cst_123 {dimension_numbers = #tpu.dot_dimension_numbers<[1], [1], [0], [0], [0, 0, 1, 0], [], []>} : vector<16x16xf32>, vector<16x16xf32>, vector<16x16xf32> -> vector<16x16xf32>
    %333 = arith.addf %332, %6 : vector<16x16xf32>
    %cst_124 = arith.constant dense<0xFF800000> : vector<16xf32>
    %334 = vector.multi_reduction <maximumf>, %333, %cst_124 [1] : vector<16x16xf32> to vector<16xf32>
    %335 = vector.shape_cast %334 : vector<16xf32> to vector<16x1xf32>
    %336 = vector.broadcast %335 : vector<16x1xf32> to vector<16x16xf32>
    %337 = arith.subf %333, %336 : vector<16x16xf32>
    %338 = math.exp %337 : vector<16x16xf32>
    %cst_125 = arith.constant dense<0.000000e+00> : vector<16xf32>
    %339 = vector.multi_reduction <add>, %338, %cst_125 [1] : vector<16x16xf32> to vector<16xf32>
    %340 = vector.shape_cast %339 : vector<16xf32> to vector<16x1xf32>
    %341 = tpu.reciprocal %340 {approx = true} : vector<16x1xf32> -> vector<16x1xf32>
    %342 = vector.broadcast %341 : vector<16x1xf32> to vector<16x16xf32>
    %343 = arith.mulf %338, %342 : vector<16x16xf32>
    %cst_126 = arith.constant dense<0.000000e+00> : vector<16x16xf32>
    %344 = tpu.matmul %343, %331, %cst_126 {dimension_numbers = #tpu.dot_dimension_numbers<[1], [0], [0], [1], [0, 0, 1, 1], [], []>} : vector<16x16xf32>, vector<16x16xf32>, vector<16x16xf32> -> vector<16x16xf32>
    %c0_127 = arith.constant 0 : index
    %c48_128 = arith.constant 48 : index
    %345 = vector.load %arg12[%c0_127, %c48_128] : memref<32x64xf32, #tpu.memory_space<vmem>>, vector<16x16xf32>
    tpu.vector_store %arg12[%c0_127, %c48_128], %344 {strides = array<i32>} : memref<32x64xf32, #tpu.memory_space<vmem>>, vector<16x16xf32>,
    %346 = vector.extract_strided_slice %269 {offsets = [16, 0], sizes = [16, 16], strides = [1, 1]} : vector<32x192xf32> to vector<16x16xf32>
    %cst_129 = arith.constant 2.500000e-01 : f32
    %347 = vector.broadcast %cst_129 : f32 to vector<16x16xf32>
    %348 = arith.mulf %346, %347 : vector<16x16xf32>
    %349 = vector.extract_strided_slice %269 {offsets = [16, 64], sizes = [16, 16], strides = [1, 1]} : vector<32x192xf32> to vector<16x16xf32>
    %350 = vector.extract_strided_slice %269 {offsets = [16, 128], sizes = [16, 16], strides = [1, 1]} : vector<32x192xf32> to vector<16x16xf32>
    %cst_130 = arith.constant dense<0.000000e+00> : vector<16x16xf32>
    %351 = tpu.matmul %348, %349, %cst_130 {dimension_numbers = #tpu.dot_dimension_numbers<[1], [1], [0], [0], [0, 0, 1, 0], [], []>} : vector<16x16xf32>, vector<16x16xf32>, vector<16x16xf32> -> vector<16x16xf32>
    %352 = arith.addf %351, %6 : vector<16x16xf32>
    %cst_131 = arith.constant dense<0xFF800000> : vector<16xf32>
    %353 = vector.multi_reduction <maximumf>, %352, %cst_131 [1] : vector<16x16xf32> to vector<16xf32>
    %354 = vector.shape_cast %353 : vector<16xf32> to vector<16x1xf32>
    %355 = vector.broadcast %354 : vector<16x1xf32> to vector<16x16xf32>
    %356 = arith.subf %352, %355 : vector<16x16xf32>
    %357 = math.exp %356 : vector<16x16xf32>
    %cst_132 = arith.constant dense<0.000000e+00> : vector<16xf32>
    %358 = vector.multi_reduction <add>, %357, %cst_132 [1] : vector<16x16xf32> to vector<16xf32>
    %359 = vector.shape_cast %358 : vector<16xf32> to vector<16x1xf32>
    %360 = tpu.reciprocal %359 {approx = true} : vector<16x1xf32> -> vector<16x1xf32>
    %361 = vector.broadcast %360 : vector<16x1xf32> to vector<16x16xf32>
    %362 = arith.mulf %357, %361 : vector<16x16xf32>
    %cst_133 = arith.constant dense<0.000000e+00> : vector<16x16xf32>
    %363 = tpu.matmul %362, %350, %cst_133 {dimension_numbers = #tpu.dot_dimension_numbers<[1], [0], [0], [1], [0, 0, 1, 1], [], []>} : vector<16x16xf32>, vector<16x16xf32>, vector<16x16xf32> -> vector<16x16xf32>
    %c16_134 = arith.constant 16 : index
    %c0_135 = arith.constant 0 : index
    %364 = vector.load %arg12[%c16_134, %c0_135] : memref<32x64xf32, #tpu.memory_space<vmem>>, vector<16x16xf32>
    tpu.vector_store %arg12[%c16_134, %c0_135], %363 {strides = array<i32>} : memref<32x64xf32, #tpu.memory_space<vmem>>, vector<16x16xf32>,
    %365 = vector.extract_strided_slice %269 {offsets = [16, 16], sizes = [16, 16], strides = [1, 1]} : vector<32x192xf32> to vector<16x16xf32>
    %cst_136 = arith.constant 2.500000e-01 : f32
    %366 = vector.broadcast %cst_136 : f32 to vector<16x16xf32>
    %367 = arith.mulf %365, %366 : vector<16x16xf32>
    %368 = vector.extract_strided_slice %269 {offsets = [16, 80], sizes = [16, 16], strides = [1, 1]} : vector<32x192xf32> to vector<16x16xf32>
    %369 = vector.extract_strided_slice %269 {offsets = [16, 144], sizes = [16, 16], strides = [1, 1]} : vector<32x192xf32> to vector<16x16xf32>
    %cst_137 = arith.constant dense<0.000000e+00> : vector<16x16xf32>
    %370 = tpu.matmul %367, %368, %cst_137 {dimension_numbers = #tpu.dot_dimension_numbers<[1], [1], [0], [0], [0, 0, 1, 0], [], []>} : vector<16x16xf32>, vector<16x16xf32>, vector<16x16xf32> -> vector<16x16xf32>
    %371 = arith.addf %370, %6 : vector<16x16xf32>
    %cst_138 = arith.constant dense<0xFF800000> : vector<16xf32>
    %372 = vector.multi_reduction <maximumf>, %371, %cst_138 [1] : vector<16x16xf32> to vector<16xf32>
    %373 = vector.shape_cast %372 : vector<16xf32> to vector<16x1xf32>
    %374 = vector.broadcast %373 : vector<16x1xf32> to vector<16x16xf32>
    %375 = arith.subf %371, %374 : vector<16x16xf32>
    %376 = math.exp %375 : vector<16x16xf32>
    %cst_139 = arith.constant dense<0.000000e+00> : vector<16xf32>
    %377 = vector.multi_reduction <add>, %376, %cst_139 [1] : vector<16x16xf32> to vector<16xf32>
    %378 = vector.shape_cast %377 : vector<16xf32> to vector<16x1xf32>
    %379 = tpu.reciprocal %378 {approx = true} : vector<16x1xf32> -> vector<16x1xf32>
    %380 = vector.broadcast %379 : vector<16x1xf32> to vector<16x16xf32>
    %381 = arith.mulf %376, %380 : vector<16x16xf32>
    %cst_140 = arith.constant dense<0.000000e+00> : vector<16x16xf32>
    %382 = tpu.matmul %381, %369, %cst_140 {dimension_numbers = #tpu.dot_dimension_numbers<[1], [0], [0], [1], [0, 0, 1, 1], [], []>} : vector<16x16xf32>, vector<16x16xf32>, vector<16x16xf32> -> vector<16x16xf32>
    %c16_141 = arith.constant 16 : index
    %c16_142 = arith.constant 16 : index
    %383 = vector.load %arg12[%c16_141, %c16_142] : memref<32x64xf32, #tpu.memory_space<vmem>>, vector<16x16xf32>
    tpu.vector_store %arg12[%c16_141, %c16_142], %382 {strides = array<i32>} : memref<32x64xf32, #tpu.memory_space<vmem>>, vector<16x16xf32>,
    %384 = vector.extract_strided_slice %269 {offsets = [16, 32], sizes = [16, 16], strides = [1, 1]} : vector<32x192xf32> to vector<16x16xf32>
    %cst_143 = arith.constant 2.500000e-01 : f32
    %385 = vector.broadcast %cst_143 : f32 to vector<16x16xf32>
    %386 = arith.mulf %384, %385 : vector<16x16xf32>
    %387 = vector.extract_strided_slice %269 {offsets = [16, 96], sizes = [16, 16], strides = [1, 1]} : vector<32x192xf32> to vector<16x16xf32>
    %388 = vector.extract_strided_slice %269 {offsets = [16, 160], sizes = [16, 16], strides = [1, 1]} : vector<32x192xf32> to vector<16x16xf32>
    %cst_144 = arith.constant dense<0.000000e+00> : vector<16x16xf32>
    %389 = tpu.matmul %386, %387, %cst_144 {dimension_numbers = #tpu.dot_dimension_numbers<[1], [1], [0], [0], [0, 0, 1, 0], [], []>} : vector<16x16xf32>, vector<16x16xf32>, vector<16x16xf32> -> vector<16x16xf32>
    %390 = arith.addf %389, %6 : vector<16x16xf32>
    %cst_145 = arith.constant dense<0xFF800000> : vector<16xf32>
    %391 = vector.multi_reduction <maximumf>, %390, %cst_145 [1] : vector<16x16xf32> to vector<16xf32>
    %392 = vector.shape_cast %391 : vector<16xf32> to vector<16x1xf32>
    %393 = vector.broadcast %392 : vector<16x1xf32> to vector<16x16xf32>
    %394 = arith.subf %390, %393 : vector<16x16xf32>
    %395 = math.exp %394 : vector<16x16xf32>
    %cst_146 = arith.constant dense<0.000000e+00> : vector<16xf32>
    %396 = vector.multi_reduction <add>, %395, %cst_146 [1] : vector<16x16xf32> to vector<16xf32>
    %397 = vector.shape_cast %396 : vector<16xf32> to vector<16x1xf32>
    %398 = tpu.reciprocal %397 {approx = true} : vector<16x1xf32> -> vector<16x1xf32>
    %399 = vector.broadcast %398 : vector<16x1xf32> to vector<16x16xf32>
    %400 = arith.mulf %395, %399 : vector<16x16xf32>
    %cst_147 = arith.constant dense<0.000000e+00> : vector<16x16xf32>
    %401 = tpu.matmul %400, %388, %cst_147 {dimension_numbers = #tpu.dot_dimension_numbers<[1], [0], [0], [1], [0, 0, 1, 1], [], []>} : vector<16x16xf32>, vector<16x16xf32>, vector<16x16xf32> -> vector<16x16xf32>
    %c16_148 = arith.constant 16 : index
    %c32_149 = arith.constant 32 : index
    %402 = vector.load %arg12[%c16_148, %c32_149] : memref<32x64xf32, #tpu.memory_space<vmem>>, vector<16x16xf32>
    tpu.vector_store %arg12[%c16_148, %c32_149], %401 {strides = array<i32>} : memref<32x64xf32, #tpu.memory_space<vmem>>, vector<16x16xf32>,
    %403 = vector.extract_strided_slice %269 {offsets = [16, 48], sizes = [16, 16], strides = [1, 1]} : vector<32x192xf32> to vector<16x16xf32>
    %cst_150 = arith.constant 2.500000e-01 : f32
    %404 = vector.broadcast %cst_150 : f32 to vector<16x16xf32>
    %405 = arith.mulf %403, %404 : vector<16x16xf32>
    %406 = vector.extract_strided_slice %269 {offsets = [16, 112], sizes = [16, 16], strides = [1, 1]} : vector<32x192xf32> to vector<16x16xf32>
    %407 = vector.extract_strided_slice %269 {offsets = [16, 176], sizes = [16, 16], strides = [1, 1]} : vector<32x192xf32> to vector<16x16xf32>
    %cst_151 = arith.constant dense<0.000000e+00> : vector<16x16xf32>
    %408 = tpu.matmul %405, %406, %cst_151 {dimension_numbers = #tpu.dot_dimension_numbers<[1], [1], [0], [0], [0, 0, 1, 0], [], []>} : vector<16x16xf32>, vector<16x16xf32>, vector<16x16xf32> -> vector<16x16xf32>
    %409 = arith.addf %408, %6 : vector<16x16xf32>
    %cst_152 = arith.constant dense<0xFF800000> : vector<16xf32>
    %410 = vector.multi_reduction <maximumf>, %409, %cst_152 [1] : vector<16x16xf32> to vector<16xf32>
    %411 = vector.shape_cast %410 : vector<16xf32> to vector<16x1xf32>
    %412 = vector.broadcast %411 : vector<16x1xf32> to vector<16x16xf32>
    %413 = arith.subf %409, %412 : vector<16x16xf32>
    %414 = math.exp %413 : vector<16x16xf32>
    %cst_153 = arith.constant dense<0.000000e+00> : vector<16xf32>
    %415 = vector.multi_reduction <add>, %414, %cst_153 [1] : vector<16x16xf32> to vector<16xf32>
    %416 = vector.shape_cast %415 : vector<16xf32> to vector<16x1xf32>
    %417 = tpu.reciprocal %416 {approx = true} : vector<16x1xf32> -> vector<16x1xf32>
    %418 = vector.broadcast %417 : vector<16x1xf32> to vector<16x16xf32>
    %419 = arith.mulf %414, %418 : vector<16x16xf32>
    %cst_154 = arith.constant dense<0.000000e+00> : vector<16x16xf32>
    %420 = tpu.matmul %419, %407, %cst_154 {dimension_numbers = #tpu.dot_dimension_numbers<[1], [0], [0], [1], [0, 0, 1, 1], [], []>} : vector<16x16xf32>, vector<16x16xf32>, vector<16x16xf32> -> vector<16x16xf32>
    %c16_155 = arith.constant 16 : index
    %c48_156 = arith.constant 48 : index
    %421 = vector.load %arg12[%c16_155, %c48_156] : memref<32x64xf32, #tpu.memory_space<vmem>>, vector<16x16xf32>
    tpu.vector_store %arg12[%c16_155, %c48_156], %420 {strides = array<i32>} : memref<32x64xf32, #tpu.memory_space<vmem>>, vector<16x16xf32>,
    %c0_157 = arith.constant 0 : index
    %c0_158 = arith.constant 0 : index
    %422 = vector.load %arg12[%c0_157, %c0_158] : memref<32x64xf32, #tpu.memory_space<vmem>>, vector<32x64xf32>
    %c1_159 = arith.constant 1 : index
    %c0_160 = arith.constant 0 : index
    %c0_161 = arith.constant 0 : index
    %423 = vector.load %arg3[%c1_159, %c0_160, %c0_161] : memref<2x64x64xbf16, #tpu.memory_space<vmem>>, vector<1x64x64xbf16>
    %424 = vector.shape_cast %423 : vector<1x64x64xbf16> to vector<64x64xbf16>
    %425 = arith.truncf %422 : vector<32x64xf32> to vector<32x64xbf16>
    %cst_162 = arith.constant dense<0.000000e+00> : vector<32x64xf32>
    %426 = tpu.matmul %425, %424, %cst_162 {dimension_numbers = #tpu.dot_dimension_numbers<[1], [0], [0], [1], [0, 0, 1, 1], [], []>} : vector<32x64xbf16>, vector<64x64xbf16>, vector<32x64xf32> -> vector<32x64xf32>
    %427 = vector.extract_strided_slice %241 {offsets = [4, 0], sizes = [1, 64], strides = [1, 1]} : vector<6x64xf32> to vector<1x64xf32>
    %428 = vector.broadcast %427 : vector<1x64xf32> to vector<32x64xf32>
    %429 = arith.addf %426, %428 : vector<32x64xf32>
    %430 = arith.addf %239, %429 : vector<32x64xf32>
    %431 = vector.extract_strided_slice %241 {offsets = [2, 0], sizes = [1, 64], strides = [1, 1]} : vector<6x64xf32> to vector<1x64xf32>
    %432 = vector.extract_strided_slice %241 {offsets = [3, 0], sizes = [1, 64], strides = [1, 1]} : vector<6x64xf32> to vector<1x64xf32>
    %cst_163 = arith.constant dense<0.000000e+00> : vector<32xf32>
    %433 = vector.multi_reduction <add>, %430, %cst_163 [1] : vector<32x64xf32> to vector<32xf32>
    %434 = vector.shape_cast %433 : vector<32xf32> to vector<32x1xf32>
    %cst_164 = arith.constant 6.400000e+01 : f32
    %435 = vector.broadcast %cst_164 : f32 to vector<32x1xf32>
    %436 = arith.divf %434, %435 : vector<32x1xf32>
    %437 = vector.broadcast %436 : vector<32x1xf32> to vector<32x64xf32>
    %438 = arith.subf %430, %437 : vector<32x64xf32>
    %439 = arith.mulf %438, %438 : vector<32x64xf32>
    %cst_165 = arith.constant dense<0.000000e+00> : vector<32xf32>
    %440 = vector.multi_reduction <add>, %439, %cst_165 [1] : vector<32x64xf32> to vector<32xf32>
    %441 = vector.shape_cast %440 : vector<32xf32> to vector<32x1xf32>
    %cst_166 = arith.constant 6.400000e+01 : f32
    %442 = vector.broadcast %cst_166 : f32 to vector<32x1xf32>
    %443 = arith.divf %441, %442 : vector<32x1xf32>
    %444 = vector.broadcast %436 : vector<32x1xf32> to vector<32x64xf32>
    %445 = arith.subf %430, %444 : vector<32x64xf32>
    %cst_167 = arith.constant 9.99999974E-6 : f32
    %446 = vector.broadcast %cst_167 : f32 to vector<32x1xf32>
    %447 = arith.addf %443, %446 : vector<32x1xf32>
    %448 = math.rsqrt %447 : vector<32x1xf32>
    %449 = vector.broadcast %448 : vector<32x1xf32> to vector<32x64xf32>
    %450 = arith.mulf %445, %449 : vector<32x64xf32>
    %451 = vector.broadcast %431 : vector<1x64xf32> to vector<32x64xf32>
    %452 = arith.mulf %450, %451 : vector<32x64xf32>
    %453 = vector.broadcast %432 : vector<1x64xf32> to vector<32x64xf32>
    %454 = arith.addf %452, %453 : vector<32x64xf32>
    %c1_168 = arith.constant 1 : index
    %c0_169 = arith.constant 0 : index
    %c0_170 = arith.constant 0 : index
    %455 = vector.load %arg4[%c1_168, %c0_169, %c0_170] : memref<2x64x256xbf16, #tpu.memory_space<vmem>>, vector<1x64x256xbf16>
    %456 = vector.shape_cast %455 : vector<1x64x256xbf16> to vector<64x256xbf16>
    %457 = arith.truncf %454 : vector<32x64xf32> to vector<32x64xbf16>
    %cst_171 = arith.constant dense<0.000000e+00> : vector<32x256xf32>
    %458 = tpu.matmul %457, %456, %cst_171 {dimension_numbers = #tpu.dot_dimension_numbers<[1], [0], [0], [1], [0, 0, 1, 1], [], []>} : vector<32x64xbf16>, vector<64x256xbf16>, vector<32x256xf32> -> vector<32x256xf32>
    %c1_172 = arith.constant 1 : index
    %c0_173 = arith.constant 0 : index
    %c0_174 = arith.constant 0 : index
    %459 = vector.load %arg7[%c1_172, %c0_173, %c0_174] : memref<2x1x256xf32, #tpu.memory_space<vmem>>, vector<1x1x256xf32>
    %460 = vector.shape_cast %459 : vector<1x1x256xf32> to vector<1x256xf32>
    %461 = vector.broadcast %460 : vector<1x256xf32> to vector<32x256xf32>
    %462 = arith.addf %458, %461 : vector<32x256xf32>
    %cst_175 = arith.constant 0.000000e+00 : f32
    %463 = vector.broadcast %cst_175 : f32 to vector<32x256xf32>
    %464 = arith.maximumf %462, %463 : vector<32x256xf32>
    %c1_176 = arith.constant 1 : index
    %c0_177 = arith.constant 0 : index
    %c0_178 = arith.constant 0 : index
    %465 = vector.load %arg5[%c1_176, %c0_177, %c0_178] : memref<2x256x64xbf16, #tpu.memory_space<vmem>>, vector<1x256x64xbf16>
    %466 = vector.shape_cast %465 : vector<1x256x64xbf16> to vector<256x64xbf16>
    %467 = arith.truncf %464 : vector<32x256xf32> to vector<32x256xbf16>
    %cst_179 = arith.constant dense<0.000000e+00> : vector<32x64xf32>
    %468 = tpu.matmul %467, %466, %cst_179 {dimension_numbers = #tpu.dot_dimension_numbers<[1], [0], [0], [1], [0, 0, 1, 1], [], []>} : vector<32x256xbf16>, vector<256x64xbf16>, vector<32x64xf32> -> vector<32x64xf32>
    %469 = vector.extract_strided_slice %241 {offsets = [5, 0], sizes = [1, 64], strides = [1, 1]} : vector<6x64xf32> to vector<1x64xf32>
    %470 = vector.broadcast %469 : vector<1x64xf32> to vector<32x64xf32>
    %471 = arith.addf %468, %470 : vector<32x64xf32>
    %472 = arith.addf %430, %471 : vector<32x64xf32>
    %c0_180 = arith.constant 0 : index
    %c0_181 = arith.constant 0 : index
    %473 = vector.load %arg8[%c0_180, %c0_181] : memref<2x64xf32, #tpu.memory_space<vmem>>, vector<1x64xf32>
    %c1_182 = arith.constant 1 : index
    %c0_183 = arith.constant 0 : index
    %474 = vector.load %arg8[%c1_182, %c0_183] : memref<2x64xf32, #tpu.memory_space<vmem>>, vector<1x64xf32>
    %cst_184 = arith.constant dense<0.000000e+00> : vector<32xf32>
    %475 = vector.multi_reduction <add>, %472, %cst_184 [1] : vector<32x64xf32> to vector<32xf32>
    %476 = vector.shape_cast %475 : vector<32xf32> to vector<32x1xf32>
    %cst_185 = arith.constant 6.400000e+01 : f32
    %477 = vector.broadcast %cst_185 : f32 to vector<32x1xf32>
    %478 = arith.divf %476, %477 : vector<32x1xf32>
    %479 = vector.broadcast %478 : vector<32x1xf32> to vector<32x64xf32>
    %480 = arith.subf %472, %479 : vector<32x64xf32>
    %481 = arith.mulf %480, %480 : vector<32x64xf32>
    %cst_186 = arith.constant dense<0.000000e+00> : vector<32xf32>
    %482 = vector.multi_reduction <add>, %481, %cst_186 [1] : vector<32x64xf32> to vector<32xf32>
    %483 = vector.shape_cast %482 : vector<32xf32> to vector<32x1xf32>
    %cst_187 = arith.constant 6.400000e+01 : f32
    %484 = vector.broadcast %cst_187 : f32 to vector<32x1xf32>
    %485 = arith.divf %483, %484 : vector<32x1xf32>
    %486 = vector.broadcast %478 : vector<32x1xf32> to vector<32x64xf32>
    %487 = arith.subf %472, %486 : vector<32x64xf32>
    %cst_188 = arith.constant 9.99999974E-6 : f32
    %488 = vector.broadcast %cst_188 : f32 to vector<32x1xf32>
    %489 = arith.addf %485, %488 : vector<32x1xf32>
    %490 = math.rsqrt %489 : vector<32x1xf32>
    %491 = vector.broadcast %490 : vector<32x1xf32> to vector<32x64xf32>
    %492 = arith.mulf %487, %491 : vector<32x64xf32>
    %493 = vector.broadcast %473 : vector<1x64xf32> to vector<32x64xf32>
    %494 = arith.mulf %492, %493 : vector<32x64xf32>
    %495 = vector.broadcast %474 : vector<1x64xf32> to vector<32x64xf32>
    %496 = arith.addf %494, %495 : vector<32x64xf32>
    %c0_189 = arith.constant 0 : index
    %c0_190 = arith.constant 0 : index
    %497 = vector.load %arg9[%c0_189, %c0_190] : memref<64x128xbf16, #tpu.memory_space<vmem>>, vector<64x128xbf16>
    %498 = arith.truncf %496 : vector<32x64xf32> to vector<32x64xbf16>
    %cst_191 = arith.constant dense<0.000000e+00> : vector<32x128xf32>
    %499 = tpu.matmul %498, %497, %cst_191 {dimension_numbers = #tpu.dot_dimension_numbers<[1], [0], [0], [1], [0, 0, 1, 1], [], []>} : vector<32x64xbf16>, vector<64x128xbf16>, vector<32x128xf32> -> vector<32x128xf32>
    %c0_192 = arith.constant 0 : index
    %c0_193 = arith.constant 0 : index
    %500 = vector.load %arg10[%c0_192, %c0_193] : memref<1x128xf32, #tpu.memory_space<vmem>>, vector<1x128xf32>
    %501 = vector.broadcast %500 : vector<1x128xf32> to vector<32x128xf32>
    %502 = arith.addf %499, %501 : vector<32x128xf32>
    %c0_194 = arith.constant 0 : index
    %c0_195 = arith.constant 0 : index
    %503 = vector.load %arg11[%c0_194, %c0_195] : memref<32x128xf32, #tpu.memory_space<vmem>>, vector<32x128xf32>
    tpu.vector_store %arg11[%c0_194, %c0_195], %502 {strides = array<i32>} : memref<32x128xf32, #tpu.memory_space<vmem>>, vector<32x128xf32>,
    return
  }
  func.func @transform_0(%arg0: i32) -> (i32, i32) {
    %c0_i32 = arith.constant 0 : i32
    %c0_i32_0 = arith.constant 0 : i32
    %c0_i32_1 = arith.constant 0 : i32
    return %c0_i32, %c0_i32_0 : i32, i32
  }
  func.func @transform_1(%arg0: i32) -> (i32, i32, i32) {
    %c0_i32 = arith.constant 0 : i32
    %c0_i32_0 = arith.constant 0 : i32
    %c0_i32_1 = arith.constant 0 : i32
    %c0_i32_2 = arith.constant 0 : i32
    return %c0_i32, %c0_i32_0, %c0_i32_1 : i32, i32, i32
  }
  func.func @transform_2(%arg0: i32) -> (i32, i32, i32) {
    %c0_i32 = arith.constant 0 : i32
    %c0_i32_0 = arith.constant 0 : i32
    %c0_i32_1 = arith.constant 0 : i32
    %c0_i32_2 = arith.constant 0 : i32
    return %c0_i32, %c0_i32_0, %c0_i32_1 : i32, i32, i32
  }
  func.func @transform_3(%arg0: i32) -> (i32, i32, i32) {
    %c0_i32 = arith.constant 0 : i32
    %c0_i32_0 = arith.constant 0 : i32
    %c0_i32_1 = arith.constant 0 : i32
    %c0_i32_2 = arith.constant 0 : i32
    return %c0_i32, %c0_i32_0, %c0_i32_1 : i32, i32, i32
  }
  func.func @transform_4(%arg0: i32) -> (i32, i32, i32) {
    %c0_i32 = arith.constant 0 : i32
    %c0_i32_0 = arith.constant 0 : i32
    %c0_i32_1 = arith.constant 0 : i32
    %c0_i32_2 = arith.constant 0 : i32
    return %c0_i32, %c0_i32_0, %c0_i32_1 : i32, i32, i32
  }
  func.func @transform_5(%arg0: i32) -> (i32, i32, i32) {
    %c0_i32 = arith.constant 0 : i32
    %c0_i32_0 = arith.constant 0 : i32
    %c0_i32_1 = arith.constant 0 : i32
    %c0_i32_2 = arith.constant 0 : i32
    return %c0_i32, %c0_i32_0, %c0_i32_1 : i32, i32, i32
  }
  func.func @transform_6(%arg0: i32) -> (i32, i32, i32) {
    %c0_i32 = arith.constant 0 : i32
    %c0_i32_0 = arith.constant 0 : i32
    %c0_i32_1 = arith.constant 0 : i32
    %c0_i32_2 = arith.constant 0 : i32
    return %c0_i32, %c0_i32_0, %c0_i32_1 : i32, i32, i32
  }
  func.func @transform_7(%arg0: i32) -> (i32, i32) {
    %c0_i32 = arith.constant 0 : i32
    %c0_i32_0 = arith.constant 0 : i32
    %c0_i32_1 = arith.constant 0 : i32
    return %c0_i32, %c0_i32_0 : i32, i32
  }
  func.func @transform_8(%arg0: i32) -> (i32, i32) {
    %c0_i32 = arith.constant 0 : i32
    %c0_i32_0 = arith.constant 0 : i32
    %c0_i32_1 = arith.constant 0 : i32
    return %c0_i32, %c0_i32_0 : i32, i32
  }
  func.func @transform_9(%arg0: i32) -> (i32, i32) {
    %c0_i32 = arith.constant 0 : i32
    %c0_i32_0 = arith.constant 0 : i32
    %c0_i32_1 = arith.constant 0 : i32
    return %c0_i32, %c0_i32_0 : i32, i32
  }
  func.func @transform_10(%arg0: i32) -> (i32, i32) {
    %c0_i32 = arith.constant 0 : i32
    %c0_i32_0 = arith.constant 0 : i32
    %c0_i32_1 = arith.constant 0 : i32
    return %c0_i32, %c0_i32_0 : i32, i32
  }
}

</mosaic_0001>

<bundles_post_ra>
// kernel: gpt_forward.1
= control target key start
LH: loop header
LB: loop body
LE: loop exit
PB: predicated region body
PF: predicated region fallthrough
CT: control target
= control target key end

     0   :  { %vm51_vm0 = vcmask 523264   ;;  %s5352_s0 = inlined_call_operand.vmem [shape: f32[32,64], index: 0, kind: input, shape index: {}]   ;;  %s5353_s1 = inlined_call_operand.vmem [shape: bf16[2,64,192], index: 1, kind: input, shape index: {}]   ;;  %s5354_s2 = inlined_call_operand.vmem [shape: bf16[2,64,64], index: 2, kind: input, shape index: {}]   ;;  %s5355_s3 = inlined_call_operand.vmem [shape: bf16[2,64,256], index: 3, kind: input, shape index: {}]   ;;  %s5356_s4 = inlined_call_operand.vmem [shape: bf16[2,256,64], index: 4, kind: input, shape index: {}]   ;;  %s5357_s5 = inlined_call_operand.vmem [shape: f32[2,6,64], index: 5, kind: input, shape index: {}]   ;;  %s5358_s6 = inlined_call_operand.vmem [shape: f32[2,1,256], index: 6, kind: input, shape index: {}]   ;;  %s5359_s7 = inlined_call_operand.vmem [shape: f32[2,64], index: 7, kind: input, shape index: {}]   ;;  %s5360_s8 = inlined_call_operand.vmem [shape: bf16[64,128], index: 8, kind: input, shape index: {}]   ;;  %s5361_s9 = inlined_call_operand.vmem [shape: f32[1,128], index: 9, kind: input, shape index: {}]   ;;  %s5362_s10 = inlined_call_operand.hbm [shape: f32[32,128], index: 10, kind: output, shape index: {}]  }
   0x1   :  { %v39_v0 = vld [vmem:[%s5352_s0 + $0x10] sm:$0xff]  ;;  %v37_v1 = vld [vmem:[%s5352_s0] sm:$0xff] }
   0x2   :  { %v58_v2 = vsel %vm51_vm0, %v39_v0, 0.0  ;;  %v52_v3 = vsel %vm51_vm0, %v37_v1, 0.0 }
   0x3   :  { %59 = vadd.xlane.f32.xlu2 %v58_v2  ;;  %53 = vadd.xlane.f32.xlu0 %v52_v3 }
   0x4   :  { %15 = vsyncpa [#allocation4], 0  ;;  %v38_v4 = vld [vmem:[%s5352_s0 + $0x8] sm:$0xff]  ;;  %v40_v5 = vld [vmem:[%s5352_s0 + $0x18] sm:$0xff]  ;;  %v4026_v8 = vmov 64.0   ;;  %s4027_s15 = smov 64  }
   0x5   :  { %v55_v6 = vsel %vm51_vm0, %v38_v4, 0.0  ;;  %v61_v7 = vsel %vm51_vm0, %v40_v5, 0.0  ;;  %3824 = vrcp.f32 %v4026_v8  ;;  %v3219_v35 = vld [vmem:[%s5353_s1 + $0x30] sm:$0xf]  ;;  %v3680_v36 = vld [vmem:[%s5353_s1 + $0x34] sm:$0xf0] }
   0x6   :  { %v3679_v37 = vld [vmem:[%s5353_s1 + $0x34] sm:$0xf]  ;;  %v3220_v38 = vor.u32 %v3680_v36, %v3219_v35  ;;  %v3221_v39 = vld [vmem:[%s5353_s1 + $0x38] sm:$0xf0]  ;;  %v3211_v41 = vld [vmem:[%s5353_s1 + $0x20] sm:$0xf] }
   0x7   :  { %v3224_v40 = vor.u32 %v3679_v37, %v3221_v39  ;;  %v3678_v42 = vld [vmem:[%s5353_s1 + $0x24] sm:$0xf0]  ;;  %v3677_v43 = vld [vmem:[%s5353_s1 + $0x24] sm:$0xf]  ;;  %v3213_v45 = vld [vmem:[%s5353_s1 + $0x28] sm:$0xf0] }
   0x8   :  { %217 = vmatpush.bf16.msra.mxu0 %v3220_v38  ;;  %v3212_v44 = vor.u32 %v3678_v42, %v3211_v41  ;;  %v3216_v46 = vor.u32 %v3677_v43, %v3213_v45  ;;  %v3203_v47 = vld [vmem:[%s5353_s1 + $0x10] sm:$0xf]  ;;  %v3676_v48 = vld [vmem:[%s5353_s1 + $0x14] sm:$0xf0]  ;;  %v3675_v49 = vld [vmem:[%s5353_s1 + $0x14] sm:$0xf] }
   0x9   :  { %236 = vmatpush.bf16.msra.mxu1 %v3224_v40  ;;  %v3204_v50 = vor.u32 %v3676_v48, %v3203_v47  ;;  %v3205_v51 = vld [vmem:[%s5353_s1 + $0x18] sm:$0xf0]  ;;  %v3195_v56 = vld [vmem:[%s5353_s1] sm:$0xf]  ;;  %v3674_v57 = vld [vmem:[%s5353_s1 + $0x4] sm:$0xf0] }
   0xa   :  { %v3208_v54 = vor.u32 %v3675_v49, %v3205_v51  ;;  %v3673_v58 = vld [vmem:[%s5353_s1 + $0x4] sm:$0xf]  ;;  %v3196_v61 = vor.u32 %v3674_v57, %v3195_v56  ;;  %v3197_v62 = vld [vmem:[%s5353_s1 + $0x8] sm:$0xf0]  ;;  %s4028_s16 = smov 112   ;;  %s4029_s17 = smov 48  }
   0xb   :  { %56 = vadd.xlane.f32.xlu0 %v55_v6  ;;  %62 = vadd.xlane.f32.xlu2 %v61_v7  ;;  %v3825_v9 = vpop.eup %3824  ;;  %v3200_v63 = vor.u32 %v3673_v58, %v3197_v62  ;;  %s4030_s18 = smov 32   ;;  %s4031_s19 = smov 16   ;;  %vm259_vm14 = vcmask 130048  }
   0xc   :  { %v65_v10 = vmul.f32 64.0, %v3825_v9  ;;  %vm69_vm1 = vweird.f32 %v3825_v9  ;;  %218 = vmatpush.bf16.msra.mxu0 %v3212_v44  ;;  %s4032_s20 = smov 96   ;;  %s4033_s21 = smov 80  }
   0xd   :  { %237 = vmatpush.bf16.msra.mxu1 %v3216_v46  ;;  %s4035_s30 = smov [#allocation3]   ;;  %s3181_s14 = sshll.u32 %s5362_s10, 4  ;;  %s3182_s14 = int_to_ptr.hbm [resolvable:$true] %s3181_s14 }
   0xe   :  { %v66_v11 = vsub.f32 1.0, %v65_v10  ;;  %s3179_s11 = sshll.u32 %s4035_s30, 4  ;;  %s4037_s22 = smov 8   ;;  %s3180_s11 = int_to_ptr.vmem [resolvable:$true] %s3179_s11 }
  0x10   :  { %v67_v12 = vmul.f32 %v3825_v9, %v66_v11  ;;  %219 = vmatpush.bf16.msra.mxu0 %v3204_v50 }
  0x11   :  { %238 = vmatpush.bf16.msra.mxu1 %v3208_v54 }
  0x12   :  { %v68_v13 = vadd.f32 %v3825_v9, %v67_v12 }
  0x14   :  { %v4109_v14 = vsel %vm69_vm1, %v3825_v9, %v68_v13  ;;  %220 = vmatpush.bf16.msra.mxu0 %v3196_v61 }
  0x15   :  { %239 = vmatpush.bf16.msra.mxu1 %v3200_v63 }
  0x76   :  { %v60_v15 = vpop.xlane.xlu2 %59  ;;  %v54_v16 = vpop.xlane.xlu0 %53 }
  0x77   :  { %v73_v17 = vmul.f32 %v4109_v14, %v60_v15  ;;  %v71_v18 = vmul.f32 %v4109_v14, %v54_v16 }
  0x79   :  { %v4113_v19 = vsub.f32 %v39_v0, %v73_v17  ;;  %v4115_v20 = vsub.f32 %v37_v1, %v71_v18 }
  0x7b   :  { %v81_v21 = vmul.f32 %v4113_v19, %v4113_v19  ;;  %v79_v22 = vmul.f32 %v4115_v20, %v4115_v20 }
  0x7d   :  { %v89_v23 = vsel %vm51_vm0, %v81_v21, 0.0  ;;  %v83_v24 = vsel %vm51_vm0, %v79_v22, 0.0 }
  0x7e   :  { %90 = vadd.xlane.f32.xlu0 %v89_v23  ;;  %84 = vadd.xlane.f32.xlu1 %v83_v24  ;;  %v57_v25 = vpop.xlane.xlu0 %56  ;;  %v63_v26 = vpop.xlane.xlu2 %62  ;;  %v50_v24 = vld [vmem:[%s5357_s5] sm:$0x3f] }
  0x7f   :  { %v72_v27 = vmul.f32 %v4109_v14, %v57_v25  ;;  %v74_v28 = vmul.f32 %v4109_v14, %v63_v26  ;;  %v152_v38 = vperm.slane %v50_v24, 1 }
  0x81   :  { %v4125_v29 = vsub.f32 %v38_v4, %v72_v27  ;;  %v4127_v30 = vsub.f32 %v40_v5, %v74_v28  ;;  %v147_v28 = vperm.slane %v50_v24, 0 }
  0x83   :  { %v80_v31 = vmul.f32 %v4125_v29, %v4125_v29  ;;  %v82_v33 = vmul.f32 %v4127_v30, %v4127_v30 }
  0x85   :  { %v86_v32 = vsel %vm51_vm0, %v80_v31, 0.0  ;;  %v92_v34 = vsel %vm51_vm0, %v82_v33, 0.0 }
  0x86   :  { %87 = vadd.xlane.f32.xlu1 %v86_v32 }
  0x8e   :  { %93 = vadd.xlane.f32.xlu1 %v92_v34 }
  0xf1   :  { %v85_v52 = vpop.xlane.xlu1 %84  ;;  %v91_v53 = vpop.xlane.xlu0 %90 }
  0xf2   :  { %v95_v55 = vmul.f32 %v85_v52, %v4109_v14  ;;  %v97_v60 = vmul.f32 %v91_v53, %v4109_v14 }
  0xf4   :  { %v99_v59 = vadd.f32 1e-05, %v95_v55  ;;  %v101_v0 = vadd.f32 1e-05, %v97_v60 }
  0xf6   :  { %3826 = vrsqrt.f32 %v99_v59  ;;  %vm109_vm3 = vweird.f32 %v99_v59  ;;  %vm129_vm10 = vweird.f32 %v101_v0 }
  0xf7   :  { %3828 = vrsqrt.f32 %v101_v0 }
  0xf9   :  { %v88_v1 = vpop.xlane.xlu1 %87 }
  0xfa   :  { %v96_v2 = vmul.f32 %v88_v1, %v4109_v14 }
  0xfc   :  { %v3827_v3 = vpop.eup %3826  ;;  %v100_v4 = vadd.f32 1e-05, %v96_v2 }
  0xfd   :  { %v104_v5 = vmul.f32 %v3827_v3, %v99_v59  ;;  %v3829_v9 = vpop.eup %3828  ;;  %vm110_vm2 = vweird.f32 %v3827_v3 }
  0xfe   :  { %3830 = vrsqrt.f32 %v100_v4  ;;  %v124_v16 = vmul.f32 %v3829_v9, %v101_v0  ;;  %vm111_vm4 = vmor %vm109_vm3, %vm110_vm2  ;;  %vm119_vm6 = vweird.f32 %v100_v4  ;;  %vm130_vm11 = vweird.f32 %v3829_v9 }
  0xff   :  { %v105_v6 = vmul.f32 %v3827_v3, %v104_v5  ;;  %vm131_vm13 = vmor %vm129_vm10, %vm130_vm11  ;;  %vm452_vm2 = vcmask 261248   ;;  %vm559_vm3 = vcmask 392448  }
 0x100   :  { %v125_v22 = vmul.f32 %v3829_v9, %v124_v16 }
 0x101   :  { %v106_v7 = vmul.f32 0.5, %v105_v6  ;;  %v94_v8 = vpop.xlane.xlu1 %93 }
 0x102   :  { %v98_v10 = vmul.f32 %v94_v8, %v4109_v14  ;;  %v126_v31 = vmul.f32 0.5, %v125_v22 }
 0x103   :  { %v107_v11 = vsub.f32 1.5, %v106_v7 }
 0x104   :  { %v3831_v12 = vpop.eup %3830  ;;  %v102_v13 = vadd.f32 1e-05, %v98_v10  ;;  %v127_v39 = vsub.f32 1.5, %v126_v31 }
 0x105   :  { %v108_v15 = vmul.f32 %v3827_v3, %v107_v11  ;;  %v114_v17 = vmul.f32 %v3831_v12, %v100_v4  ;;  %vm120_vm5 = vweird.f32 %v3831_v12 }
 0x106   :  { %3832 = vrsqrt.f32 %v102_v13  ;;  %vm121_vm7 = vmor %vm119_vm6, %vm120_vm5  ;;  %vm139_vm8 = vweird.f32 %v102_v13  ;;  %v128_v44 = vmul.f32 %v3829_v9, %v127_v39  ;;  %v41_v39 = vlaneseq }
 0x107   :  { %v115_v18 = vmul.f32 %v3831_v12, %v114_v17  ;;  %v112_v21 = vsel %vm111_vm4, %v3827_v3, %v108_v15  ;;  %vm666_vm4 = vcmask 523648  }
 0x108   :  { %v143_v27 = vmul.f32 %v112_v21, %v4115_v20 }
 0x109   :  { %v116_v23 = vmul.f32 0.5, %v115_v18 }
 0x10a   :  { %v148_v37 = vmul.f32 %v147_v28, %v143_v27 }
 0x10b   :  { %v117_v25 = vsub.f32 1.5, %v116_v23 }
 0x10c   :  { %v3833_v26 = vpop.eup %3832  ;;  %v153_v42 = vadd.f32 %v152_v38, %v148_v37 }
 0x10d   :  { %v118_v32 = vmul.f32 %v3831_v12, %v117_v25  ;;  %v134_v33 = vmul.f32 %v3833_v26, %v102_v13  ;;  %vm140_vm9 = vweird.f32 %v3833_v26 }
 0x10e   :  { %vm141_vm12 = vmor %vm139_vm8, %vm140_vm9 }
 0x10f   :  { %v122_v34 = vsel %vm121_vm7, %v3831_v12, %v118_v32  ;;  %v135_v35 = vmul.f32 %v3833_v26, %v134_v33 }
 0x110   :  { %v144_v36 = vmul.f32 %v122_v34, %v4125_v29  ;;  %v132_v29 = vsel %vm131_vm13, %v3829_v9, %v128_v44 }
 0x111   :  { %v136_v40 = vmul.f32 0.5, %v135_v35  ;;  %v145_v49 = vmul.f32 %v132_v29, %v4113_v19 }
 0x112   :  { %v149_v41 = vmul.f32 %v147_v28, %v144_v36 }
 0x113   :  { %v137_v20 = vsub.f32 1.5, %v136_v40  ;;  %v150_v51 = vmul.f32 %v147_v28, %v145_v49  ;;  %v42_v40 = vshrl.u32 %v41_v39, 7 }
 0x114   :  { %v154_v43 = vadd.f32 %v152_v38, %v149_v41  ;;  %v45_v41 = vand.u32 127, %v41_v39 }
 0x115   :  { %v138_v45 = vmul.f32 %v3833_v26, %v137_v20  ;;  %v155_v53 = vadd.f32 %v152_v38, %v150_v51  ;;  %v4034_v20 = vmov -1e+09  }
 0x116   :  { %v165_v46 = vpack.c.bf16 %v154_v43, %v153_v42  ;;  %vm46_vm15 = vcmp.ge.s32.totalorder %v42_v40, %v45_v41 }
 0x117   :  { %v142_v47 = vsel %vm141_vm12, %v3833_v26, %v138_v45  ;;  %v4273_v42 = vsel %vm46_vm15, 0.0, %v4034_v20 }
 0x118   :  { %3225 = vmatmul.msk.bf16.vlgmr.msra.gmra.mxu0 %vm51_vm0, %v165_v46  ;;  %3227 = vmatmul.msk.bf16.vlgmr.msra.gmra.mxu1 %vm51_vm0, %v165_v46  ;;  %v146_v48 = vmul.f32 %v142_v47, %v4127_v30  ;;  %v43_v47 = vadd.s32 8, %v42_v40 }
 0x11a   :  { %v151_v50 = vmul.f32 %v147_v28, %v146_v48  ;;  %vm47_vm1 = vcmp.ge.s32.totalorder %v43_v47, %v45_v41 }
 0x11b   :  { %v4280_v29 = vsel %vm47_vm1, 0.0, %v4034_v20 }
 0x11c   :  { %v156_v52 = vadd.f32 %v152_v38, %v151_v50 }
 0x11e   :  { %v166_v54 = vpack.c.bf16 %v156_v52, %v155_v53 }
 0x128   :  { %3226 = vmatmul.msk.bf16.gmra.mxu0 %vm51_vm0, %v166_v54  ;;  %3228 = vmatmul.msk.bf16.gmra.mxu1 %vm51_vm0, %v166_v54 }
 0x195   :  { %v222_v55 = vpop.f32.mrf.mxu0  ;;  %v241_v61 = vpop.f32.mrf.mxu1 }
 0x196   :  { %255 = vrot.lane.b32.xlu0 %v222_v55, %s4027_s15  ;;  %v251_v56 = vmul.f32 0.25, %v222_v55 }
 0x19d   :  { %v224_v57 = vpop.f32.mrf.mxu0  ;;  %v243_v62 = vpop.f32.mrf.mxu1 }
 0x19e   :  { %346 = vrot.lane.b32.xlu0 %v251_v56, %s4028_s16  ;;  %352 = vrot.lane.b32.xlu1 %v224_v57, %s4029_s17  ;;  %v252_v19 = vmul.f32 0.25, %v224_v57  ;;  %v3761_v63 = vpack.i.bf16 %v241_v61, %v243_v62 }
 0x19f   :  { %257 = vrot.lane.b32.xlu2 %v224_v57, %s4027_s15 }
 0x1a5   :  { %v227_v30 = vpop.f32.mrf.mxu0 }
 0x1a6   :  { %459 = vrot.lane.b32.xlu0 %v222_v55, %s4030_s18  ;;  %461 = vrot.lane.b32.xlu1 %v224_v57, %s4030_s18  ;;  %v4214_v59 = vmul.f32 0.25, %v227_v30 }
 0x1a7   :  { %350 = vrot.lane.b32.xlu2 %v222_v55, %s4029_s17 }
 0x1ad   :  { %v229_v58 = vpop.f32.mrf.mxu0 }
 0x1ae   :  { %568 = vrot.lane.b32.xlu1 %v224_v57, %s4031_s19  ;;  %457 = vrot.lane.b32.xlu0 %v252_v19, %s4032_s20  ;;  %v4220_v60 = vmul.f32 0.25, %v229_v58 }
 0x1af   :  { %348 = vrot.lane.b32.xlu2 %v252_v19, %s4028_s16 }
 0x1b6   :  { %566 = vrot.lane.b32.xlu1 %v222_v55, %s4031_s19  ;;  %562 = vrot.lane.b32.xlu0 %v251_v56, %s4033_s21 }
 0x1b7   :  { %455 = vrot.lane.b32.xlu2 %v251_v56, %s4032_s20 }
 0x1be   :  { %564 = vrot.lane.b32.xlu1 %v252_v19, %s4033_s21  ;;  %769 = vrot.lane.b32.xlu0 %v229_v58, %s4029_s17 }
 0x1bf   :  { %675 = vrot.lane.b32.xlu2 %v229_v58, %s4027_s15 }
 0x1c6   :  { %767 = vrot.lane.b32.xlu1 %v227_v30, %s4029_s17  ;;  %763 = vrot.lane.b32.xlu0 %v4214_v59, %s4028_s16 }
 0x1c7   :  { %673 = vrot.lane.b32.xlu2 %v227_v30, %s4027_s15 }
 0x1ce   :  { %871 = vrot.lane.b32.xlu1 %v4214_v59, %s4032_s20  ;;  %765 = vrot.lane.b32.xlu0 %v4220_v60, %s4028_s16 }
 0x1cf   :  { %877 = vrot.lane.b32.xlu2 %v229_v58, %s4030_s18 }
 0x1d6   :  { %873 = vrot.lane.b32.xlu1 %v4220_v60, %s4032_s20  ;;  %981 = vrot.lane.b32.xlu0 %v227_v30, %s4031_s19 }
 0x1d7   :  { %875 = vrot.lane.b32.xlu2 %v227_v30, %s4030_s18 }
 0x1de   :  { %979 = vrot.lane.b32.xlu1 %v4220_v60, %s4033_s21  ;;  %3762 = vrot.lane.b32.xlu0 %v3761_v63, %s4028_s16 }
 0x1df   :  { %983 = vrot.lane.b32.xlu2 %v229_v58, %s4031_s19 }
 0x1e6   :  { %3767 = vrot.lane.b32.xlu1 %v3761_v63, %s4032_s20 }
 0x1e7   :  { %977 = vrot.lane.b32.xlu2 %v4214_v59, %s4033_s21 }
 0x1ef   :  { %3772 = vrot.lane.b32.xlu2 %v3761_v63, %s4033_s21 }
 0x1f9   :  { %v258_v0 = vpop.permute.xlu2 %257 }
 0x1fa   :  { %3229 = vmatpush.xpose.msk.msra.mxu2 %vm259_vm14, %v258_v0 }
 0x201   :  { %v351_v1 = vpop.permute.xlu2 %350 }
 0x208   :  { %v256_v2 = vpop.permute.xlu0 %255 }
 0x209   :  { %v349_v3 = vpop.permute.xlu2 %348  ;;  %3230 = vmatpush.xpose.msk.msra.mxu2 %vm259_vm14, %v256_v2 }
 0x20c   :  { %3231 = vmatmul.msk.f32.vlgmr.msra.gmra.mxu2 %vm259_vm14, %v251_v56 }
 0x20d   :  { %335 = vmatpush.msrb.mxu2 %v243_v62 }
 0x20f   :  { %336 = vmatpush.msrb.mxu2 %v241_v61 }
 0x210   :  { %v353_v4 = vpop.permute.xlu1 %352  ;;  %v347_v5 = vpop.permute.xlu0 %346 }
 0x211   :  { %v456_v6 = vpop.permute.xlu2 %455  ;;  %3235 = vmatpush.xpose.msk.msra.mxu3 %vm259_vm14, %v353_v4 }
 0x214   :  { %3232 = vmatmul.msk.f32.gmra.mxu2 %vm259_vm14, %v252_v19 }
 0x215   :  { %3236 = vmatpush.xpose.msk.msra.mxu3 %vm259_vm14, %v351_v1 }
 0x218   :  { %v462_v7 = vpop.permute.xlu1 %461  ;;  %3237 = vmatmul.msk.f32.vlgmr.msra.gmra.mxu3 %vm259_vm14, %v347_v5  ;;  %v460_v8 = vpop.permute.xlu0 %459 }
 0x219   :  { %v676_v9 = vpop.permute.xlu2 %675  ;;  %3241 = vmatpush.xpose.msk.msrb.mxu3 %vm259_vm14, %v462_v7 }
 0x21d   :  { %3242 = vmatpush.xpose.msk.msrb.mxu3 %vm259_vm14, %v460_v8 }
 0x220   :  { %v569_v10 = vpop.permute.xlu1 %568  ;;  %3238 = vmatmul.msk.f32.gmra.mxu3 %vm259_vm14, %v349_v3  ;;  %v458_v11 = vpop.permute.xlu0 %457 }
 0x221   :  { %3253 = vmatpush.xpose.msk.msra.mxu3 %vm259_vm14, %v676_v9  ;;  %v674_v12 = vpop.permute.xlu2 %673  ;;  %3247 = vmatpush.xpose.msk.msrb.mxu0 %vm259_vm14, %v569_v10 }
 0x225   :  { %3254 = vmatpush.xpose.msk.msra.mxu3 %vm259_vm14, %v674_v12 }
 0x228   :  { %v567_v13 = vpop.permute.xlu1 %566  ;;  %3243 = vmatmul.msk.f32.vlgmr.msrb.gmra.mxu3 %vm259_vm14, %v456_v6  ;;  %v563_v15 = vpop.permute.xlu0 %562 }
 0x229   :  { %v878_v16 = vpop.permute.xlu2 %877  ;;  %3248 = vmatpush.xpose.msk.msrb.mxu0 %vm259_vm14, %v567_v13 }
 0x22a   :  { %3265 = vmatpush.xpose.msk.msrb.mxu3 %vm259_vm14, %v878_v16 }
 0x22c   :  { %3249 = vmatmul.msk.f32.vlgmr.msrb.gmra.mxu0 %vm259_vm14, %v563_v15 }
 0x230   :  { %v565_v17 = vpop.permute.xlu1 %564  ;;  %3244 = vmatmul.msk.f32.gmra.mxu3 %vm259_vm14, %v458_v11  ;;  %v770_v18 = vpop.permute.xlu0 %769 }
 0x231   :  { %v876_v21 = vpop.permute.xlu2 %875  ;;  %3259 = vmatpush.xpose.msk.msra.mxu0 %vm259_vm14, %v770_v18 }
 0x232   :  { %3266 = vmatpush.xpose.msk.msrb.mxu3 %vm259_vm14, %v876_v21 }
 0x234   :  { %3250 = vmatmul.msk.f32.gmra.mxu0 %vm259_vm14, %v565_v17 }
 0x238   :  { %v768_v22 = vpop.permute.xlu1 %767  ;;  %3255 = vmatmul.msk.f32.vlgmr.msra.gmra.mxu3 %vm259_vm14, %v4214_v59  ;;  %v764_v23 = vpop.permute.xlu0 %763 }
 0x239   :  { %v984_v24 = vpop.permute.xlu2 %983  ;;  %3260 = vmatpush.xpose.msk.msra.mxu0 %vm259_vm14, %v768_v22 }
 0x23c   :  { %3261 = vmatmul.msk.f32.vlgmr.msra.gmra.mxu0 %vm259_vm14, %v764_v23 }
 0x23d   :  { %3271 = vmatpush.xpose.msk.msrb.mxu0 %vm259_vm14, %v984_v24 }
 0x240   :  { %v872_v25 = vpop.permute.xlu1 %871  ;;  %3256 = vmatmul.msk.f32.gmra.mxu3 %vm259_vm14, %v4220_v60  ;;  %v766_v26 = vpop.permute.xlu0 %765 }
 0x241   :  { %v978_v27 = vpop.permute.xlu2 %977 }
 0x244   :  { %3262 = vmatmul.msk.f32.gmra.mxu0 %vm259_vm14, %v766_v26 }
 0x248   :  { %3267 = vmatmul.msk.f32.vlgmr.msrb.gmra.mxu3 %vm259_vm14, %v872_v25  ;;  %v982_v28 = vpop.permute.xlu0 %981  ;;  %v874_v32 = vpop.permute.xlu1 %873 }
 0x249   :  { %v3773_v31 = vpop.permute.xlu2 %3772  ;;  %3272 = vmatpush.xpose.msk.msrb.mxu0 %vm259_vm14, %v982_v28 }
 0x24a   :  { %v3774_v33 = vunpack.i.l.bf16 %v3773_v31  ;;  %v3775_v34 = vunpack.i.h.bf16 %v3773_v31 }
 0x24c   :  { %649 = vmatpush.msrb.mxu1 %v3774_v33  ;;  %3273 = vmatmul.msk.f32.vlgmr.msrb.gmra.mxu0 %vm259_vm14, %v978_v27 }
 0x24e   :  { %650 = vmatpush.msrb.mxu1 %v3775_v34 }
 0x250   :  { %3268 = vmatmul.msk.f32.gmra.mxu3 %vm259_vm14, %v874_v32  ;;  %v3763_v35 = vpop.permute.xlu0 %3762  ;;  %v980_v37 = vpop.permute.xlu1 %979 }
 0x251   :  { %v3764_v36 = vunpack.i.l.bf16 %v3763_v35  ;;  %v3765_v38 = vunpack.i.h.bf16 %v3763_v35 }
 0x253   :  { %435 = vmatpush.msra.mxu2 %v3764_v36 }
 0x254   :  { %3274 = vmatmul.msk.f32.gmra.mxu0 %vm259_vm14, %v980_v37 }
 0x255   :  { %436 = vmatpush.msra.mxu2 %v3765_v38 }
 0x258   :  { %v4362_v36 = vpop.permute.xlu1 %3767 }
 0x28f   :  { %v287_v43 = vpop.f32.mrf.mxu2 }
 0x290   :  { %v4276_v44 = vadd.f32 %v287_v43, %v4273_v42 }
 0x292   :  { %v293_v45 = vsel %vm259_vm14, %v4276_v44, -inf }
 0x293   :  { %294 = vmax.xlane.f32.xlu0 %v293_v45 }
 0x297   :  { %v290_v60 = vpop.f32.mrf.mxu2 }
 0x298   :  { %v4308_v62 = vadd.f32 %v290_v60, %v4280_v29 }
 0x29a   :  { %v296_v2 = vsel %vm259_vm14, %v4308_v62, -inf }
 0x29b   :  { %v379_v46 = vpop.f32.mrf.mxu3 }
 0x29c   :  { %v4293_v55 = vadd.f32 %v379_v46, %v4273_v42 }
 0x29e   :  { %v385_v59 = vsel %vm259_vm14, %v4293_v55, -inf }
 0x2a3   :  { %v382_v48 = vpop.f32.mrf.mxu3 }
 0x2a4   :  { %v4283_v49 = vadd.f32 %v382_v48, %v4280_v29 }
 0x2a6   :  { %v388_v50 = vsel %vm259_vm14, %v4283_v49, -inf }
 0x2a7   :  { %389 = vmax.xlane.f32.xlu0 %v388_v50 }
 0x2a9   :  { %v595_v51 = vpop.f32.mrf.mxu0 }
 0x2aa   :  { %v4288_v52 = vadd.f32 %v595_v51, %v4273_v42 }
 0x2ab   :  { %v488_v53 = vpop.f32.mrf.mxu3 }
 0x2ac   :  { %v601_v54 = vsel %vm259_vm14, %v4288_v52, -inf  ;;  %v4323_v7 = vadd.f32 %v488_v53, %v4273_v42 }
 0x2ad   :  { %602 = vmax.xlane.f32.xlu1 %v601_v54 }
 0x2ae   :  { %v494_v9 = vsel %vm259_vm14, %v4323_v7, -inf }
 0x2b1   :  { %v598_v56 = vpop.f32.mrf.mxu0 }
 0x2b2   :  { %v4296_v57 = vadd.f32 %v598_v56, %v4280_v29 }
 0x2b3   :  { %v491_v19 = vpop.f32.mrf.mxu3 }
 0x2b4   :  { %v4299_v30 = vadd.f32 %v491_v19, %v4280_v29  ;;  %v604_v58 = vsel %vm259_vm14, %v4296_v57, -inf }
 0x2b5   :  { %605 = vmax.xlane.f32.xlu2 %v604_v58  ;;  %386 = vmax.xlane.f32.xlu1 %v385_v59 }
 0x2b6   :  { %v497_v61 = vsel %vm259_vm14, %v4299_v30, -inf }
 0x2b7   :  { %498 = vmax.xlane.f32.xlu0 %v497_v61 }
 0x2b9   :  { %v796_v63 = vpop.f32.mrf.mxu0 }
 0x2ba   :  { %v4318_v4 = vadd.f32 %v796_v63, %v4273_v42 }
 0x2bb   :  { %v704_v0 = vpop.f32.mrf.mxu3 }
 0x2bc   :  { %v4311_v1 = vadd.f32 %v704_v0, %v4273_v42  ;;  %v802_v6 = vsel %vm259_vm14, %v4318_v4, -inf }
 0x2bd   :  { %297 = vmax.xlane.f32.xlu2 %v296_v2 }
 0x2be   :  { %v710_v3 = vsel %vm259_vm14, %v4311_v1, -inf }
 0x2bf   :  { %711 = vmax.xlane.f32.xlu1 %v710_v3 }
 0x2c1   :  { %v799_v5 = vpop.f32.mrf.mxu0 }
 0x2c2   :  { %v4328_v10 = vadd.f32 %v799_v5, %v4280_v29 }
 0x2c3   :  { %v707_v11 = vpop.f32.mrf.mxu3 }
 0x2c4   :  { %v805_v15 = vsel %vm259_vm14, %v4328_v10, -inf  ;;  %v4338_v17 = vadd.f32 %v707_v11, %v4280_v29 }
 0x2c5   :  { %803 = vmax.xlane.f32.xlu2 %v802_v6 }
 0x2c6   :  { %v713_v22 = vsel %vm259_vm14, %v4338_v17, -inf }
 0x2c9   :  { %v1010_v8 = vpop.f32.mrf.mxu0 }
 0x2ca   :  { %v4341_v18 = vadd.f32 %v1010_v8, %v4273_v42 }
 0x2cb   :  { %v904_v21 = vpop.f32.mrf.mxu3 }
 0x2cc   :  { %v1016_v23 = vsel %vm259_vm14, %v4341_v18, -inf  ;;  %v4348_v24 = vadd.f32 %v904_v21, %v4273_v42 }
 0x2cd   :  { %495 = vmax.xlane.f32.xlu2 %v494_v9 }
 0x2ce   :  { %v910_v25 = vsel %vm259_vm14, %v4348_v24, -inf }
 0x2d1   :  { %v1013_v12 = vpop.f32.mrf.mxu0 }
 0x2d2   :  { %v4331_v13 = vadd.f32 %v1013_v12, %v4280_v29 }
 0x2d3   :  { %v907_v26 = vpop.f32.mrf.mxu3 }
 0x2d4   :  { %v1019_v16 = vsel %vm259_vm14, %v4331_v13, -inf  ;;  %v4353_v27 = vadd.f32 %v907_v26, %v4280_v29 }
 0x2d5   :  { %806 = vmax.xlane.f32.xlu2 %v805_v15  ;;  %1020 = vmax.xlane.f32.xlu1 %v1019_v16 }
 0x2d6   :  { %v913_v28 = vsel %vm259_vm14, %v4353_v27, -inf }
 0x2dd   :  { %714 = vmax.xlane.f32.xlu1 %v713_v22  ;;  %1017 = vmax.xlane.f32.xlu2 %v1016_v23 }
 0x2e5   :  { %911 = vmax.xlane.f32.xlu1 %v910_v25 }
 0x2ed   :  { %914 = vmax.xlane.f32.xlu1 %v913_v28 }
 0x306   :  { %v295_v31 = vpop.xlane.xlu0 %294 }
 0x307   :  { %v299_v32 = vsub.f32 %v4276_v44, %v295_v31 }
 0x309   :  { %v301_v33 = vmul.f32 1.442695, %v299_v32 }
 0x30b   :  { %3834 = vpow2.f32 %v301_v33 }
 0x311   :  { %v4358_v34 = vpop.eup %3834 }
 0x312   :  { %v305_v35 = vsel %vm259_vm14, %v4358_v34, 0.0 }
 0x313   :  { %306 = vadd.xlane.f32.xlu0 %v305_v35 }
 0x31a   :  { %v390_v37 = vpop.xlane.xlu0 %389 }
 0x31b   :  { %v392_v40 = vsub.f32 %v4283_v49, %v390_v37 }
 0x31d   :  { %v395_v20 = vmul.f32 1.442695, %v392_v40 }
 0x320   :  { %v603_v38 = vpop.xlane.xlu1 %602 }
 0x321   :  { %v607_v39 = vsub.f32 %v4288_v52, %v603_v38 }
 0x323   :  { %v609_v41 = vmul.f32 1.442695, %v607_v39 }
 0x325   :  { %3836 = vpow2.f32 %v609_v41 }
 0x326   :  { %3838 = vpow2.f32 %v395_v20 }
 0x328   :  { %v606_v43 = vpop.xlane.xlu2 %605  ;;  %v387_v44 = vpop.xlane.xlu1 %386 }
 0x329   :  { %v608_v45 = vsub.f32 %v4296_v57, %v606_v43  ;;  %v391_v46 = vsub.f32 %v4293_v55, %v387_v44 }
 0x32a   :  { %v499_v60 = vpop.xlane.xlu0 %498 }
 0x32b   :  { %v4368_v47 = vpop.eup %3836  ;;  %v611_v48 = vmul.f32 1.442695, %v608_v45  ;;  %v393_v50 = vmul.f32 1.442695, %v391_v46  ;;  %v501_v0 = vsub.f32 %v4299_v30, %v499_v60  ;;  %v246_v45 = vpop.f32.mrf.mxu1  ;;  %v3769_v60 = vunpack.i.l.bf16 %v4362_v36 }
 0x32c   :  { %v613_v51 = vsel %vm259_vm14, %v4368_v47, 0.0  ;;  %v4372_v52 = vpop.eup %3838 }
 0x32d   :  { %3840 = vpow2.f32 %v611_v48  ;;  %614 = vadd.xlane.f32.xlu2 %v613_v51  ;;  %v400_v19 = vsel %vm259_vm14, %v4372_v52, 0.0  ;;  %v504_v3 = vmul.f32 1.442695, %v501_v0 }
 0x32e   :  { %3842 = vpow2.f32 %v393_v50 }
 0x330   :  { %v298_v49 = vpop.xlane.xlu2 %297 }
 0x331   :  { %v300_v53 = vsub.f32 %v4308_v62, %v298_v49 }
 0x332   :  { %v712_v5 = vpop.xlane.xlu1 %711 }
 0x333   :  { %v4375_v54 = vpop.eup %3840  ;;  %v303_v56 = vmul.f32 1.442695, %v300_v53  ;;  %v716_v11 = vsub.f32 %v4311_v1, %v712_v5  ;;  %v248_v48 = vpop.f32.mrf.mxu1 }
 0x334   :  { %v4377_v55 = vpop.eup %3842  ;;  %v616_v57 = vsel %vm259_vm14, %v4375_v54, 0.0  ;;  %v3781_v50 = vpack.i.bf16 %v246_v45, %v248_v48 }
 0x335   :  { %3844 = vpow2.f32 %v303_v56  ;;  %617 = vadd.xlane.f32.xlu1 %v616_v57  ;;  %v397_v58 = vsel %vm259_vm14, %v4377_v55, 0.0  ;;  %401 = vadd.xlane.f32.xlu2 %v400_v19  ;;  %v718_v30 = vmul.f32 1.442695, %v716_v11 }
 0x336   :  { %398 = vadd.xlane.f32.xlu0 %v397_v58 }
 0x338   :  { %v804_v59 = vpop.xlane.xlu2 %803 }
 0x339   :  { %v808_v61 = vsub.f32 %v4318_v4, %v804_v59 }
 0x33b   :  { %v4386_v62 = vpop.eup %3844  ;;  %v810_v63 = vmul.f32 1.442695, %v808_v61  ;;  %v3770_v61 = vunpack.i.h.bf16 %v4362_v36 }
 0x33c   :  { %v308_v2 = vsel %vm259_vm14, %v4386_v62, 0.0 }
 0x33d   :  { %3846 = vpow2.f32 %v810_v63 }
 0x33e   :  { %309 = vadd.xlane.f32.xlu0 %v308_v2  ;;  %3848 = vpow2.f32 %v504_v3 }
 0x340   :  { %v496_v6 = vpop.xlane.xlu2 %495 }
 0x341   :  { %v500_v8 = vsub.f32 %v4323_v7, %v496_v6 }
 0x343   :  { %v4392_v9 = vpop.eup %3846  ;;  %v502_v4 = vmul.f32 1.442695, %v500_v8 }
 0x344   :  { %v814_v12 = vsel %vm259_vm14, %v4392_v9, 0.0  ;;  %v4398_v22 = vpop.eup %3848 }
 0x345   :  { %3850 = vpow2.f32 %v502_v4  ;;  %v509_v25 = vsel %vm259_vm14, %v4398_v22, 0.0 }
 0x346   :  { %815 = vadd.xlane.f32.xlu0 %v814_v12  ;;  %3852 = vpow2.f32 %v718_v30 }
 0x348   :  { %v807_v15 = vpop.xlane.xlu2 %806  ;;  %v1021_v16 = vpop.xlane.xlu1 %1020 }
 0x349   :  { %v809_v21 = vsub.f32 %v4328_v10, %v807_v15  ;;  %v1023_v51 = vsub.f32 %v4331_v13, %v1021_v16 }
 0x34b   :  { %v4400_v23 = vpop.eup %3850  ;;  %v812_v7 = vmul.f32 1.442695, %v809_v21  ;;  %v1026_v56 = vmul.f32 1.442695, %v1023_v51 }
 0x34c   :  { %v506_v1 = vsel %vm259_vm14, %v4400_v23, 0.0  ;;  %v4406_v31 = vpop.eup %3852 }
 0x34d   :  { %3854 = vpow2.f32 %v812_v7  ;;  %507 = vadd.xlane.f32.xlu2 %v506_v1  ;;  %v722_v39 = vsel %vm259_vm14, %v4406_v31, 0.0 }
 0x34e   :  { %510 = vadd.xlane.f32.xlu0 %v509_v25 }
 0x350   :  { %v715_v26 = vpop.xlane.xlu1 %714  ;;  %v1018_v28 = vpop.xlane.xlu2 %1017 }
 0x351   :  { %v717_v10 = vsub.f32 %v4338_v17, %v715_v26  ;;  %v1022_v32 = vsub.f32 %v4341_v18, %v1018_v28 }
 0x353   :  { %v4410_v33 = vpop.eup %3854  ;;  %v720_v35 = vmul.f32 1.442695, %v717_v10  ;;  %v1024_v37 = vmul.f32 1.442695, %v1022_v32 }
 0x354   :  { %v817_v38 = vsel %vm259_vm14, %v4410_v33, 0.0 }
 0x355   :  { %3856 = vpow2.f32 %v720_v35  ;;  %818 = vadd.xlane.f32.xlu1 %v817_v38  ;;  %723 = vadd.xlane.f32.xlu2 %v722_v39 }
 0x356   :  { %3858 = vpow2.f32 %v1024_v37 }
 0x358   :  { %v912_v40 = vpop.xlane.xlu1 %911 }
 0x359   :  { %v916_v41 = vsub.f32 %v4348_v24, %v912_v40 }
 0x35b   :  { %v4417_v17 = vpop.eup %3856  ;;  %v918_v18 = vmul.f32 1.442695, %v916_v41 }
 0x35c   :  { %v4419_v20 = vpop.eup %3858  ;;  %v725_v43 = vsel %vm259_vm14, %v4417_v17, 0.0 }
 0x35d   :  { %3860 = vpow2.f32 %v918_v18  ;;  %v1028_v44 = vsel %vm259_vm14, %v4419_v20, 0.0  ;;  %726 = vadd.xlane.f32.xlu0 %v725_v43 }
 0x35e   :  { %1029 = vadd.xlane.f32.xlu1 %v1028_v44 }
 0x360   :  { %v915_v49 = vpop.xlane.xlu1 %914 }
 0x361   :  { %v917_v57 = vsub.f32 %v4353_v27, %v915_v49 }
 0x363   :  { %v4425_v46 = vpop.eup %3860  ;;  %v920_v58 = vmul.f32 1.442695, %v917_v57 }
 0x364   :  { %v922_v24 = vsel %vm259_vm14, %v4425_v46, 0.0 }
 0x366   :  { %923 = vadd.xlane.f32.xlu1 %v922_v24 }
 0x36d   :  { %3782 = vrot.lane.b32.xlu2 %v3781_v50, %s4032_s20 }
 0x371   :  { %3777 = vrot.lane.b32.xlu0 %v3781_v50, %s4028_s16 }
 0x37f   :  { %3787 = vrot.lane.b32.xlu1 %v3781_v50, %s4033_s21 }
 0x386   :  { %v307_v53 = vpop.xlane.xlu0 %306 }
 0x387   :  { %3862 = vrcp.f32 %v307_v53 }
 0x388   :  { %3864 = vpow2.f32 %v1026_v56 }
 0x389   :  { %3866 = vpow2.f32 %v920_v58 }
 0x38d   :  { %v3863_v19 = vpop.eup %3862 }
 0x38e   :  { %v313_v59 = vmul.f32 %v3863_v19, %v4358_v34  ;;  %v4438_v13 = vpop.eup %3864 }
 0x38f   :  { %v1031_v63 = vsel %vm259_vm14, %v4438_v13, 0.0  ;;  %v4442_v27 = vpop.eup %3866 }
 0x390   :  { %3233 = vmatmul.msk.f32.vlgmr.msrb.gmra.mxu2 %vm259_vm14, %v313_v59  ;;  %v925_v34 = vsel %vm259_vm14, %v4442_v27, 0.0 }
 0x391   :  { %542 = vmatpush.msrb.mxu2 %v3769_v60 }
 0x393   :  { %543 = vmatpush.msrb.mxu2 %v3770_v61 }
 0x396   :  { %1032 = vadd.xlane.f32.xlu2 %v1031_v63 }
 0x39b   :  { %926 = vadd.xlane.f32.xlu0 %v925_v34 }
 0x3a0   :  { %v615_v0 = vpop.xlane.xlu2 %614 }
 0x3a1   :  { %3868 = vrcp.f32 %v615_v0 }
 0x3a7   :  { %v3869_v2 = vpop.eup %3868 }
 0x3a8   :  { %v618_v3 = vpop.xlane.xlu1 %617  ;;  %v621_v36 = vmul.f32 %v3869_v2, %v4368_v47  ;;  %v402_v12 = vpop.xlane.xlu2 %401 }
 0x3a9   :  { %3870 = vrcp.f32 %v618_v3  ;;  %v399_v5 = vpop.xlane.xlu0 %398 }
 0x3aa   :  { %3251 = vmatmul.msk.f32.vlgmr.msrb.gmra.mxu1 %vm259_vm14, %v621_v36 }
 0x3af   :  { %v3871_v6 = vpop.eup %3870 }
 0x3b0   :  { %v622_v8 = vmul.f32 %v3871_v6, %v4375_v54 }
 0x3b1   :  { %v310_v11 = vpop.xlane.xlu0 %309 }
 0x3b2   :  { %3872 = vrcp.f32 %v310_v11  ;;  %3252 = vmatmul.msk.f32.gmra.mxu1 %vm259_vm14, %v622_v8 }
 0x3b3   :  { %3874 = vrcp.f32 %v399_v5 }
 0x3b4   :  { %3876 = vrcp.f32 %v402_v12  ;;  %v3684_v12 = vld [vmem:[%s5354_s2 + $0x18] sm:$0xff] }
 0x3b5   :  { %1132 = vmatpush.bf16.msra.mxu3 %v3684_v12 }
 0x3b8   :  { %v3873_v4 = vpop.eup %3872 }
 0x3b9   :  { %v314_v30 = vmul.f32 %v3873_v4, %v4386_v62  ;;  %v3875_v15 = vpop.eup %3874  ;;  %v816_v21 = vpop.xlane.xlu0 %815 }
 0x3ba   :  { %v405_v16 = vmul.f32 %v3875_v15, %v4377_v55  ;;  %v3877_v54 = vpop.eup %3876 }
 0x3bb   :  { %3234 = vmatmul.msk.f32.gmra.mxu2 %vm259_vm14, %v314_v30  ;;  %v406_v1 = vmul.f32 %v3877_v54, %v4372_v52  ;;  %v3683_v30 = vld [vmem:[%s5354_s2 + $0x10] sm:$0xff] }
 0x3bc   :  { %1133 = vmatpush.bf16.msra.mxu3 %v3683_v30 }
 0x3c0   :  { %v508_v47 = vpop.xlane.xlu2 %507 }
 0x3c1   :  { %3878 = vrcp.f32 %v508_v47  ;;  %v511_v62 = vpop.xlane.xlu0 %510  ;;  %v3682_v47 = vld [vmem:[%s5354_s2 + $0x8] sm:$0xff] }
 0x3c2   :  { %3880 = vrcp.f32 %v511_v62  ;;  %1134 = vmatpush.bf16.msra.mxu3 %v3682_v47  ;;  %v3321_v47 = vld [vmem:[%s5355_s3 + $0x30] sm:$0xf] }
 0x3c3   :  { %3239 = vmatmul.msk.f32.vlgmr.msra.gmra.mxu2 %vm259_vm14, %v405_v16  ;;  %v3681_v16 = vld [vmem:[%s5354_s2] sm:$0xff] }
 0x3c4   :  { %752 = vmatpush.msra.mxu2 %v248_v48 }
 0x3c6   :  { %753 = vmatpush.msra.mxu2 %v246_v45  ;;  %1135 = vmatpush.bf16.msra.mxu3 %v3681_v16  ;;  %v3692_v16 = vld [vmem:[%s5355_s3 + $0x34] sm:$0xf0] }
 0x3c7   :  { %v3879_v25 = vpop.eup %3878 }
 0x3c8   :  { %v724_v7 = vpop.xlane.xlu2 %723  ;;  %v514_v28 = vmul.f32 %v3879_v25, %v4400_v23  ;;  %v819_v10 = vpop.xlane.xlu1 %818 }
 0x3c9   :  { %v3881_v35 = vpop.eup %3880  ;;  %3882 = vrcp.f32 %v724_v7 }
 0x3ca   :  { %v515_v37 = vmul.f32 %v3881_v35, %v4398_v22  ;;  %3884 = vrcp.f32 %v816_v21 }
 0x3cb   :  { %3240 = vmatmul.msk.f32.gmra.mxu2 %vm259_vm14, %v406_v1 }
 0x3cf   :  { %v3883_v39 = vpop.eup %3882 }
 0x3d0   :  { %v3783_v26 = vpop.permute.xlu2 %3782  ;;  %v727_v38 = vpop.xlane.xlu0 %726  ;;  %v730_v23 = vmul.f32 %v3883_v39, %v4406_v31 }
 0x3d1   :  { %v3784_v55 = vunpack.i.l.bf16 %v3783_v26  ;;  %v3785_v32 = vunpack.i.h.bf16 %v3783_v26  ;;  %v1030_v52 = vpop.xlane.xlu1 %1029  ;;  %3886 = vrcp.f32 %v727_v38  ;;  %v3885_v41 = vpop.eup %3884 }
 0x3d2   :  { %3888 = vrcp.f32 %v819_v10  ;;  %v822_v22 = vmul.f32 %v3885_v41, %v4392_v9 }
 0x3d3   :  { %3245 = vmatmul.msk.f32.vlgmr.msrb.gmra.mxu2 %vm259_vm14, %v514_v28 }
 0x3d4   :  { %958 = vmatpush.msrb.mxu2 %v3784_v55 }
 0x3d6   :  { %959 = vmatpush.msrb.mxu2 %v3785_v32 }
 0x3d7   :  { %v3887_v44 = vpop.eup %3886 }
 0x3d8   :  { %v731_v24 = vmul.f32 %v3887_v44, %v4417_v17  ;;  %v3889_v31 = vpop.eup %3888  ;;  %v3995_v44 = vld [vmem:[%s5352_s0] sm:$0xff] }
 0x3d9   :  { %v924_v43 = vpop.xlane.xlu1 %923  ;;  %v823_v50 = vmul.f32 %v3889_v31, %v4410_v33 }
 0x3da   :  { %3890 = vrcp.f32 %v924_v43 }
 0x3db   :  { %3246 = vmatmul.msk.f32.gmra.mxu2 %vm259_vm14, %v515_v37  ;;  %3892 = vrcp.f32 %v1030_v52 }
 0x3e0   :  { %v3891_v48 = vpop.eup %3890 }
 0x3e1   :  { %v930_v51 = vmul.f32 %v3891_v48, %v4425_v46  ;;  %v3893_v9 = vpop.eup %3892  ;;  %v3996_v48 = vld [vmem:[%s5352_s0 + $0x8] sm:$0xff] }
 0x3e2   :  { %v1036_v17 = vmul.f32 %v3893_v9, %v4419_v20  ;;  %v3997_v9 = vld [vmem:[%s5352_s0 + $0x10] sm:$0xff] }
 0x3e3   :  { %3257 = vmatmul.msk.f32.vlgmr.msra.gmra.mxu2 %vm259_vm14, %v730_v23  ;;  %v3778_v40 = vpop.permute.xlu0 %3777 }
 0x3e4   :  { %v3779_v18 = vunpack.i.l.bf16 %v3778_v40  ;;  %v3780_v45 = vunpack.i.h.bf16 %v3778_v40  ;;  %v4521_v40 = vld [vmem:[%s5357_s5] sm:$0x3f] }
 0x3e5   :  { %v1097_v41 = vperm.slane %v4521_v40, 4 }
 0x3e6   :  { %852 = vmatpush.msra.mxu1 %v3779_v18 }
 0x3e8   :  { %853 = vmatpush.msra.mxu1 %v3780_v45 }
 0x3e9   :  { %3263 = vmatmul.msk.f32.vlgmr.msra.gmra.mxu1 %vm259_vm14, %v822_v22 }
 0x3eb   :  { %3258 = vmatmul.msk.f32.gmra.mxu2 %vm259_vm14, %v731_v24 }
 0x3f1   :  { %v3788_v49 = vpop.permute.xlu1 %3787  ;;  %3264 = vmatmul.msk.f32.gmra.mxu1 %vm259_vm14, %v823_v50 }
 0x3f2   :  { %v3789_v53 = vunpack.i.l.bf16 %v3788_v49  ;;  %v3790_v56 = vunpack.i.h.bf16 %v3788_v49 }
 0x3f3   :  { %3269 = vmatmul.msk.f32.vlgmr.msrb.gmra.mxu2 %vm259_vm14, %v930_v51 }
 0x3f4   :  { %1064 = vmatpush.msrb.mxu1 %v3789_v53 }
 0x3f6   :  { %1065 = vmatpush.msrb.mxu1 %v3790_v56 }
 0x3f9   :  { %3275 = vmatmul.msk.f32.vlgmr.msrb.gmra.mxu1 %vm259_vm14, %v1036_v17 }
 0x409   :  { %v1033_v57 = vpop.xlane.xlu2 %1032 }
 0x40a   :  { %3894 = vrcp.f32 %v1033_v57 }
 0x40e   :  { %v927_v19 = vpop.xlane.xlu0 %926 }
 0x40f   :  { %3896 = vrcp.f32 %v927_v19 }
 0x410   :  { %v3895_v33 = vpop.eup %3894 }
 0x411   :  { %v1037_v46 = vmul.f32 %v3895_v33, %v4438_v13  ;;  %v3998_v33 = vld [vmem:[%s5352_s0 + $0x18] sm:$0xff] }
 0x413   :  { %v338_v58 = vpop.f32.mrf.mxu2  ;;  %3276 = vmatmul.msk.f32.gmra.mxu1 %vm259_vm14, %v1037_v46 }
 0x414   :  { %344 = vst.msk [vmem:[#allocation2] sm:$0xff] %vm259_vm14, %v338_v58 }
 0x415   :  { %v3897_v59 = vpop.eup %3896 }
 0x416   :  { %v931_v60 = vmul.f32 %v3897_v59, %v4442_v27 }
 0x418   :  { %3270 = vmatmul.msk.f32.gmra.mxu2 %vm259_vm14, %v931_v60 }
 0x427   :  { %v652_v20 = vpop.f32.mrf.mxu1 }
 0x42f   :  { %v655_v61 = vpop.f32.mrf.mxu1 }
 0x430   :  { %662 = vrot.lane.b32.xlu2 %v655_v61, %s4029_s17 }
 0x43e   :  { %v341_v63 = vpop.f32.mrf.mxu2 }
 0x43f   :  { %345 = vst.msk [vmem:[#allocation2 + $0x8] sm:$0xff] %vm259_vm14, %v341_v63 }
 0x446   :  { %v438_v34 = vpop.f32.mrf.mxu2 }
 0x447   :  { %446 = vrot.lane.b32.xlu1 %v438_v34, %s4031_s19 }
 0x44e   :  { %v441_v13 = vpop.f32.mrf.mxu2 }
 0x44f   :  { %448 = vrot.lane.b32.xlu1 %v441_v13, %s4031_s19 }
 0x456   :  { %v545_v0 = vpop.f32.mrf.mxu2 }
 0x457   :  { %553 = vrot.lane.b32.xlu0 %v545_v0, %s4030_s18 }
 0x45e   :  { %v548_v2 = vpop.f32.mrf.mxu2 }
 0x45f   :  { %555 = vrot.lane.b32.xlu1 %v548_v2, %s4030_s18 }
 0x466   :  { %v755_v27 = vpop.f32.mrf.mxu2  ;;  %v855_v3 = vpop.f32.mrf.mxu1 }
 0x467   :  { %761 = vst.msk [vmem:[#allocation2 + $0x10] sm:$0xff] %vm259_vm14, %v755_v27  ;;  %660 = vrot.lane.b32.xlu1 %v652_v20, %s4029_s17  ;;  %863 = vrot.lane.b32.xlu0 %v855_v3, %s4031_s19 }
 0x46e   :  { %v758_v36 = vpop.f32.mrf.mxu2  ;;  %v858_v5 = vpop.f32.mrf.mxu1 }
 0x46f   :  { %762 = vst.msk [vmem:[#allocation2 + $0x18] sm:$0xff] %vm259_vm14, %v758_v36  ;;  %865 = vrot.lane.b32.xlu1 %v858_v5, %s4031_s19 }
 0x476   :  { %v961_v6 = vpop.f32.mrf.mxu2  ;;  %v1067_v8 = vpop.f32.mrf.mxu1 }
 0x477   :  { %969 = vrot.lane.b32.xlu0 %v961_v6, %s4030_s18 }
 0x47f   :  { %1075 = vrot.lane.b32.xlu0 %v1067_v8, %s4029_s17 }
 0x48a   :  { %v663_v1 = vpop.permute.xlu2 %662 }
 0x490   :  { %v1070_v4 = vpop.f32.mrf.mxu1 }
 0x49b   :  { %v964_v11 = vpop.f32.mrf.mxu2 }
 0x49c   :  { %971 = vrot.lane.b32.xlu1 %v964_v11, %s4030_s18 }
 0x4a4   :  { %1077 = vrot.lane.b32.xlu1 %v1070_v4, %s4029_s17 }
 0x4b9   :  { %v447_v15 = vpop.permute.xlu1 %446 }
 0x4ba   :  { %453 = vst.msk [vmem:[#allocation2] sm:$0xff] %vm452_vm2, %v447_v15 }
 0x4c1   :  { %v449_v21 = vpop.permute.xlu1 %448 }
 0x4c2   :  { %454 = vst.msk [vmem:[#allocation2 + $0x8] sm:$0xff] %vm452_vm2, %v449_v21  ;;  %v3691_v21 = vld [vmem:[%s5355_s3 + $0x34] sm:$0xf] }
 0x4c9   :  { %v554_v54 = vpop.permute.xlu0 %553 }
 0x4ca   :  { %560 = vst.msk [vmem:[#allocation2] sm:$0xff] %vm559_vm3, %v554_v54  ;;  %v3322_v54 = vor.u32 %v3692_v16, %v3321_v47 }
 0x4cc   :  { %1315 = vmatpush.bf16.msra.mxu2 %v3322_v54  ;;  %v3708_v54 = vld [vmem:[%s5356_s4 + $0x78] sm:$0xff] }
 0x4cd   :  { %1509 = vmatpush.bf16.msrb.mxu3 %v3708_v54 }
 0x4d1   :  { %v556_v7 = vpop.permute.xlu1 %555 }
 0x4d2   :  { %561 = vst.msk [vmem:[#allocation2 + $0x8] sm:$0xff] %vm559_vm3, %v556_v7  ;;  %v3323_v7 = vld [vmem:[%s5355_s3 + $0x38] sm:$0xf0] }
 0x4d3   :  { %668 = vst.msk [vmem:[#allocation2 + $0x8] sm:$0xff] %vm666_vm4, %v663_v1  ;;  %v3326_v1 = vor.u32 %v3691_v21, %v3323_v7 }
 0x4d5   :  { %1334 = vmatpush.bf16.msra.mxu0 %v3326_v1 }
 0x4d9   :  { %v661_v62 = vpop.permute.xlu1 %660  ;;  %v864_v25 = vpop.permute.xlu0 %863 }
 0x4da   :  { %667 = vst.msk [vmem:[#allocation2] sm:$0xff] %vm666_vm4, %v661_v62  ;;  %v1084_v10 = vld [vmem:[#allocation2 + $0x8] sm:$0xff]  ;;  %v3313_v62 = vld [vmem:[%s5355_s3 + $0x20] sm:$0xf] }
 0x4db   :  { %869 = vst.msk [vmem:[#allocation2 + $0x10] sm:$0xff] %vm452_vm2, %v864_v25  ;;  %v3690_v25 = vld [vmem:[%s5355_s3 + $0x24] sm:$0xf0] }
 0x4e1   :  { %v866_v26 = vpop.permute.xlu1 %865  ;;  %v1083_v28 = vld [vmem:[#allocation2] sm:$0xff] }
 0x4e2   :  { %870 = vst.msk [vmem:[#allocation2 + $0x18] sm:$0xff] %vm452_vm2, %v866_v26  ;;  %v1095_v55 = vpack.c.bf16 %v1084_v10, %v1083_v28  ;;  %v3689_v26 = vld [vmem:[%s5355_s3 + $0x24] sm:$0xf]  ;;  %v3314_v28 = vor.u32 %v3690_v25, %v3313_v62  ;;  %v3315_v10 = vld [vmem:[%s5355_s3 + $0x28] sm:$0xf0]  ;;  %v3707_v62 = vld [vmem:[%s5356_s4 + $0x70] sm:$0xff] }
 0x4e3   :  { %v3699_v25 = vld [vmem:[%s5356_s4 + $0x30] sm:$0xff]  ;;  %1510 = vmatpush.bf16.msrb.mxu3 %v3707_v62 }
 0x4e4   :  { %3293 = vmatmul.msk.bf16.vlgmr.msra.gmra.mxu3 %vm51_vm0, %v1095_v55  ;;  %v3318_v55 = vor.u32 %v3689_v26, %v3315_v10  ;;  %1316 = vmatpush.bf16.msra.mxu2 %v3314_v28 }
 0x4e6   :  { %1335 = vmatpush.bf16.msra.mxu0 %v3318_v55  ;;  %v3706_v55 = vld [vmem:[%s5356_s4 + $0x68] sm:$0xff] }
 0x4e7   :  { %1511 = vmatpush.bf16.msrb.mxu3 %v3706_v55 }
 0x4e9   :  { %v970_v32 = vpop.permute.xlu0 %969 }
 0x4ea   :  { %975 = vst.msk [vmem:[#allocation2 + $0x10] sm:$0xff] %vm559_vm3, %v970_v32  ;;  %v3305_v32 = vld [vmem:[%s5355_s3 + $0x10] sm:$0xf] }
 0x4f1   :  { %v1076_v35 = vpop.permute.xlu0 %1075 }
 0x4f2   :  { %1081 = vst.msk [vmem:[#allocation2 + $0x10] sm:$0xff] %vm666_vm4, %v1076_v35  ;;  %v3688_v35 = vld [vmem:[%s5355_s3 + $0x14] sm:$0xf0] }
 0x4f9   :  { %v1085_v38 = vld [vmem:[#allocation2 + $0x10] sm:$0xff] }
 0x50e   :  { %v972_v37 = vpop.permute.xlu1 %971 }
 0x50f   :  { %976 = vst.msk [vmem:[#allocation2 + $0x18] sm:$0xff] %vm559_vm3, %v972_v37  ;;  %v3687_v37 = vld [vmem:[%s5355_s3 + $0x14] sm:$0xf] }
 0x516   :  { %v1078_v52 = vpop.permute.xlu1 %1077 }
 0x517   :  { %1082 = vst.msk [vmem:[#allocation2 + $0x18] sm:$0xff] %vm666_vm4, %v1078_v52  ;;  %v3306_v52 = vor.u32 %v3688_v35, %v3305_v32  ;;  %v3698_v32 = vld [vmem:[%s5356_s4 + $0x28] sm:$0xff] }
 0x519   :  { %1317 = vmatpush.bf16.msra.mxu2 %v3306_v52  ;;  %v3705_v52 = vld [vmem:[%s5356_s4 + $0x60] sm:$0xff] }
 0x51a   :  { %1512 = vmatpush.bf16.msrb.mxu3 %v3705_v52 }
 0x51e   :  { %v1086_v39 = vld [vmem:[#allocation2 + $0x18] sm:$0xff] }
 0x51f   :  { %v1096_v23 = vpack.c.bf16 %v1086_v39, %v1085_v38  ;;  %v3307_v38 = vld [vmem:[%s5355_s3 + $0x18] sm:$0xf0] }
 0x521   :  { %3294 = vmatmul.msk.bf16.gmra.mxu3 %vm51_vm0, %v1096_v23  ;;  %v3310_v23 = vor.u32 %v3687_v37, %v3307_v38 }
 0x523   :  { %1336 = vmatpush.bf16.msra.mxu0 %v3310_v23 }
 0x567   :  { %v1137_v18 = vpop.f32.mrf.mxu3 }
 0x568   :  { %v1138_v43 = vadd.f32 %v1137_v18, %v1097_v41  ;;  %v3297_v18 = vld [vmem:[%s5355_s3] sm:$0xf] }
 0x56a   :  { %v4527_v45 = vadd.f32 %v3995_v44, %v1138_v43  ;;  %v3686_v43 = vld [vmem:[%s5355_s3 + $0x4] sm:$0xf0]  ;;  %v3685_v44 = vld [vmem:[%s5355_s3 + $0x4] sm:$0xf] }
 0x56c   :  { %v1151_v22 = vsel %vm51_vm0, %v4527_v45, 0.0 }
 0x56d   :  { %1152 = vadd.xlane.f32.xlu2 %v1151_v22 }
 0x56f   :  { %v1139_v24 = vpop.f32.mrf.mxu3 }
 0x570   :  { %v1140_v31 = vadd.f32 %v1139_v24, %v1097_v41  ;;  %v3298_v24 = vor.u32 %v3686_v43, %v3297_v18 }
 0x572   :  { %v4534_v50 = vadd.f32 %v3996_v48, %v1140_v31  ;;  %v3299_v31 = vld [vmem:[%s5355_s3 + $0x8] sm:$0xf0]  ;;  %1318 = vmatpush.bf16.msra.mxu2 %v3298_v24 }
 0x573   :  { %v3302_v48 = vor.u32 %v3685_v44, %v3299_v31 }
 0x574   :  { %v1154_v51 = vsel %vm51_vm0, %v4534_v50, 0.0 }
 0x575   :  { %1155 = vadd.xlane.f32.xlu0 %v1154_v51  ;;  %1337 = vmatpush.bf16.msra.mxu0 %v3302_v48 }
 0x5a4   :  { %v1142_v49 = vpop.f32.mrf.mxu3 }
 0x5a5   :  { %v1143_v53 = vadd.f32 %v1142_v49, %v1097_v41 }
 0x5a7   :  { %v4541_v56 = vadd.f32 %v3997_v9, %v1143_v53 }
 0x5a9   :  { %v1157_v17 = vsel %vm51_vm0, %v4541_v56, 0.0 }
 0x5aa   :  { %1158 = vadd.xlane.f32.xlu1 %v1157_v17 }
 0x5ac   :  { %v1144_v57 = vpop.f32.mrf.mxu3 }
 0x5ad   :  { %v1145_v19 = vadd.f32 %v1144_v57, %v1097_v41 }
 0x5af   :  { %v4548_v46 = vadd.f32 %v3998_v33, %v1145_v19 }
 0x5b1   :  { %v1160_v58 = vsel %vm51_vm0, %v4548_v46, 0.0 }
 0x5b2   :  { %1161 = vadd.xlane.f32.xlu2 %v1160_v58 }
 0x5e0   :  { %v1153_v59 = vpop.xlane.xlu2 %1152 }
 0x5e1   :  { %v1163_v60 = vmul.f32 %v1153_v59, %v4109_v14 }
 0x5e3   :  { %v4554_v20 = vsub.f32 %v4527_v45, %v1163_v60 }
 0x5e5   :  { %v1171_v61 = vmul.f32 %v4554_v20, %v4554_v20 }
 0x5e7   :  { %v1175_v63 = vsel %vm51_vm0, %v1171_v61, 0.0 }
 0x5e8   :  { %1176 = vadd.xlane.f32.xlu0 %v1175_v63  ;;  %v1156_v34 = vpop.xlane.xlu0 %1155 }
 0x5e9   :  { %v1164_v13 = vmul.f32 %v1156_v34, %v4109_v14 }
 0x5eb   :  { %v4561_v0 = vsub.f32 %v4534_v50, %v1164_v13 }
 0x5ed   :  { %v1172_v2 = vmul.f32 %v4561_v0, %v4561_v0 }
 0x5ef   :  { %v1178_v27 = vsel %vm51_vm0, %v1172_v2, 0.0  ;;  %v1239_v2 = vperm.slane %v4521_v40, 2 }
 0x5f0   :  { %1179 = vadd.xlane.f32.xlu1 %v1178_v27 }
 0x61d   :  { %v1159_v3 = vpop.xlane.xlu1 %1158 }
 0x61e   :  { %v1165_v36 = vmul.f32 %v1159_v3, %v4109_v14 }
 0x620   :  { %v4568_v5 = vsub.f32 %v4541_v56, %v1165_v36 }
 0x622   :  { %v1173_v6 = vmul.f32 %v4568_v5, %v4568_v5 }
 0x624   :  { %v1181_v8 = vsel %vm51_vm0, %v1173_v6, 0.0  ;;  %v1244_v6 = vperm.slane %v4521_v40, 3 }
 0x625   :  { %v1162_v11 = vpop.xlane.xlu2 %1161  ;;  %1182 = vadd.xlane.f32.xlu2 %v1181_v8 }
 0x626   :  { %v1166_v4 = vmul.f32 %v1162_v11, %v4109_v14 }
 0x628   :  { %v4575_v12 = vsub.f32 %v4548_v46, %v1166_v4 }
 0x62a   :  { %v1174_v30 = vmul.f32 %v4575_v12, %v4575_v12 }
 0x62c   :  { %v1184_v15 = vsel %vm51_vm0, %v1174_v30, 0.0 }
 0x62d   :  { %1185 = vadd.xlane.f32.xlu0 %v1184_v15 }
 0x65b   :  { %v1177_v39 = vpop.xlane.xlu0 %1176 }
 0x65c   :  { %v1187_v41 = vmul.f32 %v1177_v39, %v4109_v14 }
 0x65e   :  { %v1191_v22 = vadd.f32 1e-05, %v1187_v41 }
 0x660   :  { %3898 = vrsqrt.f32 %v1191_v22  ;;  %vm1201_vm6 = vweird.f32 %v1191_v22 }
 0x663   :  { %v1180_v51 = vpop.xlane.xlu1 %1179 }
 0x664   :  { %v1188_v49 = vmul.f32 %v1180_v51, %v4109_v14 }
 0x666   :  { %v3899_v53 = vpop.eup %3898  ;;  %v1192_v9 = vadd.f32 1e-05, %v1188_v49 }
 0x667   :  { %v1196_v17 = vmul.f32 %v3899_v53, %v1191_v22  ;;  %vm1202_vm5 = vweird.f32 %v3899_v53 }
 0x668   :  { %3900 = vrsqrt.f32 %v1192_v9  ;;  %vm1203_vm7 = vmor %vm1201_vm6, %vm1202_vm5  ;;  %vm1211_vm9 = vweird.f32 %v1192_v9 }
 0x669   :  { %v1197_v57 = vmul.f32 %v3899_v53, %v1196_v17 }
 0x66b   :  { %v1198_v19 = vmul.f32 0.5, %v1197_v57 }
 0x66d   :  { %v1199_v33 = vsub.f32 1.5, %v1198_v19  ;;  %v3704_v19 = vld [vmem:[%s5356_s4 + $0x58] sm:$0xff] }
 0x66e   :  { %v3901_v58 = vpop.eup %3900  ;;  %1513 = vmatpush.bf16.msrb.mxu3 %v3704_v19 }
 0x66f   :  { %v1200_v59 = vmul.f32 %v3899_v53, %v1199_v33  ;;  %v1206_v60 = vmul.f32 %v3901_v58, %v1192_v9  ;;  %vm1212_vm8 = vweird.f32 %v3901_v58  ;;  %v3696_v33 = vld [vmem:[%s5356_s4 + $0x18] sm:$0xff] }
 0x670   :  { %vm1213_vm10 = vmor %vm1211_vm9, %vm1212_vm8 }
 0x671   :  { %v1207_v61 = vmul.f32 %v3901_v58, %v1206_v60  ;;  %v1204_v63 = vsel %vm1203_vm7, %v3899_v53, %v1200_v59  ;;  %v3695_v59 = vld [vmem:[%s5356_s4 + $0x10] sm:$0xff]  ;;  %v3701_v60 = vld [vmem:[%s5356_s4 + $0x40] sm:$0xff] }
 0x672   :  { %v1235_v27 = vmul.f32 %v1204_v63, %v4554_v20  ;;  %v3693_v63 = vld [vmem:[%s5356_s4] sm:$0xff] }
 0x673   :  { %v1208_v34 = vmul.f32 0.5, %v1207_v61  ;;  %v3694_v61 = vld [vmem:[%s5356_s4 + $0x8] sm:$0xff] }
 0x674   :  { %v1240_v8 = vmul.f32 %v1239_v2, %v1235_v27 }
 0x675   :  { %v1209_v13 = vsub.f32 1.5, %v1208_v34  ;;  %v1259_v34 = vld [vmem:[%s5358_s6] sm:$0x3] }
 0x676   :  { %v1245_v30 = vadd.f32 %v1244_v6, %v1240_v8 }
 0x677   :  { %v1210_v3 = vmul.f32 %v3901_v58, %v1209_v13 }
 0x679   :  { %v1214_v36 = vsel %vm1213_vm10, %v3901_v58, %v1210_v3  ;;  %v3702_v58 = vld [vmem:[%s5356_s4 + $0x48] sm:$0xff] }
 0x67a   :  { %v1236_v11 = vmul.f32 %v1214_v36, %v4561_v0  ;;  %v3700_v0 = vld [vmem:[%s5356_s4 + $0x38] sm:$0xff] }
 0x67b   :  { %1490 = vmatpush.bf16.msra.mxu1 %v3700_v0 }
 0x67c   :  { %v1241_v4 = vmul.f32 %v1239_v2, %v1236_v11 }
 0x67e   :  { %v1246_v15 = vadd.f32 %v1244_v6, %v1241_v4 }
 0x67f   :  { %1491 = vmatpush.bf16.msra.mxu1 %v3699_v25 }
 0x680   :  { %v1257_v47 = vpack.c.bf16 %v1246_v15, %v1245_v30 }
 0x682   :  { %3327 = vmatmul.msk.bf16.vlgmr.msra.gmra.mxu2 %vm51_vm0, %v1257_v47  ;;  %3329 = vmatmul.msk.bf16.vlgmr.msra.gmra.mxu0 %vm51_vm0, %v1257_v47 }
 0x683   :  { %1492 = vmatpush.bf16.msra.mxu1 %v3698_v32 }
 0x698   :  { %v1183_v16 = vpop.xlane.xlu2 %1182 }
 0x699   :  { %v1189_v20 = vmul.f32 %v1183_v16, %v4109_v14 }
 0x69b   :  { %v1193_v21 = vadd.f32 1e-05, %v1189_v20 }
 0x69d   :  { %3902 = vrsqrt.f32 %v1193_v21  ;;  %vm1221_vm12 = vweird.f32 %v1193_v21 }
 0x6a0   :  { %v1186_v7 = vpop.xlane.xlu0 %1185 }
 0x6a1   :  { %v1190_v1 = vmul.f32 %v1186_v7, %v4109_v14 }
 0x6a3   :  { %v3903_v26 = vpop.eup %3902  ;;  %v1194_v28 = vadd.f32 1e-05, %v1190_v1 }
 0x6a4   :  { %v1216_v10 = vmul.f32 %v3903_v26, %v1193_v21  ;;  %vm1222_vm11 = vweird.f32 %v3903_v26 }
 0x6a5   :  { %3904 = vrsqrt.f32 %v1194_v28  ;;  %vm1223_vm13 = vmor %vm1221_vm12, %vm1222_vm11  ;;  %vm1231_vm1 = vweird.f32 %v1194_v28 }
 0x6a6   :  { %v1217_v35 = vmul.f32 %v3903_v26, %v1216_v10 }
 0x6a8   :  { %v1218_v37 = vmul.f32 0.5, %v1217_v35 }
 0x6aa   :  { %v1219_v38 = vsub.f32 1.5, %v1218_v37 }
 0x6ab   :  { %v3905_v39 = vpop.eup %3904 }
 0x6ac   :  { %v1220_v23 = vmul.f32 %v3903_v26, %v1219_v38  ;;  %v1226_v41 = vmul.f32 %v3905_v39, %v1194_v28  ;;  %vm1232_vm15 = vweird.f32 %v3905_v39 }
 0x6ad   :  { %vm1233_vm5 = vmor %vm1231_vm1, %vm1232_vm15 }
 0x6ae   :  { %v1227_v18 = vmul.f32 %v3905_v39, %v1226_v41  ;;  %v1224_v43 = vsel %vm1223_vm13, %v3903_v26, %v1220_v23 }
 0x6af   :  { %v1237_v24 = vmul.f32 %v1224_v43, %v4568_v5  ;;  %v3697_v5 = vld [vmem:[%s5356_s4 + $0x20] sm:$0xff] }
 0x6b0   :  { %v1228_v44 = vmul.f32 0.5, %v1227_v18  ;;  %1493 = vmatpush.bf16.msra.mxu1 %v3697_v5 }
 0x6b1   :  { %v1242_v49 = vmul.f32 %v1239_v2, %v1237_v24 }
 0x6b2   :  { %v1229_v22 = vsub.f32 1.5, %v1228_v44 }
 0x6b3   :  { %v1247_v9 = vadd.f32 %v1244_v6, %v1242_v49 }
 0x6b4   :  { %v1230_v31 = vmul.f32 %v3905_v39, %v1229_v22  ;;  %1494 = vmatpush.bf16.msra.mxu1 %v3696_v33 }
 0x6b6   :  { %v1234_v48 = vsel %vm1233_vm5, %v3905_v39, %v1230_v31  ;;  %v1393_v39 = vperm.slane %v4521_v40, 5 }
 0x6b7   :  { %v1238_v51 = vmul.f32 %v1234_v48, %v4575_v12  ;;  %v3703_v12 = vld [vmem:[%s5356_s4 + $0x50] sm:$0xff] }
 0x6b8   :  { %1514 = vmatpush.bf16.msrb.mxu3 %v3703_v12  ;;  %1495 = vmatpush.bf16.msra.mxu1 %v3695_v59 }
 0x6b9   :  { %v1243_v53 = vmul.f32 %v1239_v2, %v1238_v51  ;;  %v1262_v2 = vperm.slane %v1259_v34, 1 }
 0x6bb   :  { %v1248_v17 = vadd.f32 %v1244_v6, %v1243_v53  ;;  %v1261_v6 = vperm.slane %v1259_v34, 0 }
 0x6bc   :  { %1515 = vmatpush.bf16.msrb.mxu3 %v3702_v58  ;;  %1496 = vmatpush.bf16.msra.mxu1 %v3694_v61 }
 0x6bd   :  { %v1258_v57 = vpack.c.bf16 %v1248_v17, %v1247_v9 }
 0x6bf   :  { %3328 = vmatmul.msk.bf16.gmra.mxu2 %vm51_vm0, %v1258_v57  ;;  %3330 = vmatmul.msk.bf16.gmra.mxu0 %vm51_vm0, %v1258_v57 }
 0x6c0   :  { %1516 = vmatpush.bf16.msrb.mxu3 %v3701_v60  ;;  %1497 = vmatpush.bf16.msra.mxu1 %v3693_v63 }
 0x6ff   :  { %v1339_v13 = vpop.f32.mrf.mxu0 }
 0x700   :  { %v1340_v3 = vadd.f32 %v1339_v13, %v1262_v2 }
 0x702   :  { %v1350_v11 = vmax.f32 %v1340_v3, 0.0 }
 0x705   :  { %v1320_v27 = vpop.f32.mrf.mxu2 }
 0x706   :  { %v1321_v30 = vadd.f32 %v1320_v27, %v1261_v6 }
 0x707   :  { %v1341_v36 = vpop.f32.mrf.mxu0 }
 0x708   :  { %v1342_v8 = vadd.f32 %v1341_v36, %v1262_v2  ;;  %v1349_v20 = vmax.f32 %v1321_v30, 0.0 }
 0x70a   :  { %v1352_v4 = vmax.f32 %v1342_v8, 0.0 }
 0x70c   :  { %v1390_v15 = vpack.c.bf16 %v1352_v4, %v1350_v11 }
 0x70d   :  { %v1322_v47 = vpop.f32.mrf.mxu2 }
 0x70e   :  { %v1323_v16 = vadd.f32 %v1322_v47, %v1261_v6  ;;  %1517 = vmatmul.bf16.vlgmr.msrb.gmra.mxu3 %v1390_v15 }
 0x710   :  { %v1351_v21 = vmax.f32 %v1323_v16, 0.0 }
 0x712   :  { %v1389_v54 = vpack.c.bf16 %v1351_v21, %v1349_v20  ;;  %v3430_v21 = vld [vmem:[%s5353_s1 + $0x70] sm:$0xf] }
 0x714   :  { %1498 = vmatmul.bf16.vlgmr.msra.gmra.mxu1 %v1389_v54  ;;  %v3716_v54 = vld [vmem:[%s5353_s1 + $0x74] sm:$0xf0] }
 0x73c   :  { %v1344_v0 = vpop.f32.mrf.mxu0 }
 0x73d   :  { %v1345_v1 = vadd.f32 %v1344_v0, %v1262_v2  ;;  %v3715_v0 = vld [vmem:[%s5353_s1 + $0x74] sm:$0xf] }
 0x73f   :  { %v1354_v26 = vmax.f32 %v1345_v1, 0.0  ;;  %v3432_v1 = vld [vmem:[%s5353_s1 + $0x78] sm:$0xf0] }
 0x742   :  { %v1325_v7 = vpop.f32.mrf.mxu2 }
 0x743   :  { %v1326_v10 = vadd.f32 %v1325_v7, %v1261_v6  ;;  %v3431_v7 = vor.u32 %v3716_v54, %v3430_v21 }
 0x744   :  { %v1346_v62 = vpop.f32.mrf.mxu0 }
 0x745   :  { %v1347_v25 = vadd.f32 %v1346_v62, %v1262_v2  ;;  %v1353_v37 = vmax.f32 %v1326_v10, 0.0  ;;  %v3435_v62 = vor.u32 %v3715_v0, %v3432_v1  ;;  %1693 = vmatpush.bf16.msrb.mxu2 %v3431_v7 }
 0x747   :  { %v1356_v28 = vmax.f32 %v1347_v25, 0.0  ;;  %1712 = vmatpush.bf16.msrb.mxu0 %v3435_v62  ;;  %v3422_v25 = vld [vmem:[%s5353_s1 + $0x60] sm:$0xf] }
 0x749   :  { %v1392_v55 = vpack.c.bf16 %v1356_v28, %v1354_v26  ;;  %v3714_v26 = vld [vmem:[%s5353_s1 + $0x64] sm:$0xf0]  ;;  %v3713_v28 = vld [vmem:[%s5353_s1 + $0x64] sm:$0xf] }
 0x74a   :  { %v1327_v32 = vpop.f32.mrf.mxu2  ;;  %v3423_v10 = vor.u32 %v3714_v26, %v3422_v25 }
 0x74b   :  { %v1328_v35 = vadd.f32 %v1327_v32, %v1261_v6  ;;  %1522 = vmatmul.bf16.gmra.mxu3 %v1392_v55  ;;  %v3424_v55 = vld [vmem:[%s5353_s1 + $0x68] sm:$0xf0] }
 0x74c   :  { %v3427_v32 = vor.u32 %v3713_v28, %v3424_v55  ;;  %1694 = vmatpush.bf16.msrb.mxu2 %v3423_v10 }
 0x74d   :  { %v1355_v52 = vmax.f32 %v1328_v35, 0.0  ;;  %v3414_v35 = vld [vmem:[%s5353_s1 + $0x50] sm:$0xf] }
 0x74e   :  { %1713 = vmatpush.bf16.msrb.mxu0 %v3427_v32 }
 0x74f   :  { %v1391_v38 = vpack.c.bf16 %v1355_v52, %v1353_v37  ;;  %v3712_v37 = vld [vmem:[%s5353_s1 + $0x54] sm:$0xf0]  ;;  %v3711_v52 = vld [vmem:[%s5353_s1 + $0x54] sm:$0xf] }
 0x751   :  { %1503 = vmatmul.bf16.gmra.mxu1 %v1391_v38  ;;  %v3415_v38 = vor.u32 %v3712_v37, %v3414_v35 }
 0x753   :  { %1695 = vmatpush.bf16.msrb.mxu2 %v3415_v38 }
 0x791   :  { %v1499_v23 = vpop.f32.mrf.mxu1  ;;  %v1518_v41 = vpop.f32.mrf.mxu3 }
 0x792   :  { %v1500_v18 = vadd.f32 %v1499_v23, %v1393_v39 }
 0x794   :  { %v1519_v43 = vadd.f32 %v1518_v41, %v1500_v18 }
 0x796   :  { %v4695_v44 = vadd.f32 %v1519_v43, %v4527_v45  ;;  %v3406_v43 = vld [vmem:[%s5353_s1 + $0x40] sm:$0xf] }
 0x798   :  { %v1534_v22 = vsel %vm51_vm0, %v4695_v44, 0.0 }
 0x799   :  { %v1501_v24 = vpop.f32.mrf.mxu1  ;;  %1535 = vadd.xlane.f32.xlu1 %v1534_v22  ;;  %v1520_v48 = vpop.f32.mrf.mxu3  ;;  %v3710_v22 = vld [vmem:[%s5353_s1 + $0x44] sm:$0xf0] }
 0x79a   :  { %v1502_v31 = vadd.f32 %v1501_v24, %v1393_v39  ;;  %v3709_v24 = vld [vmem:[%s5353_s1 + $0x44] sm:$0xf] }
 0x79c   :  { %v1521_v51 = vadd.f32 %v1520_v48, %v1502_v31  ;;  %v3407_v48 = vor.u32 %v3710_v22, %v3406_v43 }
 0x79e   :  { %v4700_v49 = vadd.f32 %v1521_v51, %v4534_v50  ;;  %v3408_v51 = vld [vmem:[%s5353_s1 + $0x48] sm:$0xf0]  ;;  %1696 = vmatpush.bf16.msrb.mxu2 %v3407_v48 }
 0x7a0   :  { %v1537_v40 = vsel %vm51_vm0, %v4700_v49, 0.0 }
 0x7a1   :  { %1538 = vadd.xlane.f32.xlu2 %v1537_v40  ;;  %v3411_v40 = vor.u32 %v3709_v24, %v3408_v51 }
 0x7ce   :  { %v1504_v53 = vpop.f32.mrf.mxu1  ;;  %v1523_v9 = vpop.f32.mrf.mxu3 }
 0x7cf   :  { %v1505_v17 = vadd.f32 %v1504_v53, %v1393_v39 }
 0x7d1   :  { %v1524_v45 = vadd.f32 %v1523_v9, %v1505_v17 }
 0x7d3   :  { %v4705_v57 = vadd.f32 %v1524_v45, %v4541_v56 }
 0x7d5   :  { %v1540_v19 = vsel %vm51_vm0, %v4705_v57, 0.0 }
 0x7d6   :  { %v1506_v5 = vpop.f32.mrf.mxu1  ;;  %1541 = vadd.xlane.f32.xlu0 %v1540_v19  ;;  %v1525_v33 = vpop.f32.mrf.mxu3 }
 0x7d7   :  { %v1507_v12 = vadd.f32 %v1506_v5, %v1393_v39  ;;  %v3416_v39 = vld [vmem:[%s5353_s1 + $0x58] sm:$0xf0] }
 0x7d8   :  { %v3419_v41 = vor.u32 %v3711_v52, %v3416_v39 }
 0x7d9   :  { %v1526_v50 = vadd.f32 %v1525_v33, %v1507_v12 }
 0x7da   :  { %1714 = vmatpush.bf16.msrb.mxu0 %v3419_v41 }
 0x7db   :  { %v4710_v58 = vadd.f32 %v1526_v50, %v4548_v46 }
 0x7dd   :  { %v1543_v59 = vsel %vm51_vm0, %v4710_v58, 0.0 }
 0x7de   :  { %1544 = vadd.xlane.f32.xlu1 %v1543_v59  ;;  %1715 = vmatpush.bf16.msrb.mxu0 %v3411_v40 }
 0x80c   :  { %v1536_v60 = vpop.xlane.xlu1 %1535 }
 0x80d   :  { %v1546_v61 = vmul.f32 %v1536_v60, %v4109_v14 }
 0x80f   :  { %v4716_v56 = vsub.f32 %v4695_v44, %v1546_v61 }
 0x811   :  { %v1554_v63 = vmul.f32 %v4716_v56, %v4716_v56 }
 0x813   :  { %v1558_v34 = vsel %vm51_vm0, %v1554_v63, 0.0  ;;  %v3395_v63 = vld [vmem:[%s5357_s5 + $0x8] sm:$0x3f] }
 0x814   :  { %v1539_v13 = vpop.xlane.xlu2 %1538  ;;  %1559 = vadd.xlane.f32.xlu2 %v1558_v34 }
 0x815   :  { %v1547_v46 = vmul.f32 %v1539_v13, %v4109_v14 }
 0x817   :  { %v4723_v2 = vsub.f32 %v4700_v49, %v1547_v46 }
 0x819   :  { %v1555_v27 = vmul.f32 %v4723_v2, %v4723_v2 }
 0x81b   :  { %v1561_v3 = vsel %vm51_vm0, %v1555_v27, 0.0  ;;  %v1622_v27 = vperm.slane %v3395_v63, 0 }
 0x81c   :  { %1562 = vadd.xlane.f32.xlu0 %v1561_v3 }
 0x849   :  { %v1542_v36 = vpop.xlane.xlu0 %1541 }
 0x84a   :  { %v1548_v6 = vmul.f32 %v1542_v36, %v4109_v14 }
 0x84c   :  { %v4730_v8 = vsub.f32 %v4705_v57, %v1548_v6 }
 0x84e   :  { %v1556_v11 = vmul.f32 %v4730_v8, %v4730_v8 }
 0x850   :  { %v1564_v4 = vsel %vm51_vm0, %v1556_v11, 0.0  ;;  %v1627_v11 = vperm.slane %v3395_v63, 1 }
 0x851   :  { %1565 = vadd.xlane.f32.xlu1 %v1564_v4  ;;  %v1545_v30 = vpop.xlane.xlu1 %1544 }
 0x852   :  { %v1549_v15 = vmul.f32 %v1545_v30, %v4109_v14 }
 0x854   :  { %v4737_v47 = vsub.f32 %v4710_v58, %v1549_v15 }
 0x856   :  { %v1557_v16 = vmul.f32 %v4737_v47, %v4737_v47 }
 0x858   :  { %v1567_v20 = vsel %vm51_vm0, %v1557_v16, 0.0 }
 0x859   :  { %1568 = vadd.xlane.f32.xlu2 %v1567_v20 }
 0x887   :  { %v1560_v23 = vpop.xlane.xlu2 %1559 }
 0x888   :  { %v1570_v18 = vmul.f32 %v1560_v23, %v4109_v14 }
 0x88a   :  { %v1574_v31 = vadd.f32 1e-05, %v1570_v18 }
 0x88c   :  { %3906 = vrsqrt.f32 %v1574_v31  ;;  %vm1584_vm7 = vweird.f32 %v1574_v31 }
 0x88f   :  { %v1563_v53 = vpop.xlane.xlu0 %1562 }
 0x890   :  { %v1571_v9 = vmul.f32 %v1563_v53, %v4109_v14 }
 0x892   :  { %v3907_v17 = vpop.eup %3906  ;;  %v1575_v45 = vadd.f32 1e-05, %v1571_v9 }
 0x893   :  { %v1579_v19 = vmul.f32 %v3907_v17, %v1574_v31  ;;  %vm1585_vm6 = vweird.f32 %v3907_v17 }
 0x894   :  { %3908 = vrsqrt.f32 %v1575_v45  ;;  %vm1586_vm8 = vmor %vm1584_vm7, %vm1585_vm6  ;;  %vm1594_vm10 = vweird.f32 %v1575_v45 }
 0x895   :  { %v1580_v5 = vmul.f32 %v3907_v17, %v1579_v19 }
 0x897   :  { %v1581_v12 = vmul.f32 0.5, %v1580_v5 }
 0x899   :  { %v1582_v33 = vsub.f32 1.5, %v1581_v12 }
 0x89a   :  { %v3909_v50 = vpop.eup %3908 }
 0x89b   :  { %v1583_v59 = vmul.f32 %v3907_v17, %v1582_v33  ;;  %v1589_v60 = vmul.f32 %v3909_v50, %v1575_v45  ;;  %vm1595_vm9 = vweird.f32 %v3909_v50 }
 0x89c   :  { %vm1596_vm11 = vmor %vm1594_vm10, %vm1595_vm9 }
 0x89d   :  { %v1590_v61 = vmul.f32 %v3909_v50, %v1589_v60  ;;  %v1587_v34 = vsel %vm1586_vm8, %v3907_v17, %v1583_v59 }
 0x89e   :  { %v1618_v3 = vmul.f32 %v1587_v34, %v4716_v56 }
 0x89f   :  { %v1591_v13 = vmul.f32 0.5, %v1590_v61 }
 0x8a0   :  { %v1623_v4 = vmul.f32 %v1622_v27, %v1618_v3 }
 0x8a1   :  { %v1592_v46 = vsub.f32 1.5, %v1591_v13 }
 0x8a2   :  { %v1628_v16 = vadd.f32 %v1627_v11, %v1623_v4 }
 0x8a3   :  { %v1593_v36 = vmul.f32 %v3909_v50, %v1592_v46 }
 0x8a5   :  { %v1597_v6 = vsel %vm1596_vm11, %v3909_v50, %v1593_v36 }
 0x8a6   :  { %v1619_v30 = vmul.f32 %v1597_v6, %v4723_v2 }
 0x8a8   :  { %v1624_v15 = vmul.f32 %v1622_v27, %v1619_v30 }
 0x8aa   :  { %v1629_v20 = vadd.f32 %v1627_v11, %v1624_v15 }
 0x8ac   :  { %v1641_v21 = vpack.c.bf16 %v1629_v20, %v1628_v16 }
 0x8ae   :  { %3436 = vmatmul.msk.bf16.vlgmr.msrb.gmra.mxu2 %vm51_vm0, %v1641_v21  ;;  %3438 = vmatmul.msk.bf16.vlgmr.msrb.gmra.mxu0 %vm51_vm0, %v1641_v21 }
 0x8c4   :  { %v1566_v54 = vpop.xlane.xlu1 %1565 }
 0x8c5   :  { %v1572_v0 = vmul.f32 %v1566_v54, %v4109_v14 }
 0x8c7   :  { %v1576_v56 = vadd.f32 1e-05, %v1572_v0 }
 0x8c9   :  { %3910 = vrsqrt.f32 %v1576_v56  ;;  %vm1604_vm13 = vweird.f32 %v1576_v56 }
 0x8cc   :  { %v1569_v7 = vpop.xlane.xlu2 %1568 }
 0x8cd   :  { %v1573_v1 = vmul.f32 %v1569_v7, %v4109_v14 }
 0x8cf   :  { %v3911_v62 = vpop.eup %3910  ;;  %v1577_v25 = vadd.f32 1e-05, %v1573_v1 }
 0x8d0   :  { %v1599_v26 = vmul.f32 %v3911_v62, %v1576_v56  ;;  %vm1605_vm12 = vweird.f32 %v3911_v62 }
 0x8d1   :  { %3912 = vrsqrt.f32 %v1577_v25  ;;  %vm1606_vm15 = vmor %vm1604_vm13, %vm1605_vm12  ;;  %vm1614_vm5 = vweird.f32 %v1577_v25 }
 0x8d2   :  { %v1600_v2 = vmul.f32 %v3911_v62, %v1599_v26 }
 0x8d4   :  { %v1601_v28 = vmul.f32 0.5, %v1600_v2 }
 0x8d6   :  { %v1602_v10 = vsub.f32 1.5, %v1601_v28 }
 0x8d7   :  { %v3913_v55 = vpop.eup %3912 }
 0x8d8   :  { %v1603_v32 = vmul.f32 %v3911_v62, %v1602_v10  ;;  %v1609_v35 = vmul.f32 %v3913_v55, %v1577_v25  ;;  %vm1615_vm1 = vweird.f32 %v3913_v55 }
 0x8d9   :  { %vm1616_vm6 = vmor %vm1614_vm5, %vm1615_vm1 }
 0x8da   :  { %v1610_v37 = vmul.f32 %v3913_v55, %v1609_v35  ;;  %v1607_v52 = vsel %vm1606_vm15, %v3911_v62, %v1603_v32 }
 0x8db   :  { %v1620_v23 = vmul.f32 %v1607_v52, %v4730_v8 }
 0x8dc   :  { %v1611_v38 = vmul.f32 0.5, %v1610_v37 }
 0x8dd   :  { %v1625_v22 = vmul.f32 %v1622_v27, %v1620_v23 }
 0x8de   :  { %v1612_v39 = vsub.f32 1.5, %v1611_v38 }
 0x8df   :  { %v1630_v31 = vadd.f32 %v1627_v11, %v1625_v22 }
 0x8e0   :  { %v1613_v41 = vmul.f32 %v3913_v55, %v1612_v39 }
 0x8e2   :  { %v1617_v18 = vsel %vm1616_vm6, %v3913_v55, %v1613_v41 }
 0x8e3   :  { %v1621_v43 = vmul.f32 %v1617_v18, %v4737_v47 }
 0x8e5   :  { %v1626_v24 = vmul.f32 %v1622_v27, %v1621_v43 }
 0x8e7   :  { %v1631_v48 = vadd.f32 %v1627_v11, %v1626_v24 }
 0x8e9   :  { %v1642_v51 = vpack.c.bf16 %v1631_v48, %v1630_v31 }
 0x8eb   :  { %3437 = vmatmul.msk.bf16.gmra.mxu2 %vm51_vm0, %v1642_v51  ;;  %3439 = vmatmul.msk.bf16.gmra.mxu0 %vm51_vm0, %v1642_v51 }
 0x92b   :  { %v1717_v40 = vpop.f32.mrf.mxu0 }
 0x931   :  { %v1698_v53 = vpop.f32.mrf.mxu2 }
 0x932   :  { %1825 = vrot.lane.b32.xlu0 %v1698_v53, %s4029_s17  ;;  %1731 = vrot.lane.b32.xlu2 %v1698_v53, %s4027_s15  ;;  %v1727_v8 = vmul.f32 0.25, %v1698_v53 }
 0x933   :  { %v1719_v9 = vpop.f32.mrf.mxu0 }
 0x934   :  { %1810 = vmatpush.msra.mxu3 %v1719_v9  ;;  %1821 = vrot.lane.b32.xlu1 %v1727_v8, %s4028_s16  ;;  %v3791_v47 = vpack.i.bf16 %v1717_v40, %v1719_v9 }
 0x936   :  { %1811 = vmatpush.msra.mxu3 %v1717_v40 }
 0x939   :  { %v1700_v17 = vpop.f32.mrf.mxu2 }
 0x93a   :  { %1733 = vrot.lane.b32.xlu0 %v1700_v17, %s4027_s15  ;;  %2039 = vrot.lane.b32.xlu2 %v1698_v53, %s4031_s19  ;;  %v1728_v45 = vmul.f32 0.25, %v1700_v17 }
 0x93c   :  { %1827 = vrot.lane.b32.xlu1 %v1700_v17, %s4029_s17 }
 0x942   :  { %1933 = vrot.lane.b32.xlu0 %v1698_v53, %s4030_s18  ;;  %1935 = vrot.lane.b32.xlu2 %v1700_v17, %s4030_s18 }
 0x944   :  { %1929 = vrot.lane.b32.xlu1 %v1727_v8, %s4032_s20 }
 0x94a   :  { %1823 = vrot.lane.b32.xlu0 %v1728_v45, %s4028_s16  ;;  %1931 = vrot.lane.b32.xlu2 %v1728_v45, %s4032_s20 }
 0x94c   :  { %2041 = vrot.lane.b32.xlu1 %v1700_v17, %s4031_s19 }
 0x952   :  { %2035 = vrot.lane.b32.xlu0 %v1727_v8, %s4033_s21 }
 0x954   :  { %2037 = vrot.lane.b32.xlu1 %v1728_v45, %s4033_s21 }
 0x968   :  { %v4889_v40 = vpop.f32.mrf.mxu0 }
 0x96e   :  { %v1703_v19 = vpop.f32.mrf.mxu2 }
 0x96f   :  { %2145 = vrot.lane.b32.xlu1 %v1703_v19, %s4027_s15  ;;  %v2141_v12 = vmul.f32 0.25, %v1703_v19 }
 0x970   :  { %v4896_v17 = vpop.f32.mrf.mxu0 }
 0x976   :  { %v1705_v5 = vpop.f32.mrf.mxu2 }
 0x977   :  { %2347 = vrot.lane.b32.xlu1 %v1703_v19, %s4030_s18  ;;  %2241 = vrot.lane.b32.xlu2 %v1705_v5, %s4029_s17  ;;  %v4823_v33 = vmul.f32 0.25, %v1705_v5 }
 0x978   :  { %2147 = vrot.lane.b32.xlu0 %v1705_v5, %s4027_s15 }
 0x97f   :  { %2235 = vrot.lane.b32.xlu2 %v2141_v12, %s4028_s16  ;;  %2237 = vrot.lane.b32.xlu1 %v4823_v33, %s4028_s16 }
 0x980   :  { %2239 = vrot.lane.b32.xlu0 %v1703_v19, %s4029_s17 }
 0x987   :  { %2455 = vrot.lane.b32.xlu2 %v1705_v5, %s4031_s19  ;;  %2449 = vrot.lane.b32.xlu1 %v2141_v12, %s4033_s21 }
 0x988   :  { %2349 = vrot.lane.b32.xlu0 %v1705_v5, %s4030_s18 }
 0x98c   :  { %v1732_v50 = vpop.permute.xlu2 %1731 }
 0x98f   :  { %2343 = vrot.lane.b32.xlu2 %v2141_v12, %s4032_s20 }
 0x990   :  { %2453 = vrot.lane.b32.xlu0 %v1703_v19, %s4031_s19 }
 0x994   :  { %v2040_v61 = vpop.permute.xlu2 %2039 }
 0x997   :  { %2451 = vrot.lane.b32.xlu2 %v4823_v33, %s4033_s21 }
 0x998   :  { %2345 = vrot.lane.b32.xlu0 %v4823_v33, %s4032_s20 }
 0x99c   :  { %v1936_v13 = vpop.permute.xlu2 %1935 }
 0x99f   :  { %3792 = vrot.lane.b32.xlu2 %v3791_v47, %s4028_s16 }
 0x9a0   :  { %3797 = vrot.lane.b32.xlu0 %v3791_v47, %s4032_s20 }
 0x9a4   :  { %v1826_v59 = vpop.permute.xlu0 %1825  ;;  %v1932_v11 = vpop.permute.xlu2 %1931 }
 0x9a6   :  { %v1822_v60 = vpop.permute.xlu1 %1821 }
 0x9a7   :  { %3802 = vrot.lane.b32.xlu2 %v3791_v47, %s4033_s21 }
 0x9ac   :  { %v1734_v63 = vpop.permute.xlu0 %1733 }
 0x9ad   :  { %3440 = vmatpush.xpose.msk.msrb.mxu1 %vm259_vm14, %v1734_v63 }
 0x9ae   :  { %v1828_v34 = vpop.permute.xlu1 %1827 }
 0x9af   :  { %3446 = vmatpush.xpose.msk.msra.mxu2 %vm259_vm14, %v1828_v34 }
 0x9b1   :  { %3441 = vmatpush.xpose.msk.msrb.mxu1 %vm259_vm14, %v1732_v50 }
 0x9b3   :  { %3447 = vmatpush.xpose.msk.msra.mxu2 %vm259_vm14, %v1826_v59 }
 0x9b4   :  { %v1934_v46 = vpop.permute.xlu0 %1933  ;;  %3442 = vmatmul.msk.f32.vlgmr.msrb.gmra.mxu1 %vm259_vm14, %v1727_v8 }
 0x9b5   :  { %3452 = vmatpush.xpose.msk.msra.mxu1 %vm259_vm14, %v1936_v13 }
 0x9b6   :  { %3448 = vmatmul.msk.f32.vlgmr.msra.gmra.mxu2 %vm259_vm14, %v1822_v60  ;;  %v1930_v27 = vpop.permute.xlu1 %1929 }
 0x9b9   :  { %3453 = vmatpush.xpose.msk.msra.mxu1 %vm259_vm14, %v1934_v46 }
 0x9bc   :  { %v1824_v3 = vpop.permute.xlu0 %1823  ;;  %3443 = vmatmul.msk.f32.gmra.mxu1 %vm259_vm14, %v1728_v45 }
 0x9be   :  { %3449 = vmatmul.msk.f32.gmra.mxu2 %vm259_vm14, %v1824_v3  ;;  %v2042_v36 = vpop.permute.xlu1 %2041 }
 0x9bf   :  { %3458 = vmatpush.xpose.msk.msrb.mxu2 %vm259_vm14, %v2042_v36 }
 0x9c3   :  { %3459 = vmatpush.xpose.msk.msrb.mxu2 %vm259_vm14, %v2040_v61 }
 0x9c4   :  { %v2036_v6 = vpop.permute.xlu0 %2035  ;;  %3454 = vmatmul.msk.f32.vlgmr.msra.gmra.mxu1 %vm259_vm14, %v1930_v27 }
 0x9c6   :  { %3460 = vmatmul.msk.f32.vlgmr.msrb.gmra.mxu2 %vm259_vm14, %v2036_v6  ;;  %v2038_v4 = vpop.permute.xlu1 %2037 }
 0x9cc   :  { %3455 = vmatmul.msk.f32.gmra.mxu1 %vm259_vm14, %v1932_v11 }
 0x9ce   :  { %3461 = vmatmul.msk.f32.gmra.mxu2 %vm259_vm14, %v2038_v4 }
 0x9d1   :  { %v2242_v30 = vpop.permute.xlu2 %2241 }
 0x9d2   :  { %3470 = vmatpush.xpose.msk.msra.mxu2 %vm259_vm14, %v2242_v30 }
 0x9d9   :  { %v2236_v15 = vpop.permute.xlu2 %2235 }
 0x9e1   :  { %v2456_v16 = vpop.permute.xlu2 %2455  ;;  %v2146_v20 = vpop.permute.xlu1 %2145 }
 0x9e9   :  { %v2344_v21 = vpop.permute.xlu2 %2343  ;;  %v2348_v0 = vpop.permute.xlu1 %2347 }
 0x9ea   :  { %v2148_v54 = vpop.permute.xlu0 %2147 }
 0x9eb   :  { %3464 = vmatpush.xpose.msk.msrb.mxu1 %vm259_vm14, %v2148_v54 }
 0x9ef   :  { %3465 = vmatpush.xpose.msk.msrb.mxu1 %vm259_vm14, %v2146_v20 }
 0x9f1   :  { %v2452_v56 = vpop.permute.xlu2 %2451  ;;  %v2238_v26 = vpop.permute.xlu1 %2237 }
 0x9f2   :  { %v2240_v7 = vpop.permute.xlu0 %2239  ;;  %3466 = vmatmul.msk.f32.vlgmr.msrb.gmra.mxu1 %vm259_vm14, %v2141_v12  ;;  %v4905_v12 = vpack.i.bf16 %v4889_v40, %v4896_v17 }
 0x9f3   :  { %3471 = vmatpush.xpose.msk.msra.mxu2 %vm259_vm14, %v2240_v7 }
 0x9f6   :  { %3472 = vmatmul.msk.f32.vlgmr.msra.gmra.mxu2 %vm259_vm14, %v2236_v15 }
 0x9f7   :  { %3482 = vmatpush.xpose.msk.msrb.mxu2 %vm259_vm14, %v2456_v16 }
 0x9f9   :  { %v3793_v1 = vpop.permute.xlu2 %3792  ;;  %v2450_v35 = vpop.permute.xlu1 %2449 }
 0x9fa   :  { %v2350_v62 = vpop.permute.xlu0 %2349  ;;  %v3794_v25 = vunpack.i.l.bf16 %v3793_v1  ;;  %3467 = vmatmul.msk.f32.gmra.mxu1 %vm259_vm14, %v4823_v33  ;;  %v3795_v2 = vunpack.i.h.bf16 %v3793_v1 }
 0x9fb   :  { %3476 = vmatpush.xpose.msk.msra.mxu1 %vm259_vm14, %v2350_v62 }
 0x9fc   :  { %1910 = vmatpush.msra.mxu0 %v3794_v25 }
 0x9fe   :  { %3473 = vmatmul.msk.f32.gmra.mxu2 %vm259_vm14, %v2238_v26  ;;  %1911 = vmatpush.msra.mxu0 %v3795_v2 }
 0x9ff   :  { %3477 = vmatpush.xpose.msk.msra.mxu1 %vm259_vm14, %v2348_v0 }
 0xa01   :  { %v3803_v28 = vpop.permute.xlu2 %3802 }
 0xa02   :  { %v2454_v10 = vpop.permute.xlu0 %2453  ;;  %v3804_v55 = vunpack.i.l.bf16 %v3803_v28  ;;  %3478 = vmatmul.msk.f32.vlgmr.msra.gmra.mxu1 %vm259_vm14, %v2344_v21  ;;  %v3805_v32 = vunpack.i.h.bf16 %v3803_v28 }
 0xa03   :  { %3483 = vmatpush.xpose.msk.msrb.mxu2 %vm259_vm14, %v2454_v10 }
 0xa04   :  { %2122 = vmatpush.msrb.mxu0 %v3804_v55 }
 0xa06   :  { %3484 = vmatmul.msk.f32.vlgmr.msrb.gmra.mxu2 %vm259_vm14, %v2450_v35  ;;  %2123 = vmatpush.msrb.mxu0 %v3805_v32 }
 0xa0a   :  { %v2346_v37 = vpop.permute.xlu0 %2345 }
 0xa0b   :  { %3479 = vmatmul.msk.f32.gmra.mxu1 %vm259_vm14, %v2346_v37 }
 0xa0e   :  { %3485 = vmatmul.msk.f32.gmra.mxu2 %vm259_vm14, %v2452_v56 }
 0xa12   :  { %v3798_v52 = vpop.permute.xlu0 %3797 }
 0xa13   :  { %v3799_v38 = vunpack.i.l.bf16 %v3798_v52  ;;  %v3800_v39 = vunpack.i.h.bf16 %v3798_v52 }
 0xa15   :  { %2016 = vmatpush.msrb.mxu3 %v3799_v38 }
 0xa17   :  { %2017 = vmatpush.msrb.mxu3 %v3800_v39 }
 0xa31   :  { %v1762_v23 = vpop.f32.mrf.mxu1 }
 0xa32   :  { %v4875_v41 = vadd.f32 %v1762_v23, %v4273_v42 }
 0xa34   :  { %v1768_v18 = vsel %vm259_vm14, %v4875_v41, -inf }
 0xa35   :  { %1769 = vmax.xlane.f32.xlu1 %v1768_v18 }
 0xa39   :  { %v1765_v43 = vpop.f32.mrf.mxu1  ;;  %v1854_v22 = vpop.f32.mrf.mxu2 }
 0xa3a   :  { %v4880_v24 = vadd.f32 %v1765_v43, %v4280_v29  ;;  %v4883_v31 = vadd.f32 %v1854_v22, %v4273_v42 }
 0xa3c   :  { %v1771_v48 = vsel %vm259_vm14, %v4880_v24, -inf  ;;  %v1860_v51 = vsel %vm259_vm14, %v4883_v31, -inf }
 0xa3d   :  { %1772 = vmax.xlane.f32.xlu2 %v1771_v48  ;;  %1861 = vmax.xlane.f32.xlu0 %v1860_v51 }
 0xa41   :  { %v1857_v53 = vpop.f32.mrf.mxu2  ;;  %v1962_v8 = vpop.f32.mrf.mxu1 }
 0xa42   :  { %v4892_v9 = vadd.f32 %v1962_v8, %v4273_v42  ;;  %v4920_v13 = vadd.f32 %v1857_v53, %v4280_v29 }
 0xa44   :  { %v1968_v47 = vsel %vm259_vm14, %v4892_v9, -inf  ;;  %v1863_v27 = vsel %vm259_vm14, %v4920_v13, -inf }
 0xa45   :  { %1969 = vmax.xlane.f32.xlu2 %v1968_v47 }
 0xa49   :  { %v2068_v45 = vpop.f32.mrf.mxu2  ;;  %v1965_v60 = vpop.f32.mrf.mxu1 }
 0xa4a   :  { %v4899_v19 = vadd.f32 %v2068_v45, %v4273_v42  ;;  %v4930_v11 = vadd.f32 %v1965_v60, %v4280_v29 }
 0xa4c   :  { %v2074_v5 = vsel %vm259_vm14, %v4899_v19, -inf  ;;  %v1971_v4 = vsel %vm259_vm14, %v4930_v11, -inf }
 0xa4d   :  { %2075 = vmax.xlane.f32.xlu0 %v2074_v5 }
 0xa4e   :  { %3807 = vrot.lane.b32.xlu1 %v4905_v12, %s4028_s16 }
 0xa51   :  { %v2071_v33 = vpop.f32.mrf.mxu2 }
 0xa52   :  { %v4910_v50 = vadd.f32 %v2071_v33, %v4280_v29 }
 0xa54   :  { %v2077_v59 = vsel %vm259_vm14, %v4910_v50, -inf }
 0xa55   :  { %2078 = vmax.xlane.f32.xlu2 %v2077_v59 }
 0xa6f   :  { %v2176_v61 = vpop.f32.mrf.mxu1 }
 0xa70   :  { %v4915_v63 = vadd.f32 %v2176_v61, %v4273_v42 }
 0xa72   :  { %v2182_v34 = vsel %vm259_vm14, %v4915_v63, -inf }
 0xa73   :  { %2183 = vmax.xlane.f32.xlu0 %v2182_v34 }
 0xa77   :  { %v2179_v46 = vpop.f32.mrf.mxu1 }
 0xa78   :  { %v4925_v3 = vadd.f32 %v2179_v46, %v4280_v29  ;;  %1864 = vmax.xlane.f32.xlu1 %v1863_v27 }
 0xa79   :  { %v2268_v36 = vpop.f32.mrf.mxu2 }
 0xa7a   :  { %v2185_v6 = vsel %vm259_vm14, %v4925_v3, -inf  ;;  %v4938_v16 = vadd.f32 %v2268_v36, %v4273_v42 }
 0xa7b   :  { %2186 = vmax.xlane.f32.xlu2 %v2185_v6 }
 0xa7c   :  { %v2274_v54 = vsel %vm259_vm14, %v4938_v16, -inf }
 0xa7f   :  { %v2376_v21 = vpop.f32.mrf.mxu1 }
 0xa80   :  { %1972 = vmax.xlane.f32.xlu1 %v1971_v4  ;;  %v4948_v7 = vadd.f32 %v2376_v21, %v4273_v42 }
 0xa81   :  { %v2271_v30 = vpop.f32.mrf.mxu2 }
 0xa82   :  { %v4935_v15 = vadd.f32 %v2271_v30, %v4280_v29  ;;  %v2382_v62 = vsel %vm259_vm14, %v4948_v7, -inf }
 0xa84   :  { %v2277_v20 = vsel %vm259_vm14, %v4935_v15, -inf }
 0xa85   :  { %2278 = vmax.xlane.f32.xlu0 %v2277_v20 }
 0xa88   :  { %2275 = vmax.xlane.f32.xlu1 %v2274_v54  ;;  %v2379_v25 = vpop.f32.mrf.mxu1 }
 0xa89   :  { %v2482_v0 = vpop.f32.mrf.mxu2  ;;  %v4955_v26 = vadd.f32 %v2379_v25, %v4280_v29 }
 0xa8a   :  { %v4945_v56 = vadd.f32 %v2482_v0, %v4273_v42 }
 0xa8b   :  { %v2385_v2 = vsel %vm259_vm14, %v4955_v26, -inf }
 0xa8c   :  { %v2488_v1 = vsel %vm259_vm14, %v4945_v56, -inf }
 0xa8d   :  { %2489 = vmax.xlane.f32.xlu0 %v2488_v1 }
 0xa90   :  { %2383 = vmax.xlane.f32.xlu1 %v2382_v62 }
 0xa91   :  { %v2485_v28 = vpop.f32.mrf.mxu2 }
 0xa92   :  { %v4960_v42 = vadd.f32 %v2485_v28, %v4280_v29 }
 0xa94   :  { %v2491_v10 = vsel %vm259_vm14, %v4960_v42, -inf }
 0xa98   :  { %2386 = vmax.xlane.f32.xlu1 %v2385_v2 }
 0xaa0   :  { %2492 = vmax.xlane.f32.xlu1 %v2491_v10 }
 0xaa8   :  { %v1770_v55 = vpop.xlane.xlu1 %1769 }
 0xaa9   :  { %v1774_v32 = vsub.f32 %v4875_v41, %v1770_v55 }
 0xaab   :  { %v1776_v35 = vmul.f32 1.442695, %v1774_v32 }
 0xaad   :  { %3914 = vpow2.f32 %v1776_v35 }
 0xab0   :  { %v1773_v37 = vpop.xlane.xlu2 %1772  ;;  %v1862_v52 = vpop.xlane.xlu0 %1861 }
 0xab1   :  { %v1775_v38 = vsub.f32 %v4880_v24, %v1773_v37  ;;  %v1866_v39 = vsub.f32 %v4883_v31, %v1862_v52 }
 0xab3   :  { %v4967_v23 = vpop.eup %3914  ;;  %v1778_v18 = vmul.f32 1.442695, %v1775_v38  ;;  %v1868_v29 = vmul.f32 1.442695, %v1866_v39 }
 0xab4   :  { %v1780_v43 = vsel %vm259_vm14, %v4967_v23, 0.0 }
 0xab5   :  { %3916 = vpow2.f32 %v1778_v18  ;;  %1781 = vadd.xlane.f32.xlu2 %v1780_v43 }
 0xab6   :  { %3918 = vpow2.f32 %v1868_v29 }
 0xab8   :  { %v1970_v22 = vpop.xlane.xlu2 %1969 }
 0xab9   :  { %v1974_v41 = vsub.f32 %v4892_v9, %v1970_v22 }
 0xabb   :  { %v4972_v48 = vpop.eup %3916  ;;  %v1976_v51 = vmul.f32 1.442695, %v1974_v41 }
 0xabc   :  { %v4974_v53 = vpop.eup %3918  ;;  %v1783_v24 = vsel %vm259_vm14, %v4972_v48, 0.0 }
 0xabd   :  { %3920 = vpow2.f32 %v1976_v51  ;;  %1784 = vadd.xlane.f32.xlu0 %v1783_v24  ;;  %v1872_v31 = vsel %vm259_vm14, %v4974_v53, 0.0 }
 0xabe   :  { %1873 = vadd.xlane.f32.xlu2 %v1872_v31 }
 0xac0   :  { %v2076_v8 = vpop.xlane.xlu0 %2075  ;;  %v4989_v60 = vpop.permute.xlu1 %3807 }
 0xac1   :  { %v2080_v47 = vsub.f32 %v4899_v19, %v2076_v8 }
 0xac3   :  { %v4981_v45 = vpop.eup %3920  ;;  %v2082_v9 = vmul.f32 1.442695, %v2080_v47 }
 0xac4   :  { %v1980_v5 = vsel %vm259_vm14, %v4981_v45, 0.0 }
 0xac5   :  { %3922 = vpow2.f32 %v2082_v9  ;;  %1981 = vadd.xlane.f32.xlu1 %v1980_v5 }
 0xac8   :  { %v2079_v61 = vpop.xlane.xlu2 %2078 }
 0xac9   :  { %v2081_v46 = vsub.f32 %v4910_v50, %v2079_v61 }
 0xacb   :  { %v4985_v33 = vpop.eup %3922  ;;  %v2084_v6 = vmul.f32 1.442695, %v2081_v46 }
 0xacc   :  { %v2086_v59 = vsel %vm259_vm14, %v4985_v33, 0.0 }
 0xacd   :  { %2087 = vadd.xlane.f32.xlu1 %v2086_v59 }
 0xae6   :  { %v2184_v36 = vpop.xlane.xlu0 %2183 }
 0xae7   :  { %v2188_v20 = vsub.f32 %v4915_v63, %v2184_v36 }
 0xae9   :  { %v2190_v50 = vmul.f32 1.442695, %v2188_v20 }
 0xaeb   :  { %v1865_v34 = vpop.xlane.xlu1 %1864 }
 0xaec   :  { %v1867_v19 = vsub.f32 %v4920_v13, %v1865_v34 }
 0xaee   :  { %v1870_v27 = vmul.f32 1.442695, %v1867_v19  ;;  %v2187_v62 = vpop.xlane.xlu2 %2186 }
 0xaf0   :  { %3924 = vpow2.f32 %v1870_v27 }
 0xaf1   :  { %3926 = vpow2.f32 %v2084_v6 }
 0xaf3   :  { %v1973_v4 = vpop.xlane.xlu1 %1972 }
 0xaf4   :  { %v1975_v30 = vsub.f32 %v4930_v11, %v1973_v4  ;;  %v2189_v11 = vsub.f32 %v4925_v3, %v2187_v62 }
 0xaf6   :  { %v4995_v21 = vpop.eup %3924  ;;  %v1978_v54 = vmul.f32 1.442695, %v1975_v30  ;;  %v2192_v37 = vmul.f32 1.442695, %v2189_v11 }
 0xaf7   :  { %v1875_v0 = vsel %vm259_vm14, %v4995_v21, 0.0  ;;  %v5000_v28 = vpop.eup %3926 }
 0xaf8   :  { %3928 = vpow2.f32 %v1978_v54  ;;  %v2279_v13 = vpop.xlane.xlu0 %2278  ;;  %1876 = vadd.xlane.f32.xlu0 %v1875_v0  ;;  %v2089_v32 = vsel %vm259_vm14, %v5000_v28, 0.0 }
 0xaf9   :  { %v2281_v1 = vsub.f32 %v4935_v15, %v2279_v13  ;;  %3930 = vpow2.f32 %v2190_v50 }
 0xafb   :  { %v2284_v25 = vmul.f32 1.442695, %v2281_v1  ;;  %v2276_v2 = vpop.xlane.xlu1 %2275 }
 0xafc   :  { %v2280_v63 = vsub.f32 %v4938_v16, %v2276_v2 }
 0xafd   :  { %3932 = vpow2.f32 %v2284_v25 }
 0xafe   :  { %v5004_v10 = vpop.eup %3928  ;;  %v2282_v55 = vmul.f32 1.442695, %v2280_v63 }
 0xaff   :  { %v1983_v15 = vsel %vm259_vm14, %v5004_v10, 0.0  ;;  %v5011_v52 = vpop.eup %3930 }
 0xb00   :  { %3934 = vpow2.f32 %v2282_v55  ;;  %v2490_v35 = vpop.xlane.xlu0 %2489  ;;  %2090 = vadd.xlane.f32.xlu0 %v2089_v32  ;;  %1984 = vadd.xlane.f32.xlu1 %v1983_v15  ;;  %v2194_v22 = vsel %vm259_vm14, %v5011_v52, 0.0 }
 0xb01   :  { %v2494_v16 = vsub.f32 %v4945_v56, %v2490_v35  ;;  %3936 = vpow2.f32 %v2192_v37 }
 0xb03   :  { %v2496_v3 = vmul.f32 1.442695, %v2494_v16  ;;  %v2384_v38 = vpop.xlane.xlu1 %2383  ;;  %v5013_v39 = vpop.eup %3932 }
 0xb04   :  { %v2388_v29 = vsub.f32 %v4948_v7, %v2384_v38  ;;  %v2289_v43 = vsel %vm259_vm14, %v5013_v39, 0.0 }
 0xb05   :  { %3938 = vpow2.f32 %v2496_v3 }
 0xb06   :  { %v5015_v18 = vpop.eup %3934  ;;  %v2390_v41 = vmul.f32 1.442695, %v2388_v29 }
 0xb07   :  { %v2286_v56 = vsel %vm259_vm14, %v5015_v18, 0.0  ;;  %v5024_v51 = vpop.eup %3936 }
 0xb08   :  { %2290 = vadd.xlane.f32.xlu0 %v2289_v43  ;;  %2195 = vadd.xlane.f32.xlu1 %v2194_v22  ;;  %3940 = vpow2.f32 %v2390_v41  ;;  %v2197_v9 = vsel %vm259_vm14, %v5024_v51, 0.0 }
 0xb09   :  { %2287 = vadd.xlane.f32.xlu2 %v2286_v56 }
 0xb0b   :  { %v2387_v24 = vpop.xlane.xlu1 %2386  ;;  %v5026_v31 = vpop.eup %3938 }
 0xb0c   :  { %v2389_v7 = vsub.f32 %v4955_v26, %v2387_v24  ;;  %v2500_v47 = vsel %vm259_vm14, %v5026_v31, 0.0 }
 0xb0e   :  { %v2392_v8 = vmul.f32 1.442695, %v2389_v7  ;;  %v5033_v5 = vpop.eup %3940 }
 0xb0f   :  { %v2394_v61 = vsel %vm259_vm14, %v5033_v5, 0.0 }
 0xb10   :  { %3942 = vpow2.f32 %v2392_v8  ;;  %2501 = vadd.xlane.f32.xlu0 %v2500_v47  ;;  %2198 = vadd.xlane.f32.xlu1 %v2197_v9 }
 0xb13   :  { %v2493_v46 = vpop.xlane.xlu1 %2492 }
 0xb14   :  { %v2495_v20 = vsub.f32 %v4960_v42, %v2493_v46 }
 0xb16   :  { %v5035_v59 = vpop.eup %3942  ;;  %v2498_v13 = vmul.f32 1.442695, %v2495_v20 }
 0xb17   :  { %v2397_v26 = vsel %vm259_vm14, %v5035_v59, 0.0 }
 0xb18   :  { %2395 = vadd.xlane.f32.xlu1 %v2394_v61  ;;  %2398 = vadd.xlane.f32.xlu0 %v2397_v26 }
 0xb21   :  { %3812 = vrot.lane.b32.xlu2 %v4905_v12, %s4032_s20 }
 0xb28   :  { %v1782_v34 = vpop.xlane.xlu2 %1781 }
 0xb29   :  { %3944 = vrcp.f32 %v1782_v34 }
 0xb2c   :  { %3817 = vrot.lane.b32.xlu0 %v4905_v12, %s4033_s21 }
 0xb2f   :  { %v3945_v19 = vpop.eup %3944 }
 0xb30   :  { %v1788_v27 = vmul.f32 %v3945_v19, %v4967_v23  ;;  %v1785_v36 = vpop.xlane.xlu0 %1784  ;;  %v3809_v23 = vunpack.i.l.bf16 %v4989_v60 }
 0xb31   :  { %3946 = vrcp.f32 %v1785_v36  ;;  %v1874_v6 = vpop.xlane.xlu2 %1873 }
 0xb32   :  { %3948 = vrcp.f32 %v1874_v6  ;;  %3444 = vmatmul.msk.f32.vlgmr.msra.gmra.mxu3 %vm259_vm14, %v1788_v27 }
 0xb33   :  { %2224 = vmatpush.msra.mxu3 %v4896_v17  ;;  %v3810_v17 = vunpack.i.h.bf16 %v4989_v60 }
 0xb35   :  { %2225 = vmatpush.msra.mxu3 %v4889_v40 }
 0xb37   :  { %v3947_v4 = vpop.eup %3946 }
 0xb38   :  { %v3949_v30 = vpop.eup %3948  ;;  %v1982_v54 = vpop.xlane.xlu1 %1981  ;;  %v1789_v12 = vmul.f32 %v3947_v4, %v4972_v48 }
 0xb39   :  { %v1880_v0 = vmul.f32 %v3949_v30, %v4974_v53  ;;  %3950 = vrcp.f32 %v1982_v54 }
 0xb3a   :  { %3445 = vmatmul.msk.f32.gmra.mxu3 %vm259_vm14, %v1789_v12  ;;  %3952 = vpow2.f32 %v2498_v13 }
 0xb3b   :  { %3450 = vmatmul.msk.f32.vlgmr.msra.gmra.mxu0 %vm259_vm14, %v1880_v0 }
 0xb3c   :  { %2324 = vmatpush.msra.mxu0 %v3809_v23 }
 0xb3e   :  { %2325 = vmatpush.msra.mxu0 %v3810_v17 }
 0xb3f   :  { %v3951_v40 = vpop.eup %3950 }
 0xb40   :  { %v1988_v42 = vmul.f32 %v3951_v40, %v4981_v45  ;;  %v5058_v48 = vpop.eup %3952  ;;  %v2088_v50 = vpop.xlane.xlu1 %2087 }
 0xb41   :  { %v2503_v53 = vsel %vm259_vm14, %v5058_v48, 0.0 }
 0xb42   :  { %3456 = vmatmul.msk.f32.vlgmr.msrb.gmra.mxu3 %vm259_vm14, %v1988_v42 }
 0xb4a   :  { %2504 = vadd.xlane.f32.xlu2 %v2503_v53 }
 0xb6b   :  { %v1877_v1 = vpop.xlane.xlu0 %1876 }
 0xb6c   :  { %3954 = vrcp.f32 %v1877_v1  ;;  %v3719_v1 = vld [vmem:[%s5354_s2 + $0x30] sm:$0xff] }
 0xb6d   :  { %3956 = vrcp.f32 %v2088_v50  ;;  %v3720_v50 = vld [vmem:[%s5354_s2 + $0x38] sm:$0xff] }
 0xb6e   :  { %2605 = vmatpush.bf16.msrb.mxu1 %v3720_v50  ;;  %v3551_v50 = vld [vmem:[%s5355_s3 + $0x78] sm:$0xf0] }
 0xb72   :  { %v3955_v62 = vpop.eup %3954  ;;  %2606 = vmatpush.bf16.msrb.mxu1 %v3719_v1 }
 0xb73   :  { %v2091_v60 = vpop.xlane.xlu0 %2090  ;;  %v1985_v25 = vpop.xlane.xlu1 %1984  ;;  %v1881_v2 = vmul.f32 %v3955_v62, %v4995_v21  ;;  %v3718_v62 = vld [vmem:[%s5354_s2 + $0x28] sm:$0xff] }
 0xb74   :  { %3958 = vrcp.f32 %v1985_v25  ;;  %v3957_v45 = vpop.eup %3956 }
 0xb75   :  { %3451 = vmatmul.msk.f32.gmra.mxu0 %vm259_vm14, %v1881_v2  ;;  %3960 = vrcp.f32 %v2091_v60  ;;  %v2094_v11 = vmul.f32 %v3957_v45, %v4985_v33  ;;  %v3717_v60 = vld [vmem:[%s5354_s2 + $0x20] sm:$0xff] }
 0xb76   :  { %2607 = vmatpush.bf16.msrb.mxu1 %v3718_v62  ;;  %v3541_v62 = vld [vmem:[%s5355_s3 + $0x60] sm:$0xf] }
 0xb7a   :  { %v3959_v63 = vpop.eup %3958  ;;  %2608 = vmatpush.bf16.msrb.mxu1 %v3717_v60  ;;  %v3726_v60 = vld [vmem:[%s5355_s3 + $0x64] sm:$0xf0] }
 0xb7b   :  { %v2196_v55 = vpop.xlane.xlu1 %2195  ;;  %v1989_v15 = vmul.f32 %v3959_v63, %v5004_v10  ;;  %v2291_v35 = vpop.xlane.xlu0 %2290 }
 0xb7c   :  { %v2288_v32 = vpop.xlane.xlu2 %2287  ;;  %3962 = vrcp.f32 %v2196_v55  ;;  %v3961_v37 = vpop.eup %3960 }
 0xb7d   :  { %3462 = vmatmul.msk.f32.vlgmr.msrb.gmra.mxu0 %vm259_vm14, %v2094_v11  ;;  %3457 = vmatmul.msk.f32.gmra.mxu3 %vm259_vm14, %v1989_v15  ;;  %3964 = vrcp.f32 %v2288_v32  ;;  %v2095_v16 = vmul.f32 %v3961_v37, %v5000_v28 }
 0xb82   :  { %v3963_v3 = vpop.eup %3962 }
 0xb83   :  { %v2199_v21 = vpop.xlane.xlu1 %2198  ;;  %v2202_v29 = vmul.f32 %v3963_v3, %v5011_v52  ;;  %v2502_v10 = vpop.xlane.xlu0 %2501 }
 0xb84   :  { %v3813_v38 = vpop.permute.xlu2 %3812  ;;  %3966 = vrcp.f32 %v2199_v21  ;;  %v3965_v43 = vpop.eup %3964 }
 0xb85   :  { %v3814_v33 = vunpack.i.l.bf16 %v3813_v38  ;;  %3463 = vmatmul.msk.f32.gmra.mxu0 %vm259_vm14, %v2095_v16  ;;  %3468 = vmatmul.msk.f32.vlgmr.msra.gmra.mxu3 %vm259_vm14, %v2202_v29  ;;  %v3815_v22 = vunpack.i.h.bf16 %v3813_v38  ;;  %3968 = vrcp.f32 %v2291_v35  ;;  %v2294_v41 = vmul.f32 %v3965_v43, %v5015_v18  ;;  %v5131_v43 = vld [vmem:[%s5357_s5 + $0x8] sm:$0x3f] }
 0xb87   :  { %2430 = vmatpush.msrb.mxu3 %v3814_v33 }
 0xb89   :  { %2431 = vmatpush.msrb.mxu3 %v3815_v22  ;;  %v2570_v22 = vperm.slane %v5131_v43, 4 }
 0xb8a   :  { %v3967_v56 = vpop.eup %3966 }
 0xb8b   :  { %v2396_v28 = vpop.xlane.xlu1 %2395  ;;  %v2203_v24 = vmul.f32 %v3967_v56, %v5024_v51  ;;  %v3969_v52 = vpop.eup %3968 }
 0xb8c   :  { %3970 = vrcp.f32 %v2396_v28  ;;  %v2399_v7 = vpop.xlane.xlu0 %2398  ;;  %v2295_v47 = vmul.f32 %v3969_v52, %v5013_v39 }
 0xb8d   :  { %3474 = vmatmul.msk.f32.vlgmr.msra.gmra.mxu0 %vm259_vm14, %v2294_v41  ;;  %3469 = vmatmul.msk.f32.gmra.mxu3 %vm259_vm14, %v2203_v24  ;;  %3972 = vrcp.f32 %v2399_v7 }
 0xb8e   :  { %3974 = vrcp.f32 %v2502_v10 }
 0xb92   :  { %v3971_v8 = vpop.eup %3970 }
 0xb93   :  { %v2402_v9 = vmul.f32 %v3971_v8, %v5033_v5  ;;  %v3973_v18 = vpop.eup %3972 }
 0xb94   :  { %v2403_v51 = vmul.f32 %v3973_v18, %v5035_v59  ;;  %v3975_v26 = vpop.eup %3974 }
 0xb95   :  { %3475 = vmatmul.msk.f32.gmra.mxu0 %vm259_vm14, %v2295_v47  ;;  %3480 = vmatmul.msk.f32.vlgmr.msrb.gmra.mxu3 %vm259_vm14, %v2402_v9  ;;  %v2508_v39 = vmul.f32 %v3975_v26, %v5026_v31 }
 0xb9d   :  { %3481 = vmatmul.msk.f32.gmra.mxu3 %vm259_vm14, %v2403_v51 }
 0xb9e   :  { %v3818_v61 = vpop.permute.xlu0 %3817 }
 0xb9f   :  { %v3819_v34 = vunpack.i.l.bf16 %v3818_v61  ;;  %v3820_v19 = vunpack.i.h.bf16 %v3818_v61 }
 0xba1   :  { %2536 = vmatpush.msrb.mxu0 %v3819_v34 }
 0xba3   :  { %2537 = vmatpush.msrb.mxu0 %v3820_v19 }
 0xba4   :  { %3486 = vmatmul.msk.f32.vlgmr.msrb.gmra.mxu0 %vm259_vm14, %v2508_v39 }
 0xbb5   :  { %v1813_v5 = vpop.f32.mrf.mxu3 }
 0xbb6   :  { %1819 = vst.msk [vmem:[#allocation2] sm:$0xff] %vm259_vm14, %v1813_v5 }
 0xbb8   :  { %v1913_v46 = vpop.f32.mrf.mxu0 }
 0xbb9   :  { %1921 = vrot.lane.b32.xlu1 %v1913_v46, %s4031_s19 }
 0xbbd   :  { %v2505_v27 = vpop.xlane.xlu2 %2504  ;;  %v1816_v59 = vpop.f32.mrf.mxu3 }
 0xbbe   :  { %3976 = vrcp.f32 %v2505_v27  ;;  %1820 = vst.msk [vmem:[#allocation2 + $0x8] sm:$0xff] %vm259_vm14, %v1816_v59 }
 0xbc4   :  { %v3977_v36 = vpop.eup %3976 }
 0xbc5   :  { %v2509_v6 = vmul.f32 %v3977_v36, %v5058_v48  ;;  %v2019_v4 = vpop.f32.mrf.mxu3 }
 0xbc7   :  { %3487 = vmatmul.msk.f32.gmra.mxu0 %vm259_vm14, %v2509_v6 }
 0xbf2   :  { %v1916_v31 = vpop.f32.mrf.mxu0 }
 0xbf3   :  { %1923 = vrot.lane.b32.xlu0 %v1916_v31, %s4031_s19 }
 0xbfa   :  { %v2125_v30 = vpop.f32.mrf.mxu0 }
 0xbfb   :  { %2027 = vrot.lane.b32.xlu0 %v2019_v4, %s4030_s18  ;;  %2133 = vrot.lane.b32.xlu2 %v2125_v30, %s4029_s17 }
 0xc00   :  { %v2022_v20 = vpop.f32.mrf.mxu3 }
 0xc02   :  { %v2128_v54 = vpop.f32.mrf.mxu0 }
 0xc03   :  { %2029 = vrot.lane.b32.xlu0 %v2022_v20, %s4030_s18 }
 0xc08   :  { %v2227_v12 = vpop.f32.mrf.mxu3 }
 0xc09   :  { %2233 = vst.msk [vmem:[#allocation2 + $0x10] sm:$0xff] %vm259_vm14, %v2227_v12 }
 0xc0a   :  { %v2327_v0 = vpop.f32.mrf.mxu0 }
 0xc0b   :  { %2135 = vrot.lane.b32.xlu0 %v2128_v54, %s4029_s17  ;;  %2335 = vrot.lane.b32.xlu1 %v2327_v0, %s4031_s19 }
 0xc10   :  { %v2230_v23 = vpop.f32.mrf.mxu3 }
 0xc11   :  { %2234 = vst.msk [vmem:[#allocation2 + $0x18] sm:$0xff] %vm259_vm14, %v2230_v23 }
 0xc12   :  { %v2330_v17 = vpop.f32.mrf.mxu0 }
 0xc13   :  { %2337 = vrot.lane.b32.xlu0 %v2330_v17, %s4031_s19 }
 0xc18   :  { %v2433_v13 = vpop.f32.mrf.mxu3 }
 0xc19   :  { %2441 = vrot.lane.b32.xlu1 %v2433_v13, %s4030_s18 }
 0xc20   :  { %v2436_v42 = vpop.f32.mrf.mxu3 }
 0xc21   :  { %v2539_v40 = vpop.f32.mrf.mxu0  ;;  %2443 = vrot.lane.b32.xlu0 %v2436_v42, %s4030_s18  ;;  %v3728_v42 = vld [vmem:[%s5355_s3 + $0x74] sm:$0xf0] }
 0xc22   :  { %2547 = vrot.lane.b32.xlu1 %v2539_v40, %s4029_s17  ;;  %v3549_v40 = vld [vmem:[%s5355_s3 + $0x70] sm:$0xf] }
 0xc2b   :  { %v1922_v48 = vpop.permute.xlu1 %1921 }
 0xc2c   :  { %1927 = vst.msk [vmem:[#allocation2] sm:$0xff] %vm452_vm2, %v1922_v48  ;;  %v3727_v48 = vld [vmem:[%s5355_s3 + $0x74] sm:$0xf] }
 0xc2d   :  { %v3554_v1 = vor.u32 %v3727_v48, %v3551_v50  ;;  %v3735_v50 = vld [vmem:[%s5356_s4 + $0xb0] sm:$0xff] }
 0xc2f   :  { %2809 = vmatpush.bf16.msra.mxu2 %v3554_v1  ;;  %v3743_v1 = vld [vmem:[%s5356_s4 + $0xf0] sm:$0xff] }
 0xc44   :  { %v2542_v53 = vpop.f32.mrf.mxu0 }
 0xc45   :  { %2549 = vrot.lane.b32.xlu2 %v2542_v53, %s4029_s17  ;;  %v3550_v53 = vor.u32 %v3728_v42, %v3549_v40 }
 0xc47   :  { %2790 = vmatpush.bf16.msra.mxu3 %v3550_v53 }
 0xc55   :  { %v2134_v45 = vpop.permute.xlu2 %2133 }
 0xc65   :  { %v1924_v25 = vpop.permute.xlu0 %1923 }
 0xc66   :  { %1928 = vst.msk [vmem:[#allocation2 + $0x8] sm:$0xff] %vm452_vm2, %v1924_v25  ;;  %v3725_v25 = vld [vmem:[%s5355_s3 + $0x64] sm:$0xf] }
 0xc6d   :  { %v2028_v2 = vpop.permute.xlu0 %2027 }
 0xc6e   :  { %2033 = vst.msk [vmem:[#allocation2] sm:$0xff] %vm559_vm3, %v2028_v2  ;;  %v3542_v2 = vor.u32 %v3726_v60, %v3541_v62 }
 0xc6f   :  { %2139 = vst.msk [vmem:[#allocation2] sm:$0xff] %vm666_vm4, %v2134_v45  ;;  %v3543_v45 = vld [vmem:[%s5355_s3 + $0x68] sm:$0xf0] }
 0xc70   :  { %2791 = vmatpush.bf16.msra.mxu3 %v3542_v2  ;;  %v3734_v2 = vld [vmem:[%s5356_s4 + $0xa8] sm:$0xff] }
 0xc75   :  { %v2030_v63 = vpop.permute.xlu0 %2029 }
 0xc76   :  { %2034 = vst.msk [vmem:[#allocation2 + $0x8] sm:$0xff] %vm559_vm3, %v2030_v63  ;;  %v2555_v15 = vld [vmem:[#allocation2] sm:$0xff]  ;;  %v3546_v63 = vor.u32 %v3725_v25, %v3543_v45  ;;  %v3742_v45 = vld [vmem:[%s5356_s4 + $0xe8] sm:$0xff] }
 0xc78   :  { %2810 = vmatpush.bf16.msra.mxu2 %v3546_v63 }
 0xc7d   :  { %v2136_v11 = vpop.permute.xlu0 %2135  ;;  %v2336_v55 = vpop.permute.xlu1 %2335 }
 0xc7e   :  { %2140 = vst.msk [vmem:[#allocation2 + $0x8] sm:$0xff] %vm666_vm4, %v2136_v11  ;;  %v3533_v11 = vld [vmem:[%s5355_s3 + $0x50] sm:$0xf] }
 0xc7f   :  { %2341 = vst.msk [vmem:[#allocation2 + $0x10] sm:$0xff] %vm452_vm2, %v2336_v55  ;;  %v3724_v55 = vld [vmem:[%s5355_s3 + $0x54] sm:$0xf0] }
 0xc85   :  { %v2338_v32 = vpop.permute.xlu0 %2337  ;;  %v2556_v35 = vld [vmem:[#allocation2 + $0x8] sm:$0xff] }
 0xc86   :  { %2342 = vst.msk [vmem:[#allocation2 + $0x18] sm:$0xff] %vm452_vm2, %v2338_v32  ;;  %v2568_v37 = vpack.c.bf16 %v2556_v35, %v2555_v15  ;;  %v3723_v32 = vld [vmem:[%s5355_s3 + $0x54] sm:$0xf]  ;;  %v3534_v35 = vor.u32 %v3724_v55, %v3533_v11  ;;  %v3733_v55 = vld [vmem:[%s5356_s4 + $0xa0] sm:$0xff] }
 0xc88   :  { %3512 = vmatmul.msk.bf16.vlgmr.msrb.gmra.mxu1 %vm51_vm0, %v2568_v37  ;;  %v3535_v37 = vld [vmem:[%s5355_s3 + $0x58] sm:$0xf0]  ;;  %2792 = vmatpush.bf16.msra.mxu3 %v3534_v35 }
 0xc8b   :  { %v2442_v21 = vpop.permute.xlu1 %2441 }
 0xc8c   :  { %2447 = vst.msk [vmem:[#allocation2 + $0x10] sm:$0xff] %vm559_vm3, %v2442_v21 }
 0xc93   :  { %v2444_v16 = vpop.permute.xlu0 %2443 }
 0xc94   :  { %v2548_v3 = vpop.permute.xlu1 %2547  ;;  %2448 = vst.msk [vmem:[#allocation2 + $0x18] sm:$0xff] %vm559_vm3, %v2444_v16  ;;  %v3538_v16 = vor.u32 %v3723_v32, %v3535_v37  ;;  %v3741_v32 = vld [vmem:[%s5356_s4 + $0xe0] sm:$0xff] }
 0xc95   :  { %2553 = vst.msk [vmem:[#allocation2 + $0x10] sm:$0xff] %vm666_vm4, %v2548_v3 }
 0xc96   :  { %2811 = vmatpush.bf16.msra.mxu2 %v3538_v16 }
 0xc9c   :  { %v2557_v29 = vld [vmem:[#allocation2 + $0x10] sm:$0xff] }
 0xc9f   :  { %v2550_v38 = vpop.permute.xlu2 %2549 }
 0xca0   :  { %2554 = vst.msk [vmem:[#allocation2 + $0x18] sm:$0xff] %vm666_vm4, %v2550_v38  ;;  %v3525_v38 = vld [vmem:[%s5355_s3 + $0x40] sm:$0xf] }
 0xca7   :  { %v2558_v33 = vld [vmem:[#allocation2 + $0x18] sm:$0xff] }
 0xca8   :  { %v2569_v10 = vpack.c.bf16 %v2558_v33, %v2557_v29  ;;  %v3722_v29 = vld [vmem:[%s5355_s3 + $0x44] sm:$0xf0] }
 0xca9   :  { %v3526_v33 = vor.u32 %v3722_v29, %v3525_v38 }
 0xcaa   :  { %3513 = vmatmul.msk.bf16.gmra.mxu1 %vm51_vm0, %v2569_v10  ;;  %v3721_v10 = vld [vmem:[%s5355_s3 + $0x44] sm:$0xf] }
 0xcab   :  { %2793 = vmatpush.bf16.msra.mxu3 %v3526_v33 }
 0xd05   :  { %v2610_v56 = vpop.f32.mrf.mxu1 }
 0xd06   :  { %v2611_v41 = vadd.f32 %v2610_v56, %v2570_v22 }
 0xd08   :  { %v5135_v28 = vadd.f32 %v2611_v41, %v4695_v44 }
 0xd0a   :  { %v2624_v24 = vsel %vm51_vm0, %v5135_v28, 0.0 }
 0xd0b   :  { %2625 = vadd.xlane.f32.xlu0 %v2624_v24 }
 0xd0d   :  { %v2612_v52 = vpop.f32.mrf.mxu1 }
 0xd0e   :  { %v2613_v7 = vadd.f32 %v2612_v52, %v2570_v22 }
 0xd10   :  { %v5140_v8 = vadd.f32 %v2613_v7, %v4700_v49 }
 0xd12   :  { %v2627_v47 = vsel %vm51_vm0, %v5140_v8, 0.0 }
 0xd13   :  { %2628 = vadd.xlane.f32.xlu1 %v2627_v47 }
 0xd27   :  { %v2615_v9 = vpop.f32.mrf.mxu1 }
 0xd28   :  { %v2616_v18 = vadd.f32 %v2615_v9, %v2570_v22 }
 0xd2a   :  { %v5145_v51 = vadd.f32 %v2616_v18, %v4705_v57 }
 0xd2c   :  { %v2630_v44 = vsel %vm51_vm0, %v5145_v51, 0.0 }
 0xd2d   :  { %2631 = vadd.xlane.f32.xlu2 %v2630_v44 }
 0xd2f   :  { %v2617_v61 = vpop.f32.mrf.mxu1 }
 0xd30   :  { %v2618_v26 = vadd.f32 %v2617_v61, %v2570_v22  ;;  %v3527_v22 = vld [vmem:[%s5355_s3 + $0x48] sm:$0xf0] }
 0xd31   :  { %v3530_v56 = vor.u32 %v3721_v10, %v3527_v22 }
 0xd32   :  { %v5150_v34 = vadd.f32 %v2618_v26, %v4710_v58 }
 0xd33   :  { %2812 = vmatpush.bf16.msra.mxu2 %v3530_v56 }
 0xd34   :  { %v2633_v49 = vsel %vm51_vm0, %v5150_v34, 0.0 }
 0xd35   :  { %2634 = vadd.xlane.f32.xlu0 %v2633_v49 }
 0xd7e   :  { %v2626_v19 = vpop.xlane.xlu0 %2625 }
 0xd7f   :  { %v2636_v39 = vmul.f32 %v2626_v19, %v4109_v14 }
 0xd81   :  { %v5156_v5 = vsub.f32 %v5135_v28, %v2636_v39 }
 0xd83   :  { %v2644_v57 = vmul.f32 %v5156_v5, %v5156_v5 }
 0xd85   :  { %v2648_v46 = vsel %vm51_vm0, %v2644_v57, 0.0 }
 0xd86   :  { %2649 = vadd.xlane.f32.xlu1 %v2648_v46  ;;  %v2629_v27 = vpop.xlane.xlu1 %2628 }
 0xd87   :  { %v2637_v58 = vmul.f32 %v2629_v27, %v4109_v14  ;;  %v2712_v27 = vperm.slane %v5131_v43, 2 }
 0xd89   :  { %v5163_v59 = vsub.f32 %v5140_v8, %v2637_v58 }
 0xd8b   :  { %v2645_v36 = vmul.f32 %v5163_v59, %v5163_v59 }
 0xd8d   :  { %v2651_v6 = vsel %vm51_vm0, %v2645_v36, 0.0 }
 0xd8e   :  { %2652 = vadd.xlane.f32.xlu2 %v2651_v6 }
 0xda0   :  { %v2632_v31 = vpop.xlane.xlu2 %2631 }
 0xda1   :  { %v2638_v4 = vmul.f32 %v2632_v31, %v4109_v14  ;;  %v2717_v31 = vperm.slane %v5131_v43, 3 }
 0xda3   :  { %v5170_v30 = vsub.f32 %v5145_v51, %v2638_v4 }
 0xda5   :  { %v2646_v20 = vmul.f32 %v5170_v30, %v5170_v30 }
 0xda7   :  { %v2654_v54 = vsel %vm51_vm0, %v2646_v20, 0.0 }
 0xda8   :  { %v2635_v12 = vpop.xlane.xlu0 %2634  ;;  %2655 = vadd.xlane.f32.xlu0 %v2654_v54 }
 0xda9   :  { %v2639_v0 = vmul.f32 %v2635_v12, %v4109_v14 }
 0xdab   :  { %v5177_v23 = vsub.f32 %v5150_v34, %v2639_v0 }
 0xdad   :  { %v2647_v17 = vmul.f32 %v5177_v23, %v5177_v23 }
 0xdaf   :  { %v2657_v13 = vsel %vm51_vm0, %v2647_v17, 0.0 }
 0xdb0   :  { %2658 = vadd.xlane.f32.xlu1 %v2657_v13 }
 0xdf9   :  { %v2650_v15 = vpop.xlane.xlu1 %2649 }
 0xdfa   :  { %v2660_v21 = vmul.f32 %v2650_v15, %v4109_v14 }
 0xdfc   :  { %v2664_v3 = vadd.f32 1e-05, %v2660_v21 }
 0xdfe   :  { %3978 = vrsqrt.f32 %v2664_v3  ;;  %vm2674_vm2 = vweird.f32 %v2664_v3 }
 0xe01   :  { %v2653_v41 = vpop.xlane.xlu2 %2652 }
 0xe02   :  { %v2661_v24 = vmul.f32 %v2653_v41, %v4109_v14 }
 0xe04   :  { %v3979_v52 = vpop.eup %3978  ;;  %v2665_v7 = vadd.f32 1e-05, %v2661_v24 }
 0xe05   :  { %v2669_v47 = vmul.f32 %v3979_v52, %v2664_v3  ;;  %vm2675_vm14 = vweird.f32 %v3979_v52 }
 0xe06   :  { %3980 = vrsqrt.f32 %v2665_v7  ;;  %vm2676_vm3 = vmor %vm2674_vm2, %vm2675_vm14  ;;  %vm2684_vm7 = vweird.f32 %v2665_v7 }
 0xe07   :  { %v2670_v9 = vmul.f32 %v3979_v52, %v2669_v47 }
 0xe09   :  { %v2671_v18 = vmul.f32 0.5, %v2670_v9  ;;  %v3732_v9 = vld [vmem:[%s5356_s4 + $0x98] sm:$0xff] }
 0xe0b   :  { %v2672_v44 = vsub.f32 1.5, %v2671_v18  ;;  %v3739_v18 = vld [vmem:[%s5356_s4 + $0xd0] sm:$0xff] }
 0xe0c   :  { %v3981_v61 = vpop.eup %3980 }
 0xe0d   :  { %v2673_v26 = vmul.f32 %v3979_v52, %v2672_v44  ;;  %v2679_v49 = vmul.f32 %v3981_v61, %v2665_v7  ;;  %vm2685_vm4 = vweird.f32 %v3981_v61  ;;  %v3730_v44 = vld [vmem:[%s5356_s4 + $0x88] sm:$0xff] }
 0xe0e   :  { %vm2686_vm8 = vmor %vm2684_vm7, %vm2685_vm4 }
 0xe0f   :  { %v2680_v19 = vmul.f32 %v3981_v61, %v2679_v49  ;;  %v2677_v39 = vsel %vm2676_vm3, %v3979_v52, %v2673_v26  ;;  %v3729_v26 = vld [vmem:[%s5356_s4 + $0x80] sm:$0xff] }
 0xe10   :  { %v2708_v58 = vmul.f32 %v2677_v39, %v5156_v5  ;;  %v3736_v5 = vld [vmem:[%s5356_s4 + $0xb8] sm:$0xff]  ;;  %v3737_v49 = vld [vmem:[%s5356_s4 + $0xc0] sm:$0xff] }
 0xe11   :  { %v2681_v57 = vmul.f32 0.5, %v2680_v19  ;;  %2966 = vmatpush.bf16.msra.mxu0 %v3736_v5  ;;  %v3522_v19 = vld [vmem:[%s5358_s6 + $0x2] sm:$0x3] }
 0xe12   :  { %v2713_v4 = vmul.f32 %v2712_v27, %v2708_v58 }
 0xe13   :  { %v2682_v46 = vsub.f32 1.5, %v2681_v57 }
 0xe14   :  { %v2718_v0 = vadd.f32 %v2717_v31, %v2713_v4 }
 0xe15   :  { %v2683_v36 = vmul.f32 %v3981_v61, %v2682_v46  ;;  %2967 = vmatpush.bf16.msra.mxu0 %v3735_v50  ;;  %v2736_v46 = vperm.slane %v3522_v19, 0 }
 0xe17   :  { %v2687_v6 = vsel %vm2686_vm8, %v3981_v61, %v2683_v36  ;;  %v3738_v61 = vld [vmem:[%s5356_s4 + $0xc8] sm:$0xff] }
 0xe18   :  { %v2709_v20 = vmul.f32 %v2687_v6, %v5163_v59  ;;  %v3744_v59 = vld [vmem:[%s5356_s4 + $0xf8] sm:$0xff] }
 0xe19   :  { %2985 = vmatpush.bf16.msra.mxu1 %v3744_v59  ;;  %2968 = vmatpush.bf16.msra.mxu0 %v3734_v2 }
 0xe1a   :  { %v2714_v54 = vmul.f32 %v2712_v27, %v2709_v20 }
 0xe1b   :  { %v2656_v12 = vpop.xlane.xlu0 %2655 }
 0xe1c   :  { %v2719_v17 = vadd.f32 %v2717_v31, %v2714_v54  ;;  %v2662_v13 = vmul.f32 %v2656_v12, %v4109_v14 }
 0xe1d   :  { %2986 = vmatpush.bf16.msra.mxu1 %v3743_v1  ;;  %2969 = vmatpush.bf16.msra.mxu0 %v3733_v55  ;;  %v2869_v55 = vperm.slane %v5131_v43, 5 }
 0xe1e   :  { %v2731_v40 = vpack.c.bf16 %v2719_v17, %v2718_v0  ;;  %v2666_v42 = vadd.f32 1e-05, %v2662_v13 }
 0xe20   :  { %3982 = vrsqrt.f32 %v2666_v42  ;;  %3555 = vmatmul.msk.bf16.vlgmr.msra.gmra.mxu3 %vm51_vm0, %v2731_v40  ;;  %3557 = vmatmul.msk.bf16.vlgmr.msra.gmra.mxu2 %vm51_vm0, %v2731_v40  ;;  %vm2694_vm10 = vweird.f32 %v2666_v42 }
 0xe21   :  { %2987 = vmatpush.bf16.msra.mxu1 %v3742_v45  ;;  %2970 = vmatpush.bf16.msra.mxu0 %v3732_v9 }
 0xe23   :  { %v2659_v48 = vpop.xlane.xlu1 %2658 }
 0xe24   :  { %v2663_v53 = vmul.f32 %v2659_v48, %v4109_v14 }
 0xe25   :  { %2988 = vmatpush.bf16.msra.mxu1 %v3741_v32 }
 0xe26   :  { %v3983_v62 = vpop.eup %3982  ;;  %v2667_v60 = vadd.f32 1e-05, %v2663_v53 }
 0xe27   :  { %v2689_v25 = vmul.f32 %v3983_v62, %v2666_v42  ;;  %vm2695_vm9 = vweird.f32 %v3983_v62 }
 0xe28   :  { %3984 = vrsqrt.f32 %v2667_v60  ;;  %vm2696_vm11 = vmor %vm2694_vm10, %vm2695_vm9  ;;  %vm2704_vm13 = vweird.f32 %v2667_v60 }
 0xe29   :  { %v2690_v63 = vmul.f32 %v3983_v62, %v2689_v25 }
 0xe2b   :  { %v2691_v11 = vmul.f32 0.5, %v2690_v63 }
 0xe2d   :  { %v2692_v15 = vsub.f32 1.5, %v2691_v11 }
 0xe2e   :  { %v3985_v35 = vpop.eup %3984 }
 0xe2f   :  { %v2693_v37 = vmul.f32 %v3983_v62, %v2692_v15  ;;  %v2699_v21 = vmul.f32 %v3985_v35, %v2667_v60  ;;  %vm2705_vm12 = vweird.f32 %v3985_v35 }
 0xe30   :  { %vm2706_vm15 = vmor %vm2704_vm13, %vm2705_vm12 }
 0xe31   :  { %v2700_v16 = vmul.f32 %v3985_v35, %v2699_v21  ;;  %v2697_v3 = vsel %vm2696_vm11, %v3983_v62, %v2693_v37 }
 0xe32   :  { %v2710_v33 = vmul.f32 %v2697_v3, %v5170_v30  ;;  %v3740_v30 = vld [vmem:[%s5356_s4 + $0xd8] sm:$0xff] }
 0xe33   :  { %v2701_v38 = vmul.f32 0.5, %v2700_v16  ;;  %2989 = vmatpush.bf16.msra.mxu1 %v3740_v30 }
 0xe34   :  { %v2715_v41 = vmul.f32 %v2712_v27, %v2710_v33 }
 0xe35   :  { %v2702_v29 = vsub.f32 1.5, %v2701_v38 }
 0xe36   :  { %v2720_v52 = vadd.f32 %v2717_v31, %v2715_v41 }
 0xe37   :  { %v2703_v10 = vmul.f32 %v3985_v35, %v2702_v29  ;;  %2990 = vmatpush.bf16.msra.mxu1 %v3739_v18 }
 0xe39   :  { %v2707_v22 = vsel %vm2706_vm15, %v3985_v35, %v2703_v10 }
 0xe3a   :  { %v2711_v56 = vmul.f32 %v2707_v22, %v5177_v23  ;;  %v3731_v23 = vld [vmem:[%s5356_s4 + $0x90] sm:$0xff] }
 0xe3b   :  { %2971 = vmatpush.bf16.msra.mxu0 %v3731_v23  ;;  %2991 = vmatpush.bf16.msra.mxu1 %v3738_v61 }
 0xe3c   :  { %v2716_v24 = vmul.f32 %v2712_v27, %v2711_v56  ;;  %v2737_v27 = vperm.slane %v3522_v19, 1 }
 0xe3e   :  { %v2721_v7 = vadd.f32 %v2717_v31, %v2716_v24 }
 0xe3f   :  { %2972 = vmatpush.bf16.msra.mxu0 %v3730_v44  ;;  %2992 = vmatpush.bf16.msra.mxu1 %v3737_v49 }
 0xe40   :  { %v2732_v47 = vpack.c.bf16 %v2721_v7, %v2720_v52 }
 0xe42   :  { %3556 = vmatmul.msk.bf16.gmra.mxu3 %vm51_vm0, %v2732_v47  ;;  %3558 = vmatmul.msk.bf16.gmra.mxu2 %vm51_vm0, %v2732_v47 }
 0xe43   :  { %2973 = vmatpush.bf16.msra.mxu0 %v3729_v26 }
 0xea3   :  { %v2795_v39 = vpop.f32.mrf.mxu3  ;;  %v2814_v57 = vpop.f32.mrf.mxu2 }
 0xea4   :  { %v2796_v58 = vadd.f32 %v2795_v39, %v2736_v46  ;;  %v2815_v36 = vadd.f32 %v2814_v57, %v2737_v27 }
 0xea6   :  { %v2824_v54 = vmax.f32 %v2796_v58, 0.0  ;;  %v2825_v12 = vmax.f32 %v2815_v36, 0.0 }
 0xeab   :  { %v2797_v6 = vpop.f32.mrf.mxu3  ;;  %v2816_v31 = vpop.f32.mrf.mxu2 }
 0xeac   :  { %v2798_v4 = vadd.f32 %v2797_v6, %v2736_v46  ;;  %v2817_v20 = vadd.f32 %v2816_v31, %v2737_v27 }
 0xeae   :  { %v2826_v0 = vmax.f32 %v2798_v4, 0.0  ;;  %v2827_v17 = vmax.f32 %v2817_v20, 0.0 }
 0xeb0   :  { %v2865_v13 = vpack.c.bf16 %v2826_v0, %v2824_v54  ;;  %v2866_v40 = vpack.c.bf16 %v2827_v17, %v2825_v12  ;;  %v3748_v0 = vld [vmem:[%s5360_s8 + $0x18] sm:$0xff]  ;;  %v3747_v17 = vld [vmem:[%s5360_s8 + $0x10] sm:$0xff] }
 0xeb1   :  { %3156 = vmatpush.bf16.msrb.mxu3 %v3748_v0 }
 0xeb2   :  { %2974 = vmatmul.bf16.vlgmr.msra.gmra.mxu0 %v2865_v13  ;;  %2993 = vmatmul.bf16.vlgmr.msra.gmra.mxu1 %v2866_v40  ;;  %v3746_v40 = vld [vmem:[%s5360_s8 + $0x8] sm:$0xff] }
 0xeb5   :  { %3157 = vmatpush.bf16.msrb.mxu3 %v3747_v17 }
 0xeb9   :  { %3158 = vmatpush.bf16.msrb.mxu3 %v3746_v40 }
 0xec5   :  { %v2800_v42 = vpop.f32.mrf.mxu3  ;;  %v2819_v5 = vpop.f32.mrf.mxu2 }
 0xec6   :  { %v2801_v59 = vadd.f32 %v2800_v42, %v2736_v46  ;;  %v2820_v48 = vadd.f32 %v2819_v5, %v2737_v27 }
 0xec8   :  { %v2828_v60 = vmax.f32 %v2801_v59, 0.0  ;;  %v2829_v25 = vmax.f32 %v2820_v48, 0.0  ;;  %v3745_v59 = vld [vmem:[%s5360_s8] sm:$0xff] }
 0xec9   :  { %3159 = vmatpush.bf16.msrb.mxu3 %v3745_v59 }
 0xecd   :  { %v2802_v53 = vpop.f32.mrf.mxu3  ;;  %v2821_v50 = vpop.f32.mrf.mxu2 }
 0xece   :  { %v2803_v1 = vadd.f32 %v2802_v53, %v2736_v46  ;;  %v2822_v62 = vadd.f32 %v2821_v50, %v2737_v27 }
 0xed0   :  { %v2830_v2 = vmax.f32 %v2803_v1, 0.0  ;;  %v2831_v45 = vmax.f32 %v2822_v62, 0.0 }
 0xed2   :  { %v2867_v63 = vpack.c.bf16 %v2830_v2, %v2828_v60  ;;  %v2868_v11 = vpack.c.bf16 %v2831_v45, %v2829_v25 }
 0xed4   :  { %2979 = vmatmul.bf16.gmra.mxu0 %v2867_v63  ;;  %2998 = vmatmul.bf16.gmra.mxu1 %v2868_v11 }
 0xf2f   :  { %v2975_v32 = vpop.f32.mrf.mxu0  ;;  %v2994_v15 = vpop.f32.mrf.mxu1 }
 0xf30   :  { %v2976_v35 = vadd.f32 %v2975_v32, %v2869_v55 }
 0xf32   :  { %v2995_v37 = vadd.f32 %v2994_v15, %v2976_v35 }
 0xf34   :  { %v3004_v21 = vadd.f32 %v2995_v37, %v5135_v28  ;;  %v3821_v37 = vld [vmem:[%s5359_s7] ss:$0 sm:$0xff] }
 0xf36   :  { %v3010_v16 = vsel %vm51_vm0, %v3004_v21, 0.0 }
 0xf37   :  { %v2977_v3 = vpop.f32.mrf.mxu0  ;;  %3011 = vadd.xlane.f32.xlu2 %v3010_v16  ;;  %v2996_v29 = vpop.f32.mrf.mxu1 }
 0xf38   :  { %v2978_v38 = vadd.f32 %v2977_v3, %v2869_v55 }
 0xf3a   :  { %v2997_v33 = vadd.f32 %v2996_v29, %v2978_v38  ;;  %v3822_v38 = vld [vmem:[%s5359_s7 + $0x1] ss:$0 sm:$0xff] }
 0xf3c   :  { %v3005_v10 = vadd.f32 %v2997_v33, %v5140_v8 }
 0xf3e   :  { %v3013_v22 = vsel %vm51_vm0, %v3005_v10, 0.0 }
 0xf3f   :  { %3014 = vadd.xlane.f32.xlu0 %v3013_v22 }
 0xf51   :  { %v2980_v56 = vpop.f32.mrf.mxu0  ;;  %v2999_v43 = vpop.f32.mrf.mxu1 }
 0xf52   :  { %v2981_v41 = vadd.f32 %v2980_v56, %v2869_v55 }
 0xf54   :  { %v3000_v24 = vadd.f32 %v2999_v43, %v2981_v41 }
 0xf56   :  { %v3006_v52 = vadd.f32 %v3000_v24, %v5145_v51 }
 0xf58   :  { %v3016_v28 = vsel %vm51_vm0, %v3006_v52, 0.0 }
 0xf59   :  { %v2982_v7 = vpop.f32.mrf.mxu0  ;;  %3017 = vadd.xlane.f32.xlu1 %v3016_v28  ;;  %v3001_v9 = vpop.f32.mrf.mxu1 }
 0xf5a   :  { %v2983_v47 = vadd.f32 %v2982_v7, %v2869_v55 }
 0xf5c   :  { %v3002_v30 = vadd.f32 %v3001_v9, %v2983_v47 }
 0xf5e   :  { %v3007_v23 = vadd.f32 %v3002_v30, %v5150_v34 }
 0xf60   :  { %v3019_v8 = vsel %vm51_vm0, %v3007_v23, 0.0 }
 0xf61   :  { %3020 = vadd.xlane.f32.xlu2 %v3019_v8 }
 0xfaa   :  { %v3012_v18 = vpop.xlane.xlu2 %3011 }
 0xfab   :  { %v3022_v44 = vmul.f32 %v3012_v18, %v4109_v14 }
 0xfad   :  { %v3026_v61 = vsub.f32 %v3004_v21, %v3022_v44 }
 0xfaf   :  { %v3030_v26 = vmul.f32 %v3026_v61, %v3026_v61 }
 0xfb1   :  { %v3034_v49 = vsel %vm51_vm0, %v3030_v26, 0.0 }
 0xfb2   :  { %v3015_v51 = vpop.xlane.xlu0 %3014  ;;  %3035 = vadd.xlane.f32.xlu0 %v3034_v49 }
 0xfb3   :  { %v3023_v19 = vmul.f32 %v3015_v51, %v4109_v14 }
 0xfb5   :  { %v3027_v39 = vsub.f32 %v3005_v10, %v3023_v19 }
 0xfb7   :  { %v3031_v57 = vmul.f32 %v3027_v39, %v3027_v39 }
 0xfb9   :  { %v3037_v46 = vsel %vm51_vm0, %v3031_v57, 0.0 }
 0xfba   :  { %3038 = vadd.xlane.f32.xlu1 %v3037_v46 }
 0xfcc   :  { %v3018_v34 = vpop.xlane.xlu1 %3017 }
 0xfcd   :  { %v3024_v27 = vmul.f32 %v3018_v34, %v4109_v14 }
 0xfcf   :  { %v5309_v58 = vsub.f32 %v3006_v52, %v3024_v27 }
 0xfd1   :  { %v3032_v36 = vmul.f32 %v5309_v58, %v5309_v58 }
 0xfd3   :  { %v3040_v6 = vsel %vm51_vm0, %v3032_v36, 0.0 }
 0xfd4   :  { %3041 = vadd.xlane.f32.xlu2 %v3040_v6  ;;  %v3021_v31 = vpop.xlane.xlu2 %3020 }
 0xfd5   :  { %v3025_v4 = vmul.f32 %v3021_v31, %v4109_v14 }
 0xfd7   :  { %v5315_v20 = vsub.f32 %v3007_v23, %v3025_v4 }
 0xfd9   :  { %v3033_v54 = vmul.f32 %v5315_v20, %v5315_v20 }
 0xfdb   :  { %v3043_v12 = vsel %vm51_vm0, %v3033_v54, 0.0  ;;  %v3823_v54 = vld [vmem:[%s5361_s9] ss:$0 sm:$0xff]  ;;  %s4036_s9 = smov 128  }
 0xfdc   :  { %3044 = vadd.xlane.f32.xlu0 %v3043_v12 }
0x1025   :  { %v3036_v13 = vpop.xlane.xlu0 %3035 }
0x1026   :  { %v3046_v42 = vmul.f32 %v3036_v13, %v4109_v14 }
0x1028   :  { %v3050_v5 = vadd.f32 1e-05, %v3046_v42 }
0x102a   :  { %3986 = vrsqrt.f32 %v3050_v5  ;;  %vm3060_vm5 = vweird.f32 %v3050_v5 }
0x102d   :  { %v3039_v48 = vpop.xlane.xlu1 %3038 }
0x102e   :  { %v3047_v53 = vmul.f32 %v3039_v48, %v4109_v14 }
0x1030   :  { %v3987_v50 = vpop.eup %3986  ;;  %v3051_v1 = vadd.f32 1e-05, %v3047_v53 }
0x1031   :  { %v3055_v62 = vmul.f32 %v3987_v50, %v3050_v5  ;;  %vm3061_vm1 = vweird.f32 %v3987_v50 }
0x1032   :  { %3988 = vrsqrt.f32 %v3051_v1  ;;  %vm3062_vm6 = vmor %vm3060_vm5, %vm3061_vm1  ;;  %vm3070_vm2 = vweird.f32 %v3051_v1 }
0x1033   :  { %v3056_v60 = vmul.f32 %v3987_v50, %v3055_v62 }
0x1035   :  { %v3057_v25 = vmul.f32 0.5, %v3056_v60 }
0x1037   :  { %v3058_v2 = vsub.f32 1.5, %v3057_v25 }
0x1038   :  { %v3989_v45 = vpop.eup %3988 }
0x1039   :  { %v3059_v63 = vmul.f32 %v3987_v50, %v3058_v2  ;;  %v3065_v11 = vmul.f32 %v3989_v45, %v3051_v1  ;;  %vm3071_vm14 = vweird.f32 %v3989_v45 }
0x103a   :  { %vm3072_vm3 = vmor %vm3070_vm2, %vm3071_vm14 }
0x103b   :  { %v3066_v55 = vmul.f32 %v3989_v45, %v3065_v11  ;;  %v3063_v32 = vsel %vm3062_vm6, %v3987_v50, %v3059_v63 }
0x103c   :  { %v3094_v21 = vmul.f32 %v3063_v32, %v3026_v61 }
0x103d   :  { %v3067_v15 = vmul.f32 0.5, %v3066_v55 }
0x103e   :  { %v3099_v29 = vmul.f32 %v3821_v37, %v3094_v21 }
0x103f   :  { %v3068_v35 = vsub.f32 1.5, %v3067_v15 }
0x1040   :  { %v3104_v56 = vadd.f32 %v3822_v38, %v3099_v29 }
0x1041   :  { %v3069_v16 = vmul.f32 %v3989_v45, %v3068_v35 }
0x1043   :  { %v3073_v3 = vsel %vm3072_vm3, %v3989_v45, %v3069_v16 }
0x1044   :  { %v3095_v33 = vmul.f32 %v3073_v3, %v3027_v39 }
0x1046   :  { %v3100_v10 = vmul.f32 %v3821_v37, %v3095_v33 }
0x1047   :  { %v3042_v22 = vpop.xlane.xlu2 %3041 }
0x1048   :  { %v3105_v43 = vadd.f32 %v3822_v38, %v3100_v10  ;;  %v3048_v41 = vmul.f32 %v3042_v22, %v4109_v14 }
0x104a   :  { %v3116_v24 = vpack.c.bf16 %v3105_v43, %v3104_v56  ;;  %v3052_v52 = vadd.f32 1e-05, %v3048_v41 }
0x104c   :  { %3990 = vrsqrt.f32 %v3052_v52  ;;  %3671 = vmatmul.msk.bf16.vlgmr.msrb.gmra.mxu3 %vm51_vm0, %v3116_v24  ;;  %vm3080_vm7 = vweird.f32 %v3052_v52 }
0x104f   :  { %v3045_v28 = vpop.xlane.xlu0 %3044 }
0x1050   :  { %v3049_v7 = vmul.f32 %v3045_v28, %v4109_v14 }
0x1052   :  { %v3991_v47 = vpop.eup %3990  ;;  %v3053_v9 = vadd.f32 1e-05, %v3049_v7 }
0x1053   :  { %v3075_v30 = vmul.f32 %v3991_v47, %v3052_v52  ;;  %vm3081_vm4 = vweird.f32 %v3991_v47 }
0x1054   :  { %3992 = vrsqrt.f32 %v3053_v9  ;;  %vm3082_vm8 = vmor %vm3080_vm7, %vm3081_vm4  ;;  %vm3090_vm10 = vweird.f32 %v3053_v9 }
0x1055   :  { %v3076_v23 = vmul.f32 %v3991_v47, %v3075_v30 }
0x1057   :  { %v3077_v8 = vmul.f32 0.5, %v3076_v23 }
0x1059   :  { %v3078_v18 = vsub.f32 1.5, %v3077_v8 }
0x105a   :  { %v3993_v44 = vpop.eup %3992 }
0x105b   :  { %v3079_v61 = vmul.f32 %v3991_v47, %v3078_v18  ;;  %v3085_v26 = vmul.f32 %v3993_v44, %v3053_v9  ;;  %vm3091_vm9 = vweird.f32 %v3993_v44 }
0x105c   :  { %vm3092_vm11 = vmor %vm3090_vm10, %vm3091_vm9 }
0x105d   :  { %v3086_v49 = vmul.f32 %v3993_v44, %v3085_v26  ;;  %v3083_v51 = vsel %vm3082_vm8, %v3991_v47, %v3079_v61 }
0x105e   :  { %v3096_v14 = vmul.f32 %v3083_v51, %v5309_v58 }
0x105f   :  { %v3087_v19 = vmul.f32 0.5, %v3086_v49 }
0x1060   :  { %v3101_v27 = vmul.f32 %v3821_v37, %v3096_v14 }
0x1061   :  { %v3088_v39 = vsub.f32 1.5, %v3087_v19 }
0x1062   :  { %v3106_v6 = vadd.f32 %v3822_v38, %v3101_v27 }
0x1063   :  { %v3089_v57 = vmul.f32 %v3993_v44, %v3088_v39 }
0x1065   :  { %v3093_v46 = vsel %vm3092_vm11, %v3993_v44, %v3089_v57 }
0x1066   :  { %v3097_v34 = vmul.f32 %v3093_v46, %v5315_v20 }
0x1068   :  { %v3102_v36 = vmul.f32 %v3821_v37, %v3097_v34 }
0x106a   :  { %v3107_v31 = vadd.f32 %v3822_v38, %v3102_v36 }
0x106c   :  { %v3117_v4 = vpack.c.bf16 %v3107_v31, %v3106_v6 }
0x106e   :  { %3672 = vmatmul.msk.bf16.gmra.mxu3 %vm51_vm0, %v3117_v4 }
0x10cf   :  { %v3161_v12 = vpop.f32.mrf.mxu3 }
0x10d0   :  { %v3162_v0 = vadd.f32 %v3823_v54, %v3161_v12 }
0x10d2   :  { %3171 = vst [vmem:[#allocation3] sm:$0xff] %v3162_v0 }
0x10d7   :  { %v3163_v58 = vpop.f32.mrf.mxu3 }
0x10d8   :  { %v3164_v17 = vadd.f32 %v3823_v54, %v3163_v58 }
0x10da   :  { %3172 = vst [vmem:[#allocation3 + $0x8] sm:$0xff] %v3164_v17 }
0x10f1   :  { %v3166_v13 = vpop.f32.mrf.mxu3 }
0x10f2   :  { %v3167_v40 = vadd.f32 %v3823_v54, %v3166_v13 }
0x10f4   :  { %3173 = vst [vmem:[#allocation3 + $0x10] sm:$0xff] %v3167_v40 }
0x10f9   :  { %v3168_v20 = vpop.f32.mrf.mxu3 }
0x10fa   :  { %v3169_v42 = vadd.f32 %v3823_v54, %v3168_v20 }
0x10fc   :  { %3174 = vst [vmem:[#allocation3 + $0x18] sm:$0xff] %v3169_v42 }
0x10fd   :  { %3187 = dma.vmem_to_hbm [thread:$0]  %s3180_s11, 512, %s3182_s14, [#allocation4], %s4036_s9, %s4036_s9, %s4037_s22  }
0x10fe   :  { %4024 = dma.done.wait [#allocation4], 512  }
0x10ff   :  { %4025 = vsyncadd [#allocation4], 4294966784 }
0x1100   :  { %3192 = vsyncpa [#allocation4], 1 }

</bundles_post_ra>
